<compile_context>
chip_gen: v5e
topology: v5e:2x2
jax: 0.10.0
libtpu: 0.0.40
codegen_flags: <defaults>
</compile_context>

<pallas_src>
import functools
import numpy as np
import jax
import jax.numpy as jnp
from jax import lax
from jax.experimental import pallas as pl
from jax.experimental.pallas import tpu as pltpu


def _round_up(x, m):
    return ((x + m - 1) // m) * m


def rnn_kernel(*refs, num_layers, seq_len):
    """One grid step == one batch block. The full time recurrence runs inside."""
    if num_layers > 1:
        (len_ref, x_ref, w_x0_ref, w_h0_ref, w_rest_ref, b0_ref, b_rest_ref,
         fc_w_ref, fc_b_ref, out_ref, xproj_ref, tops_ref) = refs
    else:
        (len_ref, x_ref, w_x0_ref, w_h0_ref, b0_ref,
         fc_w_ref, fc_b_ref, out_ref, xproj_ref, tops_ref) = refs
        w_rest_ref = b_rest_ref = None

    T = seq_len                      # effective length == max(lengths)
    Bb = x_ref.shape[1]
    D = x_ref.shape[2]
    Hp = w_h0_ref.shape[0]           # padded hidden width (multiple of 128)
    Op = out_ref.shape[-1]           # padded output width (multiple of 128)
    L = num_layers

    # --- hoisted, densified layer-0 input projection: one (T*Bb, D) @ (D, Hp) dot ---
    x2 = x_ref[...].reshape(T * Bb, D)
    xproj = jnp.dot(x2, w_x0_ref[...], preferred_element_type=jnp.float32) + b0_ref[...]
    xproj_ref[...] = xproj.reshape(T, Bb, Hp)

    # --- hoist all weight / bias loads out of the time loop (vreg-resident) ---
    w_h0 = w_h0_ref[...]                                  # (Hp, Hp)
    if L > 1:
        w_rest = w_rest_ref[...]                          # (L-1, 2*Hp, Hp)
        b_rest = b_rest_ref[...]                          # (L-1, 1, Hp)

    lens = len_ref[...]                                   # (Bb, 1) int32, loaded once

    # Hidden state of every layer kept in the fori_loop carry (no VMEM round-trip).
    h_init = tuple(jnp.zeros((Bb, Hp), jnp.float32) for _ in range(L))

    def step(t, hs):
        mask = t < lens                                   # (Bb, 1): still inside sequence?

        # layer 0: input part precomputed -> one recurrent matmul per step.
        h0_prev = hs[0]
        pre0 = xproj_ref[t] + jnp.dot(h0_prev, w_h0,
                                      preferred_element_type=jnp.float32)
        h0_new = jnp.where(mask, jnp.tanh(pre0), h0_prev)  # freeze once t >= length[b]

        new_hs = [h0_new]
        below = h0_new
        # layers 1..L-1: fused [input_below | own_hidden] @ [W_ih^T; W_hh^T]
        # -> exactly one (Bb, 2*Hp) @ (2*Hp, Hp) MXU matmul per layer per step.
        for l in range(1, L):
            h_prev = hs[l]
            z = jnp.concatenate([below, h_prev], axis=1)   # (Bb, 2*Hp), vreg-aligned
            pre = (jnp.dot(z, w_rest[l - 1],
                           preferred_element_type=jnp.float32)
                   + b_rest[l - 1])
            h_new = jnp.where(mask, jnp.tanh(pre), h_prev)
            new_hs.append(h_new)
            below = h_new

        # pad_packed_sequence zero-pads positions past each sequence's length.
        # Lane-dense (Bb, Hp) store, off the recurrence critical path.
        tops_ref[t] = jnp.where(mask, below, 0.0)
        return tuple(new_hs)

    # Full unroll for short T; partial unroll otherwise so layer-0 of step t+1
    # can overlap upper layers of step t (state is register-resident now).
    lax.fori_loop(0, T, step, h_init, unroll=(True if T <= 16 else 2))

    # --- fc head applied once over the whole (T*Bb, Hp) slab: lane-dense, one store ---
    tops2 = tops_ref[...].reshape(T * Bb, Hp)
    y = (jnp.dot(tops2, fc_w_ref[...], preferred_element_type=jnp.float32)
         + fc_b_ref[...])
    out_ref[...] = y.reshape(T, Bb, Op)


def recurrent_model_forward(x, lengths, params, *, batch_block=None):
    """x: (B, T, D) float32 batch_first. lengths: host-side ints (like td_lengths)."""
    B0, T_full, D = x.shape
    L = params["num_layers"]
    Hp = params["w_h0"].shape[0]
    Op = params["fc_w"].shape[1]
    O = params["output_dim"]

    lengths_np = np.asarray(lengths).astype(np.int32)
    t_max = int(lengths_np.max())                 # pad_packed -> max(lengths)

    # Pad batch to a multiple of 8 sublanes; padded rows get length 0 (fully masked).
    B = _round_up(B0, 8)
    if B != B0:
        x = jnp.concatenate(
            [x, jnp.zeros((B - B0, T_full, D), x.dtype)], axis=0)
        lengths_np = np.concatenate(
            [lengths_np, np.zeros((B - B0,), np.int32)], axis=0)

    # Batch split only on multi-TensorCore chips (v7x); single block on v5e/v6e.
    if batch_block is None:
        batch_block = B
        try:
            kind = jax.devices()[0].device_kind.lower()
            if ("v7" in kind or "7x" in kind) and B % 16 == 0:
                batch_block = B // 2
        except Exception:
            pass
    assert B % batch_block == 0
    n_blk = B // batch_block

    # Time-major, truncated to max(lengths): steps past t_max are pure waste.
    x_tbd = jnp.transpose(x, (1, 0, 2))[:t_max]            # (t_max, B, D)
    len_col = jnp.asarray(lengths_np, jnp.int32).reshape(B, 1)

    kernel = functools.partial(rnn_kernel, num_layers=L, seq_len=t_max)

    args = [len_col, x_tbd, params["w_x0"], params["w_h0"]]
    in_specs = [
        pl.BlockSpec((batch_block, 1), lambda i: (i, 0)),              # lengths
        pl.BlockSpec((t_max, batch_block, D), lambda i: (0, i, 0)),    # x (time-major)
        pl.BlockSpec((D, Hp), lambda i: (0, 0)),                       # W_ih0^T (padded)
        pl.BlockSpec((Hp, Hp), lambda i: (0, 0)),                      # W_hh0^T (padded)
    ]
    if L > 1:
        args.append(params["w_rest"])                                  # (L-1, 2Hp, Hp)
        in_specs.append(pl.BlockSpec((L - 1, 2 * Hp, Hp), lambda i: (0, 0, 0)))
    args.append(params["b0"])                                          # (1, Hp)
    in_specs.append(pl.BlockSpec((1, Hp), lambda i: (0, 0)))
    if L > 1:
        args.append(params["b_rest"])                                  # (L-1, 1, Hp)
        in_specs.append(pl.BlockSpec((L - 1, 1, Hp), lambda i: (0, 0, 0)))
    args += [params["fc_w"], params["fc_b"]]
    in_specs += [pl.BlockSpec((Hp, Op), lambda i: (0, 0)),             # fc weight (padded)
                 pl.BlockSpec((1, Op), lambda i: (0, 0))]              # fc bias   (padded)

    out_tbo = pl.pallas_call(
        kernel,
        out_shape=jax.ShapeDtypeStruct((t_max, B, Op), jnp.float32),
        grid_spec=pltpu.PrefetchScalarGridSpec(
            num_scalar_prefetch=0,
            grid=(n_blk,),
            in_specs=in_specs,
            out_specs=pl.BlockSpec((t_max, batch_block, Op), lambda i: (0, i, 0)),
            scratch_shapes=[
                pltpu.VMEM((t_max, batch_block, Hp), jnp.float32),   # hoisted layer-0 x-proj
                pltpu.VMEM((t_max, batch_block, Hp), jnp.float32),   # top-layer outputs
            ]),
        compiler_params=pltpu.CompilerParams(
            dimension_semantics=("parallel",)),
    )(*args)

    out = jnp.transpose(out_tbo, (1, 0, 2))                # (B, t_max, Op) batch_first
    return out[:B0, :, :O]                                 # strip batch / lane padding


def init_params(key, input_dim, hidden_dim, layer_dim, output_dim):
    """Deterministic init matching nn.RNN / nn.Linear shapes, plus padded kernel packing."""
    H, D, L, O = hidden_dim, input_dim, layer_dim, output_dim
    Hp = _round_up(H, 128)
    Op = _round_up(O, 128)
    stdv = 1.0 / np.sqrt(H)
    keys = jax.random.split(key, 4 * L + 2)
    u = lambda k, s: jax.random.uniform(k, s, jnp.float32, -stdv, stdv)

    w_ih = [u(keys[4 * l + 0], (H, D if l == 0 else H)) for l in range(L)]
    w_hh = [u(keys[4 * l + 1], (H, H)) for l in range(L)]
    b_ih = [u(keys[4 * l + 2], (H,)) for l in range(L)]
    b_hh = [u(keys[4 * l + 3], (H,)) for l in range(L)]
    fc_w = u(keys[-2], (O, H))
    fc_b = u(keys[-1], (O,))

    raw = dict(w_ih=w_ih, w_hh=w_hh, b_ih=b_ih, b_hh=b_hh, fc_w=fc_w, fc_b=fc_b)

    # ---- zero-padded, transposed packing for the kernel (padded lanes stay 0) ----
    w_x0 = np.zeros((D, Hp), np.float32)
    w_x0[:, :H] = np.asarray(w_ih[0]).T
    w_h0 = np.zeros((Hp, Hp), np.float32)
    w_h0[:H, :H] = np.asarray(w_hh[0]).T
    b0 = np.zeros((1, Hp), np.float32)
    b0[0, :H] = np.asarray(b_ih[0]) + np.asarray(b_hh[0])
    fc_w_p = np.zeros((Hp, Op), np.float32)
    fc_w_p[:H, :O] = np.asarray(fc_w).T
    fc_b_p = np.zeros((1, Op), np.float32)
    fc_b_p[0, :O] = np.asarray(fc_b)

    params = dict(
        num_layers=L,
        output_dim=O,
        w_x0=jnp.asarray(w_x0),                              # (D, Hp)
        w_h0=jnp.asarray(w_h0),                              # (Hp, Hp)
        b0=jnp.asarray(b0),                                  # (1, Hp) combined layer-0 bias
        fc_w=jnp.asarray(fc_w_p),                            # (Hp, Op)
        fc_b=jnp.asarray(fc_b_p),                            # (1, Op)
    )
    if L > 1:
        w_rest = np.zeros((L - 1, 2 * Hp, Hp), np.float32)
        b_rest = np.zeros((L - 1, 1, Hp), np.float32)
        for l in range(1, L):
            w_rest[l - 1, :H, :H] = np.asarray(w_ih[l]).T          # input-from-below part
            w_rest[l - 1, Hp:Hp + H, :H] = np.asarray(w_hh[l]).T   # own-hidden part
            b_rest[l - 1, 0, :H] = np.asarray(b_ih[l]) + np.asarray(b_hh[l])
        params["w_rest"] = jnp.asarray(w_rest)               # (L-1, 2Hp, Hp)
        params["b_rest"] = jnp.asarray(b_rest)               # (L-1, 1, Hp)
    # TODO(synk): optional bf16 weight cast (with f32 accumulation) for large H on v6e/v7x.
    return params, raw


def reference_forward(x, lengths, raw):
    """Pure numpy reference of the PyTorch forward (inference mode)."""
    xnp = np.asarray(x)
    B, T, D = xnp.shape
    L = len(raw["w_hh"])
    H = np.asarray(raw["w_hh"][0]).shape[0]
    lengths = np.asarray(lengths)
    h = [np.zeros((B, H), np.float32) for _ in range(L)]
    tops = []
    for t in range(int(lengths.max())):
        inp = xnp[:, t, :]
        mask = (t < lengths)[:, None]
        for l in range(L):
            pre = (inp @ np.asarray(raw["w_ih"][l]).T
                   + h[l] @ np.asarray(raw["w_hh"][l]).T
                   + np.asarray(raw["b_ih"][l]) + np.asarray(raw["b_hh"][l]))
            h[l] = np.where(mask, np.tanh(pre), h[l])
            inp = h[l]
        tops.append(np.where(mask, inp, 0.0))
    top = np.stack(tops, axis=1)                                       # (B, t_max, H)
    y = top @ np.asarray(raw["fc_w"]).T + np.asarray(raw["fc_b"])
    return y


if __name__ == "__main__":
    # Small shapes consistent with the module (RNN cell, tanh, 3 layers).
    B, T, D, H, L, O = 8, 8, 16, 32, 3, 2
    lengths = [8, 6, 5, 8, 3, 7, 8, 4]          # max == T so padded length == T

    key = jax.random.PRNGKey(0)
    k_x, k_p = jax.random.split(key)
    x = jax.random.normal(k_x, (B, T, D), jnp.float32)
    params, raw = init_params(k_p, D, H, L, O)

    out = recurrent_model_forward(x, lengths, params)
    out = jax.block_until_ready(out)

    ref = reference_forward(x, lengths, raw)
    np.testing.assert_allclose(np.asarray(out), ref, rtol=1e-4, atol=1e-4)

    print("KERNEL_OK")
</pallas_src>

<mosaic_0001>
module attributes {stable_mosaic.version = 11 : i64} {
  func.func @rnn_kernel(%arg0: i32, %arg1: memref<8x1xi32, #tpu.memory_space<vmem>>, %arg2: memref<8x8x16xf32, #tpu.memory_space<vmem>>, %arg3: memref<16x128xf32, #tpu.memory_space<vmem>>, %arg4: memref<128x128xf32, #tpu.memory_space<vmem>>, %arg5: memref<2x256x128xf32, #tpu.memory_space<vmem>>, %arg6: memref<1x128xf32, #tpu.memory_space<vmem>>, %arg7: memref<2x1x128xf32, #tpu.memory_space<vmem>>, %arg8: memref<128x128xf32, #tpu.memory_space<vmem>>, %arg9: memref<1x128xf32, #tpu.memory_space<vmem>>, %arg10: memref<8x8x128xf32, #tpu.memory_space<vmem>>, %arg11: memref<8x8x128xf32, #tpu.memory_space<vmem>>, %arg12: memref<8x8x128xf32, #tpu.memory_space<vmem>>) attributes {dimension_semantics = [#tpu.dimension_semantics<parallel>], iteration_bounds = array<i64: 1>, scalar_prefetch = 0 : i64, scratch_operands = 2 : i64, tpu.core_type = #tpu.core_type<tc>, window_params = [{transform_indices = @transform_0, window_bounds = array<i64: 8, 1>}, {transform_indices = @transform_1, window_bounds = array<i64: 8, 8, 16>}, {pipeline_mode = #tpu.pipeline_mode<synchronous>, transform_indices = @transform_2, window_bounds = array<i64: 16, 128>}, {pipeline_mode = #tpu.pipeline_mode<synchronous>, transform_indices = @transform_3, window_bounds = array<i64: 128, 128>}, {pipeline_mode = #tpu.pipeline_mode<synchronous>, transform_indices = @transform_4, window_bounds = array<i64: 2, 256, 128>}, {pipeline_mode = #tpu.pipeline_mode<synchronous>, transform_indices = @transform_5, window_bounds = array<i64: 1, 128>}, {pipeline_mode = #tpu.pipeline_mode<synchronous>, transform_indices = @transform_6, window_bounds = array<i64: 2, 1, 128>}, {pipeline_mode = #tpu.pipeline_mode<synchronous>, transform_indices = @transform_7, window_bounds = array<i64: 128, 128>}, {pipeline_mode = #tpu.pipeline_mode<synchronous>, transform_indices = @transform_8, window_bounds = array<i64: 1, 128>}, {transform_indices = @transform_9, window_bounds = array<i64: 8, 8, 128>}]} {
    %c0 = arith.constant 0 : index
    %c0_0 = arith.constant 0 : index
    %c0_1 = arith.constant 0 : index
    %0 = vector.load %arg2[%c0, %c0_0, %c0_1] : memref<8x8x16xf32, #tpu.memory_space<vmem>>, vector<8x8x16xf32>
    %1 = vector.shape_cast %0 : vector<8x8x16xf32> to vector<64x16xf32>
    %c0_2 = arith.constant 0 : index
    %c0_3 = arith.constant 0 : index
    %2 = vector.load %arg3[%c0_2, %c0_3] : memref<16x128xf32, #tpu.memory_space<vmem>>, vector<16x128xf32>
    %cst = arith.constant dense<0.000000e+00> : vector<64x128xf32>
    %3 = tpu.matmul %1, %2, %cst {dimension_numbers = #tpu.dot_dimension_numbers<[1], [0], [0], [1], [0, 0, 1, 1], [], []>} : vector<64x16xf32>, vector<16x128xf32>, vector<64x128xf32> -> vector<64x128xf32>
    %c0_4 = arith.constant 0 : index
    %c0_5 = arith.constant 0 : index
    %4 = vector.load %arg6[%c0_4, %c0_5] : memref<1x128xf32, #tpu.memory_space<vmem>>, vector<1x128xf32>
    %5 = vector.broadcast %4 : vector<1x128xf32> to vector<64x128xf32>
    %6 = arith.addf %3, %5 : vector<64x128xf32>
    %7 = vector.shape_cast %6 : vector<64x128xf32> to vector<8x8x128xf32>
    %c0_6 = arith.constant 0 : index
    %c0_7 = arith.constant 0 : index
    %c0_8 = arith.constant 0 : index
    %8 = vector.load %arg11[%c0_6, %c0_7, %c0_8] : memref<8x8x128xf32, #tpu.memory_space<vmem>>, vector<8x8x128xf32>
    tpu.vector_store %arg11[%c0_6, %c0_7, %c0_8], %7 {strides = array<i32>} : memref<8x8x128xf32, #tpu.memory_space<vmem>>, vector<8x8x128xf32>,
    %c0_9 = arith.constant 0 : index
    %c0_10 = arith.constant 0 : index
    %9 = vector.load %arg4[%c0_9, %c0_10] : memref<128x128xf32, #tpu.memory_space<vmem>>, vector<128x128xf32>
    %c0_11 = arith.constant 0 : index
    %c0_12 = arith.constant 0 : index
    %c0_13 = arith.constant 0 : index
    %10 = vector.load %arg5[%c0_11, %c0_12, %c0_13] : memref<2x256x128xf32, #tpu.memory_space<vmem>>, vector<2x256x128xf32>
    %c0_14 = arith.constant 0 : index
    %c0_15 = arith.constant 0 : index
    %c0_16 = arith.constant 0 : index
    %11 = vector.load %arg7[%c0_14, %c0_15, %c0_16] : memref<2x1x128xf32, #tpu.memory_space<vmem>>, vector<2x1x128xf32>
    %c0_17 = arith.constant 0 : index
    %c0_18 = arith.constant 0 : index
    %12 = vector.load %arg1[%c0_17, %c0_18] : memref<8x1xi32, #tpu.memory_space<vmem>>, vector<8x1xi32>
    %cst_19 = arith.constant 0.000000e+00 : f32
    %13 = vector.broadcast %cst_19 : f32 to vector<8x128xf32>
    %cst_20 = arith.constant 0.000000e+00 : f32
    %14 = vector.broadcast %cst_20 : f32 to vector<8x128xf32>
    %cst_21 = arith.constant 0.000000e+00 : f32
    %15 = vector.broadcast %cst_21 : f32 to vector<8x128xf32>
    %c0_i32 = arith.constant 0 : i32
    %16 = vector.broadcast %c0_i32 : i32 to vector<8x1xi32>
    %17 = arith.cmpi slt, %16, %12 : vector<8x1xi32>
    %18 = arith.index_cast %c0_i32 : i32 to index
    %c0_22 = arith.constant 0 : index
    %c0_23 = arith.constant 0 : index
    %19 = vector.load %arg11[%18, %c0_22, %c0_23] : memref<8x8x128xf32, #tpu.memory_space<vmem>>, vector<1x8x128xf32>
    %20 = vector.shape_cast %19 : vector<1x8x128xf32> to vector<8x128xf32>
    %cst_24 = arith.constant dense<0.000000e+00> : vector<8x128xf32>
    %21 = tpu.matmul %13, %9, %cst_24 {dimension_numbers = #tpu.dot_dimension_numbers<[1], [0], [0], [1], [0, 0, 1, 1], [], []>} : vector<8x128xf32>, vector<128x128xf32>, vector<8x128xf32> -> vector<8x128xf32>
    %22 = arith.addf %20, %21 : vector<8x128xf32>
    %23 = math.tanh %22 : vector<8x128xf32>
    %24 = vector.shape_cast %17 : vector<8x1xi1> to vector<8x1xi1>
    %25 = vector.broadcast %24 : vector<8x1xi1> to vector<8x128xi1>
    %26 = arith.select %25, %23, %13 : vector<8x128xi1>, vector<8x128xf32>
    %27 = tpu.concatenate %26, %14 in 1 : vector<8x128xf32>, vector<8x128xf32> -> vector<8x256xf32>
    %28 = vector.extract_strided_slice %10 {offsets = [0, 0, 0], sizes = [1, 256, 128], strides = [1, 1, 1]} : vector<2x256x128xf32> to vector<1x256x128xf32>
    %29 = vector.shape_cast %28 : vector<1x256x128xf32> to vector<256x128xf32>
    %cst_25 = arith.constant dense<0.000000e+00> : vector<8x128xf32>
    %30 = tpu.matmul %27, %29, %cst_25 {dimension_numbers = #tpu.dot_dimension_numbers<[1], [0], [0], [1], [0, 0, 1, 1], [], []>} : vector<8x256xf32>, vector<256x128xf32>, vector<8x128xf32> -> vector<8x128xf32>
    %31 = vector.extract_strided_slice %11 {offsets = [0, 0, 0], sizes = [1, 1, 128], strides = [1, 1, 1]} : vector<2x1x128xf32> to vector<1x1x128xf32>
    %32 = vector.shape_cast %31 : vector<1x1x128xf32> to vector<1x128xf32>
    %33 = vector.broadcast %32 : vector<1x128xf32> to vector<8x128xf32>
    %34 = arith.addf %30, %33 : vector<8x128xf32>
    %35 = math.tanh %34 : vector<8x128xf32>
    %36 = vector.shape_cast %17 : vector<8x1xi1> to vector<8x1xi1>
    %37 = vector.broadcast %36 : vector<8x1xi1> to vector<8x128xi1>
    %38 = arith.select %37, %35, %14 : vector<8x128xi1>, vector<8x128xf32>
    %39 = tpu.concatenate %38, %15 in 1 : vector<8x128xf32>, vector<8x128xf32> -> vector<8x256xf32>
    %40 = vector.extract_strided_slice %10 {offsets = [1, 0, 0], sizes = [1, 256, 128], strides = [1, 1, 1]} : vector<2x256x128xf32> to vector<1x256x128xf32>
    %41 = vector.shape_cast %40 : vector<1x256x128xf32> to vector<256x128xf32>
    %cst_26 = arith.constant dense<0.000000e+00> : vector<8x128xf32>
    %42 = tpu.matmul %39, %41, %cst_26 {dimension_numbers = #tpu.dot_dimension_numbers<[1], [0], [0], [1], [0, 0, 1, 1], [], []>} : vector<8x256xf32>, vector<256x128xf32>, vector<8x128xf32> -> vector<8x128xf32>
    %43 = vector.extract_strided_slice %11 {offsets = [1, 0, 0], sizes = [1, 1, 128], strides = [1, 1, 1]} : vector<2x1x128xf32> to vector<1x1x128xf32>
    %44 = vector.shape_cast %43 : vector<1x1x128xf32> to vector<1x128xf32>
    %45 = vector.broadcast %44 : vector<1x128xf32> to vector<8x128xf32>
    %46 = arith.addf %42, %45 : vector<8x128xf32>
    %47 = math.tanh %46 : vector<8x128xf32>
    %48 = vector.shape_cast %17 : vector<8x1xi1> to vector<8x1xi1>
    %49 = vector.broadcast %48 : vector<8x1xi1> to vector<8x128xi1>
    %50 = arith.select %49, %47, %15 : vector<8x128xi1>, vector<8x128xf32>
    %cst_27 = arith.constant 0.000000e+00 : f32
    %51 = vector.shape_cast %17 : vector<8x1xi1> to vector<8x1xi1>
    %52 = vector.broadcast %51 : vector<8x1xi1> to vector<8x128xi1>
    %53 = vector.broadcast %cst_27 : f32 to vector<8x128xf32>
    %54 = arith.select %52, %50, %53 : vector<8x128xi1>, vector<8x128xf32>
    %55 = arith.index_cast %c0_i32 : i32 to index
    %c0_28 = arith.constant 0 : index
    %c0_29 = arith.constant 0 : index
    %56 = vector.load %arg12[%55, %c0_28, %c0_29] : memref<8x8x128xf32, #tpu.memory_space<vmem>>, vector<1x8x128xf32>
    %57 = vector.shape_cast %56 : vector<1x8x128xf32> to vector<8x128xf32>
    %58 = vector.shape_cast %54 : vector<8x128xf32> to vector<1x8x128xf32>
    tpu.vector_store %arg12[%55, %c0_28, %c0_29], %58 {strides = array<i32>} : memref<8x8x128xf32, #tpu.memory_space<vmem>>, vector<1x8x128xf32>,
    %c1_i32 = arith.constant 1 : i32
    %59 = vector.broadcast %c1_i32 : i32 to vector<8x1xi32>
    %60 = arith.cmpi slt, %59, %12 : vector<8x1xi32>
    %61 = arith.index_cast %c1_i32 : i32 to index
    %c0_30 = arith.constant 0 : index
    %c0_31 = arith.constant 0 : index
    %62 = vector.load %arg11[%61, %c0_30, %c0_31] : memref<8x8x128xf32, #tpu.memory_space<vmem>>, vector<1x8x128xf32>
    %63 = vector.shape_cast %62 : vector<1x8x128xf32> to vector<8x128xf32>
    %cst_32 = arith.constant dense<0.000000e+00> : vector<8x128xf32>
    %64 = tpu.matmul %26, %9, %cst_32 {dimension_numbers = #tpu.dot_dimension_numbers<[1], [0], [0], [1], [0, 0, 1, 1], [], []>} : vector<8x128xf32>, vector<128x128xf32>, vector<8x128xf32> -> vector<8x128xf32>
    %65 = arith.addf %63, %64 : vector<8x128xf32>
    %66 = math.tanh %65 : vector<8x128xf32>
    %67 = vector.shape_cast %60 : vector<8x1xi1> to vector<8x1xi1>
    %68 = vector.broadcast %67 : vector<8x1xi1> to vector<8x128xi1>
    %69 = arith.select %68, %66, %26 : vector<8x128xi1>, vector<8x128xf32>
    %70 = tpu.concatenate %69, %38 in 1 : vector<8x128xf32>, vector<8x128xf32> -> vector<8x256xf32>
    %71 = vector.extract_strided_slice %10 {offsets = [0, 0, 0], sizes = [1, 256, 128], strides = [1, 1, 1]} : vector<2x256x128xf32> to vector<1x256x128xf32>
    %72 = vector.shape_cast %71 : vector<1x256x128xf32> to vector<256x128xf32>
    %cst_33 = arith.constant dense<0.000000e+00> : vector<8x128xf32>
    %73 = tpu.matmul %70, %72, %cst_33 {dimension_numbers = #tpu.dot_dimension_numbers<[1], [0], [0], [1], [0, 0, 1, 1], [], []>} : vector<8x256xf32>, vector<256x128xf32>, vector<8x128xf32> -> vector<8x128xf32>
    %74 = vector.extract_strided_slice %11 {offsets = [0, 0, 0], sizes = [1, 1, 128], strides = [1, 1, 1]} : vector<2x1x128xf32> to vector<1x1x128xf32>
    %75 = vector.shape_cast %74 : vector<1x1x128xf32> to vector<1x128xf32>
    %76 = vector.broadcast %75 : vector<1x128xf32> to vector<8x128xf32>
    %77 = arith.addf %73, %76 : vector<8x128xf32>
    %78 = math.tanh %77 : vector<8x128xf32>
    %79 = vector.shape_cast %60 : vector<8x1xi1> to vector<8x1xi1>
    %80 = vector.broadcast %79 : vector<8x1xi1> to vector<8x128xi1>
    %81 = arith.select %80, %78, %38 : vector<8x128xi1>, vector<8x128xf32>
    %82 = tpu.concatenate %81, %50 in 1 : vector<8x128xf32>, vector<8x128xf32> -> vector<8x256xf32>
    %83 = vector.extract_strided_slice %10 {offsets = [1, 0, 0], sizes = [1, 256, 128], strides = [1, 1, 1]} : vector<2x256x128xf32> to vector<1x256x128xf32>
    %84 = vector.shape_cast %83 : vector<1x256x128xf32> to vector<256x128xf32>
    %cst_34 = arith.constant dense<0.000000e+00> : vector<8x128xf32>
    %85 = tpu.matmul %82, %84, %cst_34 {dimension_numbers = #tpu.dot_dimension_numbers<[1], [0], [0], [1], [0, 0, 1, 1], [], []>} : vector<8x256xf32>, vector<256x128xf32>, vector<8x128xf32> -> vector<8x128xf32>
    %86 = vector.extract_strided_slice %11 {offsets = [1, 0, 0], sizes = [1, 1, 128], strides = [1, 1, 1]} : vector<2x1x128xf32> to vector<1x1x128xf32>
    %87 = vector.shape_cast %86 : vector<1x1x128xf32> to vector<1x128xf32>
    %88 = vector.broadcast %87 : vector<1x128xf32> to vector<8x128xf32>
    %89 = arith.addf %85, %88 : vector<8x128xf32>
    %90 = math.tanh %89 : vector<8x128xf32>
    %91 = vector.shape_cast %60 : vector<8x1xi1> to vector<8x1xi1>
    %92 = vector.broadcast %91 : vector<8x1xi1> to vector<8x128xi1>
    %93 = arith.select %92, %90, %50 : vector<8x128xi1>, vector<8x128xf32>
    %cst_35 = arith.constant 0.000000e+00 : f32
    %94 = vector.shape_cast %60 : vector<8x1xi1> to vector<8x1xi1>
    %95 = vector.broadcast %94 : vector<8x1xi1> to vector<8x128xi1>
    %96 = vector.broadcast %cst_35 : f32 to vector<8x128xf32>
    %97 = arith.select %95, %93, %96 : vector<8x128xi1>, vector<8x128xf32>
    %98 = arith.index_cast %c1_i32 : i32 to index
    %c0_36 = arith.constant 0 : index
    %c0_37 = arith.constant 0 : index
    %99 = vector.load %arg12[%98, %c0_36, %c0_37] : memref<8x8x128xf32, #tpu.memory_space<vmem>>, vector<1x8x128xf32>
    %100 = vector.shape_cast %99 : vector<1x8x128xf32> to vector<8x128xf32>
    %101 = vector.shape_cast %97 : vector<8x128xf32> to vector<1x8x128xf32>
    tpu.vector_store %arg12[%98, %c0_36, %c0_37], %101 {strides = array<i32>} : memref<8x8x128xf32, #tpu.memory_space<vmem>>, vector<1x8x128xf32>,
    %c2_i32 = arith.constant 2 : i32
    %102 = vector.broadcast %c2_i32 : i32 to vector<8x1xi32>
    %103 = arith.cmpi slt, %102, %12 : vector<8x1xi32>
    %104 = arith.index_cast %c2_i32 : i32 to index
    %c0_38 = arith.constant 0 : index
    %c0_39 = arith.constant 0 : index
    %105 = vector.load %arg11[%104, %c0_38, %c0_39] : memref<8x8x128xf32, #tpu.memory_space<vmem>>, vector<1x8x128xf32>
    %106 = vector.shape_cast %105 : vector<1x8x128xf32> to vector<8x128xf32>
    %cst_40 = arith.constant dense<0.000000e+00> : vector<8x128xf32>
    %107 = tpu.matmul %69, %9, %cst_40 {dimension_numbers = #tpu.dot_dimension_numbers<[1], [0], [0], [1], [0, 0, 1, 1], [], []>} : vector<8x128xf32>, vector<128x128xf32>, vector<8x128xf32> -> vector<8x128xf32>
    %108 = arith.addf %106, %107 : vector<8x128xf32>
    %109 = math.tanh %108 : vector<8x128xf32>
    %110 = vector.shape_cast %103 : vector<8x1xi1> to vector<8x1xi1>
    %111 = vector.broadcast %110 : vector<8x1xi1> to vector<8x128xi1>
    %112 = arith.select %111, %109, %69 : vector<8x128xi1>, vector<8x128xf32>
    %113 = tpu.concatenate %112, %81 in 1 : vector<8x128xf32>, vector<8x128xf32> -> vector<8x256xf32>
    %114 = vector.extract_strided_slice %10 {offsets = [0, 0, 0], sizes = [1, 256, 128], strides = [1, 1, 1]} : vector<2x256x128xf32> to vector<1x256x128xf32>
    %115 = vector.shape_cast %114 : vector<1x256x128xf32> to vector<256x128xf32>
    %cst_41 = arith.constant dense<0.000000e+00> : vector<8x128xf32>
    %116 = tpu.matmul %113, %115, %cst_41 {dimension_numbers = #tpu.dot_dimension_numbers<[1], [0], [0], [1], [0, 0, 1, 1], [], []>} : vector<8x256xf32>, vector<256x128xf32>, vector<8x128xf32> -> vector<8x128xf32>
    %117 = vector.extract_strided_slice %11 {offsets = [0, 0, 0], sizes = [1, 1, 128], strides = [1, 1, 1]} : vector<2x1x128xf32> to vector<1x1x128xf32>
    %118 = vector.shape_cast %117 : vector<1x1x128xf32> to vector<1x128xf32>
    %119 = vector.broadcast %118 : vector<1x128xf32> to vector<8x128xf32>
    %120 = arith.addf %116, %119 : vector<8x128xf32>
    %121 = math.tanh %120 : vector<8x128xf32>
    %122 = vector.shape_cast %103 : vector<8x1xi1> to vector<8x1xi1>
    %123 = vector.broadcast %122 : vector<8x1xi1> to vector<8x128xi1>
    %124 = arith.select %123, %121, %81 : vector<8x128xi1>, vector<8x128xf32>
    %125 = tpu.concatenate %124, %93 in 1 : vector<8x128xf32>, vector<8x128xf32> -> vector<8x256xf32>
    %126 = vector.extract_strided_slice %10 {offsets = [1, 0, 0], sizes = [1, 256, 128], strides = [1, 1, 1]} : vector<2x256x128xf32> to vector<1x256x128xf32>
    %127 = vector.shape_cast %126 : vector<1x256x128xf32> to vector<256x128xf32>
    %cst_42 = arith.constant dense<0.000000e+00> : vector<8x128xf32>
    %128 = tpu.matmul %125, %127, %cst_42 {dimension_numbers = #tpu.dot_dimension_numbers<[1], [0], [0], [1], [0, 0, 1, 1], [], []>} : vector<8x256xf32>, vector<256x128xf32>, vector<8x128xf32> -> vector<8x128xf32>
    %129 = vector.extract_strided_slice %11 {offsets = [1, 0, 0], sizes = [1, 1, 128], strides = [1, 1, 1]} : vector<2x1x128xf32> to vector<1x1x128xf32>
    %130 = vector.shape_cast %129 : vector<1x1x128xf32> to vector<1x128xf32>
    %131 = vector.broadcast %130 : vector<1x128xf32> to vector<8x128xf32>
    %132 = arith.addf %128, %131 : vector<8x128xf32>
    %133 = math.tanh %132 : vector<8x128xf32>
    %134 = vector.shape_cast %103 : vector<8x1xi1> to vector<8x1xi1>
    %135 = vector.broadcast %134 : vector<8x1xi1> to vector<8x128xi1>
    %136 = arith.select %135, %133, %93 : vector<8x128xi1>, vector<8x128xf32>
    %cst_43 = arith.constant 0.000000e+00 : f32
    %137 = vector.shape_cast %103 : vector<8x1xi1> to vector<8x1xi1>
    %138 = vector.broadcast %137 : vector<8x1xi1> to vector<8x128xi1>
    %139 = vector.broadcast %cst_43 : f32 to vector<8x128xf32>
    %140 = arith.select %138, %136, %139 : vector<8x128xi1>, vector<8x128xf32>
    %141 = arith.index_cast %c2_i32 : i32 to index
    %c0_44 = arith.constant 0 : index
    %c0_45 = arith.constant 0 : index
    %142 = vector.load %arg12[%141, %c0_44, %c0_45] : memref<8x8x128xf32, #tpu.memory_space<vmem>>, vector<1x8x128xf32>
    %143 = vector.shape_cast %142 : vector<1x8x128xf32> to vector<8x128xf32>
    %144 = vector.shape_cast %140 : vector<8x128xf32> to vector<1x8x128xf32>
    tpu.vector_store %arg12[%141, %c0_44, %c0_45], %144 {strides = array<i32>} : memref<8x8x128xf32, #tpu.memory_space<vmem>>, vector<1x8x128xf32>,
    %c3_i32 = arith.constant 3 : i32
    %145 = vector.broadcast %c3_i32 : i32 to vector<8x1xi32>
    %146 = arith.cmpi slt, %145, %12 : vector<8x1xi32>
    %147 = arith.index_cast %c3_i32 : i32 to index
    %c0_46 = arith.constant 0 : index
    %c0_47 = arith.constant 0 : index
    %148 = vector.load %arg11[%147, %c0_46, %c0_47] : memref<8x8x128xf32, #tpu.memory_space<vmem>>, vector<1x8x128xf32>
    %149 = vector.shape_cast %148 : vector<1x8x128xf32> to vector<8x128xf32>
    %cst_48 = arith.constant dense<0.000000e+00> : vector<8x128xf32>
    %150 = tpu.matmul %112, %9, %cst_48 {dimension_numbers = #tpu.dot_dimension_numbers<[1], [0], [0], [1], [0, 0, 1, 1], [], []>} : vector<8x128xf32>, vector<128x128xf32>, vector<8x128xf32> -> vector<8x128xf32>
    %151 = arith.addf %149, %150 : vector<8x128xf32>
    %152 = math.tanh %151 : vector<8x128xf32>
    %153 = vector.shape_cast %146 : vector<8x1xi1> to vector<8x1xi1>
    %154 = vector.broadcast %153 : vector<8x1xi1> to vector<8x128xi1>
    %155 = arith.select %154, %152, %112 : vector<8x128xi1>, vector<8x128xf32>
    %156 = tpu.concatenate %155, %124 in 1 : vector<8x128xf32>, vector<8x128xf32> -> vector<8x256xf32>
    %157 = vector.extract_strided_slice %10 {offsets = [0, 0, 0], sizes = [1, 256, 128], strides = [1, 1, 1]} : vector<2x256x128xf32> to vector<1x256x128xf32>
    %158 = vector.shape_cast %157 : vector<1x256x128xf32> to vector<256x128xf32>
    %cst_49 = arith.constant dense<0.000000e+00> : vector<8x128xf32>
    %159 = tpu.matmul %156, %158, %cst_49 {dimension_numbers = #tpu.dot_dimension_numbers<[1], [0], [0], [1], [0, 0, 1, 1], [], []>} : vector<8x256xf32>, vector<256x128xf32>, vector<8x128xf32> -> vector<8x128xf32>
    %160 = vector.extract_strided_slice %11 {offsets = [0, 0, 0], sizes = [1, 1, 128], strides = [1, 1, 1]} : vector<2x1x128xf32> to vector<1x1x128xf32>
    %161 = vector.shape_cast %160 : vector<1x1x128xf32> to vector<1x128xf32>
    %162 = vector.broadcast %161 : vector<1x128xf32> to vector<8x128xf32>
    %163 = arith.addf %159, %162 : vector<8x128xf32>
    %164 = math.tanh %163 : vector<8x128xf32>
    %165 = vector.shape_cast %146 : vector<8x1xi1> to vector<8x1xi1>
    %166 = vector.broadcast %165 : vector<8x1xi1> to vector<8x128xi1>
    %167 = arith.select %166, %164, %124 : vector<8x128xi1>, vector<8x128xf32>
    %168 = tpu.concatenate %167, %136 in 1 : vector<8x128xf32>, vector<8x128xf32> -> vector<8x256xf32>
    %169 = vector.extract_strided_slice %10 {offsets = [1, 0, 0], sizes = [1, 256, 128], strides = [1, 1, 1]} : vector<2x256x128xf32> to vector<1x256x128xf32>
    %170 = vector.shape_cast %169 : vector<1x256x128xf32> to vector<256x128xf32>
    %cst_50 = arith.constant dense<0.000000e+00> : vector<8x128xf32>
    %171 = tpu.matmul %168, %170, %cst_50 {dimension_numbers = #tpu.dot_dimension_numbers<[1], [0], [0], [1], [0, 0, 1, 1], [], []>} : vector<8x256xf32>, vector<256x128xf32>, vector<8x128xf32> -> vector<8x128xf32>
    %172 = vector.extract_strided_slice %11 {offsets = [1, 0, 0], sizes = [1, 1, 128], strides = [1, 1, 1]} : vector<2x1x128xf32> to vector<1x1x128xf32>
    %173 = vector.shape_cast %172 : vector<1x1x128xf32> to vector<1x128xf32>
    %174 = vector.broadcast %173 : vector<1x128xf32> to vector<8x128xf32>
    %175 = arith.addf %171, %174 : vector<8x128xf32>
    %176 = math.tanh %175 : vector<8x128xf32>
    %177 = vector.shape_cast %146 : vector<8x1xi1> to vector<8x1xi1>
    %178 = vector.broadcast %177 : vector<8x1xi1> to vector<8x128xi1>
    %179 = arith.select %178, %176, %136 : vector<8x128xi1>, vector<8x128xf32>
    %cst_51 = arith.constant 0.000000e+00 : f32
    %180 = vector.shape_cast %146 : vector<8x1xi1> to vector<8x1xi1>
    %181 = vector.broadcast %180 : vector<8x1xi1> to vector<8x128xi1>
    %182 = vector.broadcast %cst_51 : f32 to vector<8x128xf32>
    %183 = arith.select %181, %179, %182 : vector<8x128xi1>, vector<8x128xf32>
    %184 = arith.index_cast %c3_i32 : i32 to index
    %c0_52 = arith.constant 0 : index
    %c0_53 = arith.constant 0 : index
    %185 = vector.load %arg12[%184, %c0_52, %c0_53] : memref<8x8x128xf32, #tpu.memory_space<vmem>>, vector<1x8x128xf32>
    %186 = vector.shape_cast %185 : vector<1x8x128xf32> to vector<8x128xf32>
    %187 = vector.shape_cast %183 : vector<8x128xf32> to vector<1x8x128xf32>
    tpu.vector_store %arg12[%184, %c0_52, %c0_53], %187 {strides = array<i32>} : memref<8x8x128xf32, #tpu.memory_space<vmem>>, vector<1x8x128xf32>,
    %c4_i32 = arith.constant 4 : i32
    %188 = vector.broadcast %c4_i32 : i32 to vector<8x1xi32>
    %189 = arith.cmpi slt, %188, %12 : vector<8x1xi32>
    %190 = arith.index_cast %c4_i32 : i32 to index
    %c0_54 = arith.constant 0 : index
    %c0_55 = arith.constant 0 : index
    %191 = vector.load %arg11[%190, %c0_54, %c0_55] : memref<8x8x128xf32, #tpu.memory_space<vmem>>, vector<1x8x128xf32>
    %192 = vector.shape_cast %191 : vector<1x8x128xf32> to vector<8x128xf32>
    %cst_56 = arith.constant dense<0.000000e+00> : vector<8x128xf32>
    %193 = tpu.matmul %155, %9, %cst_56 {dimension_numbers = #tpu.dot_dimension_numbers<[1], [0], [0], [1], [0, 0, 1, 1], [], []>} : vector<8x128xf32>, vector<128x128xf32>, vector<8x128xf32> -> vector<8x128xf32>
    %194 = arith.addf %192, %193 : vector<8x128xf32>
    %195 = math.tanh %194 : vector<8x128xf32>
    %196 = vector.shape_cast %189 : vector<8x1xi1> to vector<8x1xi1>
    %197 = vector.broadcast %196 : vector<8x1xi1> to vector<8x128xi1>
    %198 = arith.select %197, %195, %155 : vector<8x128xi1>, vector<8x128xf32>
    %199 = tpu.concatenate %198, %167 in 1 : vector<8x128xf32>, vector<8x128xf32> -> vector<8x256xf32>
    %200 = vector.extract_strided_slice %10 {offsets = [0, 0, 0], sizes = [1, 256, 128], strides = [1, 1, 1]} : vector<2x256x128xf32> to vector<1x256x128xf32>
    %201 = vector.shape_cast %200 : vector<1x256x128xf32> to vector<256x128xf32>
    %cst_57 = arith.constant dense<0.000000e+00> : vector<8x128xf32>
    %202 = tpu.matmul %199, %201, %cst_57 {dimension_numbers = #tpu.dot_dimension_numbers<[1], [0], [0], [1], [0, 0, 1, 1], [], []>} : vector<8x256xf32>, vector<256x128xf32>, vector<8x128xf32> -> vector<8x128xf32>
    %203 = vector.extract_strided_slice %11 {offsets = [0, 0, 0], sizes = [1, 1, 128], strides = [1, 1, 1]} : vector<2x1x128xf32> to vector<1x1x128xf32>
    %204 = vector.shape_cast %203 : vector<1x1x128xf32> to vector<1x128xf32>
    %205 = vector.broadcast %204 : vector<1x128xf32> to vector<8x128xf32>
    %206 = arith.addf %202, %205 : vector<8x128xf32>
    %207 = math.tanh %206 : vector<8x128xf32>
    %208 = vector.shape_cast %189 : vector<8x1xi1> to vector<8x1xi1>
    %209 = vector.broadcast %208 : vector<8x1xi1> to vector<8x128xi1>
    %210 = arith.select %209, %207, %167 : vector<8x128xi1>, vector<8x128xf32>
    %211 = tpu.concatenate %210, %179 in 1 : vector<8x128xf32>, vector<8x128xf32> -> vector<8x256xf32>
    %212 = vector.extract_strided_slice %10 {offsets = [1, 0, 0], sizes = [1, 256, 128], strides = [1, 1, 1]} : vector<2x256x128xf32> to vector<1x256x128xf32>
    %213 = vector.shape_cast %212 : vector<1x256x128xf32> to vector<256x128xf32>
    %cst_58 = arith.constant dense<0.000000e+00> : vector<8x128xf32>
    %214 = tpu.matmul %211, %213, %cst_58 {dimension_numbers = #tpu.dot_dimension_numbers<[1], [0], [0], [1], [0, 0, 1, 1], [], []>} : vector<8x256xf32>, vector<256x128xf32>, vector<8x128xf32> -> vector<8x128xf32>
    %215 = vector.extract_strided_slice %11 {offsets = [1, 0, 0], sizes = [1, 1, 128], strides = [1, 1, 1]} : vector<2x1x128xf32> to vector<1x1x128xf32>
    %216 = vector.shape_cast %215 : vector<1x1x128xf32> to vector<1x128xf32>
    %217 = vector.broadcast %216 : vector<1x128xf32> to vector<8x128xf32>
    %218 = arith.addf %214, %217 : vector<8x128xf32>
    %219 = math.tanh %218 : vector<8x128xf32>
    %220 = vector.shape_cast %189 : vector<8x1xi1> to vector<8x1xi1>
    %221 = vector.broadcast %220 : vector<8x1xi1> to vector<8x128xi1>
    %222 = arith.select %221, %219, %179 : vector<8x128xi1>, vector<8x128xf32>
    %cst_59 = arith.constant 0.000000e+00 : f32
    %223 = vector.shape_cast %189 : vector<8x1xi1> to vector<8x1xi1>
    %224 = vector.broadcast %223 : vector<8x1xi1> to vector<8x128xi1>
    %225 = vector.broadcast %cst_59 : f32 to vector<8x128xf32>
    %226 = arith.select %224, %222, %225 : vector<8x128xi1>, vector<8x128xf32>
    %227 = arith.index_cast %c4_i32 : i32 to index
    %c0_60 = arith.constant 0 : index
    %c0_61 = arith.constant 0 : index
    %228 = vector.load %arg12[%227, %c0_60, %c0_61] : memref<8x8x128xf32, #tpu.memory_space<vmem>>, vector<1x8x128xf32>
    %229 = vector.shape_cast %228 : vector<1x8x128xf32> to vector<8x128xf32>
    %230 = vector.shape_cast %226 : vector<8x128xf32> to vector<1x8x128xf32>
    tpu.vector_store %arg12[%227, %c0_60, %c0_61], %230 {strides = array<i32>} : memref<8x8x128xf32, #tpu.memory_space<vmem>>, vector<1x8x128xf32>,
    %c5_i32 = arith.constant 5 : i32
    %231 = vector.broadcast %c5_i32 : i32 to vector<8x1xi32>
    %232 = arith.cmpi slt, %231, %12 : vector<8x1xi32>
    %233 = arith.index_cast %c5_i32 : i32 to index
    %c0_62 = arith.constant 0 : index
    %c0_63 = arith.constant 0 : index
    %234 = vector.load %arg11[%233, %c0_62, %c0_63] : memref<8x8x128xf32, #tpu.memory_space<vmem>>, vector<1x8x128xf32>
    %235 = vector.shape_cast %234 : vector<1x8x128xf32> to vector<8x128xf32>
    %cst_64 = arith.constant dense<0.000000e+00> : vector<8x128xf32>
    %236 = tpu.matmul %198, %9, %cst_64 {dimension_numbers = #tpu.dot_dimension_numbers<[1], [0], [0], [1], [0, 0, 1, 1], [], []>} : vector<8x128xf32>, vector<128x128xf32>, vector<8x128xf32> -> vector<8x128xf32>
    %237 = arith.addf %235, %236 : vector<8x128xf32>
    %238 = math.tanh %237 : vector<8x128xf32>
    %239 = vector.shape_cast %232 : vector<8x1xi1> to vector<8x1xi1>
    %240 = vector.broadcast %239 : vector<8x1xi1> to vector<8x128xi1>
    %241 = arith.select %240, %238, %198 : vector<8x128xi1>, vector<8x128xf32>
    %242 = tpu.concatenate %241, %210 in 1 : vector<8x128xf32>, vector<8x128xf32> -> vector<8x256xf32>
    %243 = vector.extract_strided_slice %10 {offsets = [0, 0, 0], sizes = [1, 256, 128], strides = [1, 1, 1]} : vector<2x256x128xf32> to vector<1x256x128xf32>
    %244 = vector.shape_cast %243 : vector<1x256x128xf32> to vector<256x128xf32>
    %cst_65 = arith.constant dense<0.000000e+00> : vector<8x128xf32>
    %245 = tpu.matmul %242, %244, %cst_65 {dimension_numbers = #tpu.dot_dimension_numbers<[1], [0], [0], [1], [0, 0, 1, 1], [], []>} : vector<8x256xf32>, vector<256x128xf32>, vector<8x128xf32> -> vector<8x128xf32>
    %246 = vector.extract_strided_slice %11 {offsets = [0, 0, 0], sizes = [1, 1, 128], strides = [1, 1, 1]} : vector<2x1x128xf32> to vector<1x1x128xf32>
    %247 = vector.shape_cast %246 : vector<1x1x128xf32> to vector<1x128xf32>
    %248 = vector.broadcast %247 : vector<1x128xf32> to vector<8x128xf32>
    %249 = arith.addf %245, %248 : vector<8x128xf32>
    %250 = math.tanh %249 : vector<8x128xf32>
    %251 = vector.shape_cast %232 : vector<8x1xi1> to vector<8x1xi1>
    %252 = vector.broadcast %251 : vector<8x1xi1> to vector<8x128xi1>
    %253 = arith.select %252, %250, %210 : vector<8x128xi1>, vector<8x128xf32>
    %254 = tpu.concatenate %253, %222 in 1 : vector<8x128xf32>, vector<8x128xf32> -> vector<8x256xf32>
    %255 = vector.extract_strided_slice %10 {offsets = [1, 0, 0], sizes = [1, 256, 128], strides = [1, 1, 1]} : vector<2x256x128xf32> to vector<1x256x128xf32>
    %256 = vector.shape_cast %255 : vector<1x256x128xf32> to vector<256x128xf32>
    %cst_66 = arith.constant dense<0.000000e+00> : vector<8x128xf32>
    %257 = tpu.matmul %254, %256, %cst_66 {dimension_numbers = #tpu.dot_dimension_numbers<[1], [0], [0], [1], [0, 0, 1, 1], [], []>} : vector<8x256xf32>, vector<256x128xf32>, vector<8x128xf32> -> vector<8x128xf32>
    %258 = vector.extract_strided_slice %11 {offsets = [1, 0, 0], sizes = [1, 1, 128], strides = [1, 1, 1]} : vector<2x1x128xf32> to vector<1x1x128xf32>
    %259 = vector.shape_cast %258 : vector<1x1x128xf32> to vector<1x128xf32>
    %260 = vector.broadcast %259 : vector<1x128xf32> to vector<8x128xf32>
    %261 = arith.addf %257, %260 : vector<8x128xf32>
    %262 = math.tanh %261 : vector<8x128xf32>
    %263 = vector.shape_cast %232 : vector<8x1xi1> to vector<8x1xi1>
    %264 = vector.broadcast %263 : vector<8x1xi1> to vector<8x128xi1>
    %265 = arith.select %264, %262, %222 : vector<8x128xi1>, vector<8x128xf32>
    %cst_67 = arith.constant 0.000000e+00 : f32
    %266 = vector.shape_cast %232 : vector<8x1xi1> to vector<8x1xi1>
    %267 = vector.broadcast %266 : vector<8x1xi1> to vector<8x128xi1>
    %268 = vector.broadcast %cst_67 : f32 to vector<8x128xf32>
    %269 = arith.select %267, %265, %268 : vector<8x128xi1>, vector<8x128xf32>
    %270 = arith.index_cast %c5_i32 : i32 to index
    %c0_68 = arith.constant 0 : index
    %c0_69 = arith.constant 0 : index
    %271 = vector.load %arg12[%270, %c0_68, %c0_69] : memref<8x8x128xf32, #tpu.memory_space<vmem>>, vector<1x8x128xf32>
    %272 = vector.shape_cast %271 : vector<1x8x128xf32> to vector<8x128xf32>
    %273 = vector.shape_cast %269 : vector<8x128xf32> to vector<1x8x128xf32>
    tpu.vector_store %arg12[%270, %c0_68, %c0_69], %273 {strides = array<i32>} : memref<8x8x128xf32, #tpu.memory_space<vmem>>, vector<1x8x128xf32>,
    %c6_i32 = arith.constant 6 : i32
    %274 = vector.broadcast %c6_i32 : i32 to vector<8x1xi32>
    %275 = arith.cmpi slt, %274, %12 : vector<8x1xi32>
    %276 = arith.index_cast %c6_i32 : i32 to index
    %c0_70 = arith.constant 0 : index
    %c0_71 = arith.constant 0 : index
    %277 = vector.load %arg11[%276, %c0_70, %c0_71] : memref<8x8x128xf32, #tpu.memory_space<vmem>>, vector<1x8x128xf32>
    %278 = vector.shape_cast %277 : vector<1x8x128xf32> to vector<8x128xf32>
    %cst_72 = arith.constant dense<0.000000e+00> : vector<8x128xf32>
    %279 = tpu.matmul %241, %9, %cst_72 {dimension_numbers = #tpu.dot_dimension_numbers<[1], [0], [0], [1], [0, 0, 1, 1], [], []>} : vector<8x128xf32>, vector<128x128xf32>, vector<8x128xf32> -> vector<8x128xf32>
    %280 = arith.addf %278, %279 : vector<8x128xf32>
    %281 = math.tanh %280 : vector<8x128xf32>
    %282 = vector.shape_cast %275 : vector<8x1xi1> to vector<8x1xi1>
    %283 = vector.broadcast %282 : vector<8x1xi1> to vector<8x128xi1>
    %284 = arith.select %283, %281, %241 : vector<8x128xi1>, vector<8x128xf32>
    %285 = tpu.concatenate %284, %253 in 1 : vector<8x128xf32>, vector<8x128xf32> -> vector<8x256xf32>
    %286 = vector.extract_strided_slice %10 {offsets = [0, 0, 0], sizes = [1, 256, 128], strides = [1, 1, 1]} : vector<2x256x128xf32> to vector<1x256x128xf32>
    %287 = vector.shape_cast %286 : vector<1x256x128xf32> to vector<256x128xf32>
    %cst_73 = arith.constant dense<0.000000e+00> : vector<8x128xf32>
    %288 = tpu.matmul %285, %287, %cst_73 {dimension_numbers = #tpu.dot_dimension_numbers<[1], [0], [0], [1], [0, 0, 1, 1], [], []>} : vector<8x256xf32>, vector<256x128xf32>, vector<8x128xf32> -> vector<8x128xf32>
    %289 = vector.extract_strided_slice %11 {offsets = [0, 0, 0], sizes = [1, 1, 128], strides = [1, 1, 1]} : vector<2x1x128xf32> to vector<1x1x128xf32>
    %290 = vector.shape_cast %289 : vector<1x1x128xf32> to vector<1x128xf32>
    %291 = vector.broadcast %290 : vector<1x128xf32> to vector<8x128xf32>
    %292 = arith.addf %288, %291 : vector<8x128xf32>
    %293 = math.tanh %292 : vector<8x128xf32>
    %294 = vector.shape_cast %275 : vector<8x1xi1> to vector<8x1xi1>
    %295 = vector.broadcast %294 : vector<8x1xi1> to vector<8x128xi1>
    %296 = arith.select %295, %293, %253 : vector<8x128xi1>, vector<8x128xf32>
    %297 = tpu.concatenate %296, %265 in 1 : vector<8x128xf32>, vector<8x128xf32> -> vector<8x256xf32>
    %298 = vector.extract_strided_slice %10 {offsets = [1, 0, 0], sizes = [1, 256, 128], strides = [1, 1, 1]} : vector<2x256x128xf32> to vector<1x256x128xf32>
    %299 = vector.shape_cast %298 : vector<1x256x128xf32> to vector<256x128xf32>
    %cst_74 = arith.constant dense<0.000000e+00> : vector<8x128xf32>
    %300 = tpu.matmul %297, %299, %cst_74 {dimension_numbers = #tpu.dot_dimension_numbers<[1], [0], [0], [1], [0, 0, 1, 1], [], []>} : vector<8x256xf32>, vector<256x128xf32>, vector<8x128xf32> -> vector<8x128xf32>
    %301 = vector.extract_strided_slice %11 {offsets = [1, 0, 0], sizes = [1, 1, 128], strides = [1, 1, 1]} : vector<2x1x128xf32> to vector<1x1x128xf32>
    %302 = vector.shape_cast %301 : vector<1x1x128xf32> to vector<1x128xf32>
    %303 = vector.broadcast %302 : vector<1x128xf32> to vector<8x128xf32>
    %304 = arith.addf %300, %303 : vector<8x128xf32>
    %305 = math.tanh %304 : vector<8x128xf32>
    %306 = vector.shape_cast %275 : vector<8x1xi1> to vector<8x1xi1>
    %307 = vector.broadcast %306 : vector<8x1xi1> to vector<8x128xi1>
    %308 = arith.select %307, %305, %265 : vector<8x128xi1>, vector<8x128xf32>
    %cst_75 = arith.constant 0.000000e+00 : f32
    %309 = vector.shape_cast %275 : vector<8x1xi1> to vector<8x1xi1>
    %310 = vector.broadcast %309 : vector<8x1xi1> to vector<8x128xi1>
    %311 = vector.broadcast %cst_75 : f32 to vector<8x128xf32>
    %312 = arith.select %310, %308, %311 : vector<8x128xi1>, vector<8x128xf32>
    %313 = arith.index_cast %c6_i32 : i32 to index
    %c0_76 = arith.constant 0 : index
    %c0_77 = arith.constant 0 : index
    %314 = vector.load %arg12[%313, %c0_76, %c0_77] : memref<8x8x128xf32, #tpu.memory_space<vmem>>, vector<1x8x128xf32>
    %315 = vector.shape_cast %314 : vector<1x8x128xf32> to vector<8x128xf32>
    %316 = vector.shape_cast %312 : vector<8x128xf32> to vector<1x8x128xf32>
    tpu.vector_store %arg12[%313, %c0_76, %c0_77], %316 {strides = array<i32>} : memref<8x8x128xf32, #tpu.memory_space<vmem>>, vector<1x8x128xf32>,
    %c7_i32 = arith.constant 7 : i32
    %317 = vector.broadcast %c7_i32 : i32 to vector<8x1xi32>
    %318 = arith.cmpi slt, %317, %12 : vector<8x1xi32>
    %319 = arith.index_cast %c7_i32 : i32 to index
    %c0_78 = arith.constant 0 : index
    %c0_79 = arith.constant 0 : index
    %320 = vector.load %arg11[%319, %c0_78, %c0_79] : memref<8x8x128xf32, #tpu.memory_space<vmem>>, vector<1x8x128xf32>
    %321 = vector.shape_cast %320 : vector<1x8x128xf32> to vector<8x128xf32>
    %cst_80 = arith.constant dense<0.000000e+00> : vector<8x128xf32>
    %322 = tpu.matmul %284, %9, %cst_80 {dimension_numbers = #tpu.dot_dimension_numbers<[1], [0], [0], [1], [0, 0, 1, 1], [], []>} : vector<8x128xf32>, vector<128x128xf32>, vector<8x128xf32> -> vector<8x128xf32>
    %323 = arith.addf %321, %322 : vector<8x128xf32>
    %324 = math.tanh %323 : vector<8x128xf32>
    %325 = vector.shape_cast %318 : vector<8x1xi1> to vector<8x1xi1>
    %326 = vector.broadcast %325 : vector<8x1xi1> to vector<8x128xi1>
    %327 = arith.select %326, %324, %284 : vector<8x128xi1>, vector<8x128xf32>
    %328 = tpu.concatenate %327, %296 in 1 : vector<8x128xf32>, vector<8x128xf32> -> vector<8x256xf32>
    %329 = vector.extract_strided_slice %10 {offsets = [0, 0, 0], sizes = [1, 256, 128], strides = [1, 1, 1]} : vector<2x256x128xf32> to vector<1x256x128xf32>
    %330 = vector.shape_cast %329 : vector<1x256x128xf32> to vector<256x128xf32>
    %cst_81 = arith.constant dense<0.000000e+00> : vector<8x128xf32>
    %331 = tpu.matmul %328, %330, %cst_81 {dimension_numbers = #tpu.dot_dimension_numbers<[1], [0], [0], [1], [0, 0, 1, 1], [], []>} : vector<8x256xf32>, vector<256x128xf32>, vector<8x128xf32> -> vector<8x128xf32>
    %332 = vector.extract_strided_slice %11 {offsets = [0, 0, 0], sizes = [1, 1, 128], strides = [1, 1, 1]} : vector<2x1x128xf32> to vector<1x1x128xf32>
    %333 = vector.shape_cast %332 : vector<1x1x128xf32> to vector<1x128xf32>
    %334 = vector.broadcast %333 : vector<1x128xf32> to vector<8x128xf32>
    %335 = arith.addf %331, %334 : vector<8x128xf32>
    %336 = math.tanh %335 : vector<8x128xf32>
    %337 = vector.shape_cast %318 : vector<8x1xi1> to vector<8x1xi1>
    %338 = vector.broadcast %337 : vector<8x1xi1> to vector<8x128xi1>
    %339 = arith.select %338, %336, %296 : vector<8x128xi1>, vector<8x128xf32>
    %340 = tpu.concatenate %339, %308 in 1 : vector<8x128xf32>, vector<8x128xf32> -> vector<8x256xf32>
    %341 = vector.extract_strided_slice %10 {offsets = [1, 0, 0], sizes = [1, 256, 128], strides = [1, 1, 1]} : vector<2x256x128xf32> to vector<1x256x128xf32>
    %342 = vector.shape_cast %341 : vector<1x256x128xf32> to vector<256x128xf32>
    %cst_82 = arith.constant dense<0.000000e+00> : vector<8x128xf32>
    %343 = tpu.matmul %340, %342, %cst_82 {dimension_numbers = #tpu.dot_dimension_numbers<[1], [0], [0], [1], [0, 0, 1, 1], [], []>} : vector<8x256xf32>, vector<256x128xf32>, vector<8x128xf32> -> vector<8x128xf32>
    %344 = vector.extract_strided_slice %11 {offsets = [1, 0, 0], sizes = [1, 1, 128], strides = [1, 1, 1]} : vector<2x1x128xf32> to vector<1x1x128xf32>
    %345 = vector.shape_cast %344 : vector<1x1x128xf32> to vector<1x128xf32>
    %346 = vector.broadcast %345 : vector<1x128xf32> to vector<8x128xf32>
    %347 = arith.addf %343, %346 : vector<8x128xf32>
    %348 = math.tanh %347 : vector<8x128xf32>
    %349 = vector.shape_cast %318 : vector<8x1xi1> to vector<8x1xi1>
    %350 = vector.broadcast %349 : vector<8x1xi1> to vector<8x128xi1>
    %351 = arith.select %350, %348, %308 : vector<8x128xi1>, vector<8x128xf32>
    %cst_83 = arith.constant 0.000000e+00 : f32
    %352 = vector.shape_cast %318 : vector<8x1xi1> to vector<8x1xi1>
    %353 = vector.broadcast %352 : vector<8x1xi1> to vector<8x128xi1>
    %354 = vector.broadcast %cst_83 : f32 to vector<8x128xf32>
    %355 = arith.select %353, %351, %354 : vector<8x128xi1>, vector<8x128xf32>
    %356 = arith.index_cast %c7_i32 : i32 to index
    %c0_84 = arith.constant 0 : index
    %c0_85 = arith.constant 0 : index
    %357 = vector.load %arg12[%356, %c0_84, %c0_85] : memref<8x8x128xf32, #tpu.memory_space<vmem>>, vector<1x8x128xf32>
    %358 = vector.shape_cast %357 : vector<1x8x128xf32> to vector<8x128xf32>
    %359 = vector.shape_cast %355 : vector<8x128xf32> to vector<1x8x128xf32>
    tpu.vector_store %arg12[%356, %c0_84, %c0_85], %359 {strides = array<i32>} : memref<8x8x128xf32, #tpu.memory_space<vmem>>, vector<1x8x128xf32>,
    %c8_i32 = arith.constant 8 : i32
    %c0_86 = arith.constant 0 : index
    %c0_87 = arith.constant 0 : index
    %c0_88 = arith.constant 0 : index
    %360 = vector.load %arg12[%c0_86, %c0_87, %c0_88] : memref<8x8x128xf32, #tpu.memory_space<vmem>>, vector<8x8x128xf32>
    %361 = vector.shape_cast %360 : vector<8x8x128xf32> to vector<64x128xf32>
    %c0_89 = arith.constant 0 : index
    %c0_90 = arith.constant 0 : index
    %362 = vector.load %arg8[%c0_89, %c0_90] : memref<128x128xf32, #tpu.memory_space<vmem>>, vector<128x128xf32>
    %cst_91 = arith.constant dense<0.000000e+00> : vector<64x128xf32>
    %363 = tpu.matmul %361, %362, %cst_91 {dimension_numbers = #tpu.dot_dimension_numbers<[1], [0], [0], [1], [0, 0, 1, 1], [], []>} : vector<64x128xf32>, vector<128x128xf32>, vector<64x128xf32> -> vector<64x128xf32>
    %c0_92 = arith.constant 0 : index
    %c0_93 = arith.constant 0 : index
    %364 = vector.load %arg9[%c0_92, %c0_93] : memref<1x128xf32, #tpu.memory_space<vmem>>, vector<1x128xf32>
    %365 = vector.broadcast %364 : vector<1x128xf32> to vector<64x128xf32>
    %366 = arith.addf %363, %365 : vector<64x128xf32>
    %367 = vector.shape_cast %366 : vector<64x128xf32> to vector<8x8x128xf32>
    %c0_94 = arith.constant 0 : index
    %c0_95 = arith.constant 0 : index
    %c0_96 = arith.constant 0 : index
    %368 = vector.load %arg10[%c0_94, %c0_95, %c0_96] : memref<8x8x128xf32, #tpu.memory_space<vmem>>, vector<8x8x128xf32>
    tpu.vector_store %arg10[%c0_94, %c0_95, %c0_96], %367 {strides = array<i32>} : memref<8x8x128xf32, #tpu.memory_space<vmem>>, vector<8x8x128xf32>,
    return
  }
  func.func @transform_0(%arg0: i32) -> (i32, i32) {
    %c0_i32 = arith.constant 0 : i32
    %c0_i32_0 = arith.constant 0 : i32
    return %arg0, %c0_i32 : i32, i32
  }
  func.func @transform_1(%arg0: i32) -> (i32, i32, i32) {
    %c0_i32 = arith.constant 0 : i32
    %c0_i32_0 = arith.constant 0 : i32
    %c0_i32_1 = arith.constant 0 : i32
    return %c0_i32, %arg0, %c0_i32_0 : i32, i32, i32
  }
  func.func @transform_2(%arg0: i32) -> (i32, i32) {
    %c0_i32 = arith.constant 0 : i32
    %c0_i32_0 = arith.constant 0 : i32
    %c0_i32_1 = arith.constant 0 : i32
    return %c0_i32, %c0_i32_0 : i32, i32
  }
  func.func @transform_3(%arg0: i32) -> (i32, i32) {
    %c0_i32 = arith.constant 0 : i32
    %c0_i32_0 = arith.constant 0 : i32
    %c0_i32_1 = arith.constant 0 : i32
    return %c0_i32, %c0_i32_0 : i32, i32
  }
  func.func @transform_4(%arg0: i32) -> (i32, i32, i32) {
    %c0_i32 = arith.constant 0 : i32
    %c0_i32_0 = arith.constant 0 : i32
    %c0_i32_1 = arith.constant 0 : i32
    %c0_i32_2 = arith.constant 0 : i32
    return %c0_i32, %c0_i32_0, %c0_i32_1 : i32, i32, i32
  }
  func.func @transform_5(%arg0: i32) -> (i32, i32) {
    %c0_i32 = arith.constant 0 : i32
    %c0_i32_0 = arith.constant 0 : i32
    %c0_i32_1 = arith.constant 0 : i32
    return %c0_i32, %c0_i32_0 : i32, i32
  }
  func.func @transform_6(%arg0: i32) -> (i32, i32, i32) {
    %c0_i32 = arith.constant 0 : i32
    %c0_i32_0 = arith.constant 0 : i32
    %c0_i32_1 = arith.constant 0 : i32
    %c0_i32_2 = arith.constant 0 : i32
    return %c0_i32, %c0_i32_0, %c0_i32_1 : i32, i32, i32
  }
  func.func @transform_7(%arg0: i32) -> (i32, i32) {
    %c0_i32 = arith.constant 0 : i32
    %c0_i32_0 = arith.constant 0 : i32
    %c0_i32_1 = arith.constant 0 : i32
    return %c0_i32, %c0_i32_0 : i32, i32
  }
  func.func @transform_8(%arg0: i32) -> (i32, i32) {
    %c0_i32 = arith.constant 0 : i32
    %c0_i32_0 = arith.constant 0 : i32
    %c0_i32_1 = arith.constant 0 : i32
    return %c0_i32, %c0_i32_0 : i32, i32
  }
  func.func @transform_9(%arg0: i32) -> (i32, i32, i32) {
    %c0_i32 = arith.constant 0 : i32
    %c0_i32_0 = arith.constant 0 : i32
    %c0_i32_1 = arith.constant 0 : i32
    return %c0_i32, %arg0, %c0_i32_0 : i32, i32, i32
  }
}

</mosaic_0001>

<bundles_post_ra>
// kernel: tpu_custom_call.1
= control target key start
LH: loop header
LB: loop body
LE: loop exit
PB: predicated region body
PF: predicated region fallthrough
CT: control target
= control target key end

     0   :  { %14 = vsyncpa [#allocation5], 0  ;;  %s3006_s0 = inlined_call_operand.vmem [shape: s32[8,1], index: 0, kind: input, shape index: {}]   ;;  %s3007_s1 = inlined_call_operand.hbm [shape: f32[8,8,16], index: 1, kind: input, shape index: {}]   ;;  %s3008_s2 = inlined_call_operand.hbm [shape: f32[16,128], index: 2, kind: input, shape index: {}]   ;;  %s3009_s3 = inlined_call_operand.hbm [shape: f32[128,128], index: 3, kind: input, shape index: {}]   ;;  %s3010_s4 = inlined_call_operand.hbm [shape: f32[2,256,128], index: 4, kind: input, shape index: {}]   ;;  %s3011_s5 = inlined_call_operand.vmem [shape: f32[1,128], index: 5, kind: input, shape index: {}]   ;;  %s3012_s6 = inlined_call_operand.vmem [shape: f32[2,1,128], index: 6, kind: input, shape index: {}]   ;;  %s3013_s7 = inlined_call_operand.hbm [shape: f32[128,128], index: 7, kind: input, shape index: {}]   ;;  %s3014_s8 = inlined_call_operand.vmem [shape: f32[1,128], index: 8, kind: input, shape index: {}]   ;;  %s3015_s9 = inlined_call_operand.hbm [shape: f32[8,8,128], index: 9, kind: output, shape index: {}]  }
   0x1   :  { %15 = vsyncpa [#allocation8], 0 }
   0x2   :  { %16 = vsyncpa [#allocation11], 0 }
   0x3   :  { %17 = vsyncpa [#allocation6], 0  ;;  %s37_s11 = sshll.u32 %s3008_s2, 4  ;;  %s1650_s12 = smov [#allocation7]   ;;  %s38_s11 = int_to_ptr.hbm [resolvable:$true] %s37_s11 }
   0x4   :  { %s39_s13 = sshll.u32 %s1650_s12, 4  ;;  %s63_s16 = sshll.u32 %s3010_s4, 4  ;;  %s40_s13 = int_to_ptr.vmem [resolvable:$true] %s39_s13  ;;  %s64_s16 = int_to_ptr.hbm [resolvable:$true] %s63_s16 }
   0x5   :  { %s1651_s17 = smov 128   ;;  %s1652_s18 = smov 8  }
   0x6   :  { %45 = dma.hbm_to_vmem [thread:$0]  %s38_s11, 256, %s40_s13, [#allocation8], %s1651_s17, %s1651_s17, %s1652_s18  }
   0x7   :  { %s1653_s19 = smov [#allocation10]   ;;  %s24_s2 = sshll.u32 %s3007_s1, 4  ;;  %s25_s2 = int_to_ptr.hbm [resolvable:$true] %s24_s2 }
   0x8   :  { %s65_s20 = sshll.u32 %s1653_s19, 4  ;;  %s50_s24 = sshll.u32 %s3009_s3, 4  ;;  %s66_s20 = int_to_ptr.vmem [resolvable:$true] %s65_s20  ;;  %s51_s24 = int_to_ptr.hbm [resolvable:$true] %s50_s24 }
   0x9   :  { %71 = dma.hbm_to_vmem [thread:$0]  %s64_s16, 8192, %s66_s20, [#allocation11], %s1651_s17, %s1651_s17, %s1652_s18  }
   0xa   :  { %s1654_s25 = smov [#allocation4]   ;;  %s1655_s27 = smov [#allocation9]  }
   0xb   :  { %s26_s26 = sshll.u32 %s1654_s25, 4  ;;  %s52_s1 = sshll.u32 %s1655_s27, 4  ;;  %s27_s26 = int_to_ptr.vmem [resolvable:$true] %s26_s26  ;;  %s53_s1 = int_to_ptr.vmem [resolvable:$true] %s52_s1 }
   0xc   :  { %32 = dma.hbm_to_vmem [thread:$0]  %s25_s2, 1024, %s27_s26, [#allocation5], %s1651_s17, %s1651_s17, %s1652_s18  }
   0xd   :  { %s80_s30 = sshll.u32 %s3013_s7, 4  ;;  %s1656_s3 = smov [#allocation12]   ;;  %s81_s30 = int_to_ptr.hbm [resolvable:$true] %s80_s30 }
   0xe   :  { %58 = dma.hbm_to_vmem [thread:$0]  %s51_s24, 2048, %s53_s1, [#allocation8], %s1651_s17, %s1651_s17, %s1652_s18  }
   0xf   :  { %s82_s10 = sshll.u32 %s1656_s3, 4  ;;  %s83_s10 = int_to_ptr.vmem [resolvable:$true] %s82_s10 }
  0x10   :  { %88 = dma.hbm_to_vmem [thread:$0]  %s81_s30, 2048, %s83_s10, [#allocation11], %s1651_s17, %s1651_s17, %s1652_s18  }
  0x11   :  { %1642 = dma.done.wait [#allocation5], 1024  }
  0x12   :  { %1643 = vsyncadd [#allocation5], 4294966272 }
  0x13   :  { %1644 = dma.done.wait [#allocation8], 2304  }
  0x14   :  { %1645 = vsyncadd [#allocation8], 4294964992 }
  0x15   :  { %1646 = dma.done.wait [#allocation11], 10240  }
  0x16   :  { %1647 = vsyncadd [#allocation11], 4294957056  ;;  %v1740_v0 = vld [vmem:[#allocation9 + $0x78] sm:$0xff]  ;;  %v1742_v1 = vld [vmem:[#allocation9 + $0x70] sm:$0xff]  ;;  %v3016_v2 = vmov 0   ;;  %vm125_vm0 = vcmask 130048  }
  0x17   :  { %3180 = vst [vmem:[#allocation18_spill] sm:$0xff] %v1740_v0  ;;  %284 = vmatpush.msra.mxu1 %v1740_v0  ;;  %1359 = vset.pattern.permute.xlu0 %v3016_v2  ;;  %v1746_v3 = vld [vmem:[#allocation9 + $0x68] sm:$0xff]  ;;  %v1751_v4 = vld [vmem:[#allocation9 + $0x60] sm:$0xff]  ;;  %v120_v5 = vld [vmem:[#allocation7 + $0x8] sm:$0xff]  ;;  %v3022_v38 = vmov 0.0   ;;  %s1311_s1 = sshll.u32 %s3015_s9, 4  ;;  %s1312_s1 = int_to_ptr.hbm [resolvable:$true] %s1311_s1 }
  0x18   :  { %3181 = vst [vmem:[#allocation19_spill] sm:$0xff] %v1742_v1  ;;  %1360 = vset.pattern.permute.xlu1 %v3016_v2  ;;  %1361 = vset.pattern.permute.xlu2 %v3016_v2  ;;  %v119_v6 = vld [vmem:[#allocation7] sm:$0xff]  ;;  %v1754_v8 = vld [vmem:[#allocation9 + $0x58] sm:$0xff]  ;;  %v1773_v14 = vld [vmem:[#allocation10 + $0x68] sm:$0xff] }
  0x19   :  { %3182 = vst [vmem:[#allocation20_spill] sm:$0xff] %v1746_v3  ;;  %285 = vmatpush.msra.mxu1 %v1742_v1  ;;  %164 = vmatpush.msra.mxu0 %v120_v5  ;;  %v111_v7 = vld [vmem:[#allocation4] sm:$0xff]  ;;  %v1761_v10 = vld [vmem:[#allocation10 + $0x78] sm:$0xff]  ;;  %v1775_v15 = vld [vmem:[#allocation9 + $0x48] sm:$0xff] }
  0x1a   :  { %3183 = vst [vmem:[#allocation21_spill] sm:$0xff] %v1751_v4  ;;  %v1759_v9 = vld [vmem:[%s3006_s0] sm:$0xff]  ;;  %1347 = vmatpush.msra.mxu2 %v120_v5  ;;  %315 = vmatpush.msra.mxu3 %v1761_v10  ;;  %v1780_v16 = vld [vmem:[#allocation10 + $0x60] sm:$0xff]  ;;  %v1786_v18 = vld [vmem:[#allocation9 + $0x38] sm:$0xff] }
  0x1b   :  { %286 = vmatpush.msra.mxu1 %v1746_v3  ;;  %3184 = vst [vmem:[#allocation22_spill] sm:$0xff] %v1754_v8  ;;  %165 = vmatpush.msra.mxu0 %v119_v6  ;;  %vm282_vm1 = vcmp.gt.s32.totalorder %v1759_v9, 0  ;;  %v1765_v11 = vld [vmem:[#allocation10 + $0x70] sm:$0xff]  ;;  %vm403_vm2 = vcmp.gt.s32.totalorder %v1759_v9, 1  ;;  %v1782_v17 = vld [vmem:[#allocation9 + $0x40] sm:$0xff]  ;;  %v1789_v20 = vld [vmem:[#allocation10 + $0x58] sm:$0xff] }
  0x1c   :  { %3185 = vst [vmem:[#allocation23_spill] sm:$0xff] %v1759_v9  ;;  %v1767_v12 = vld [vmem:[#allocation9 + $0x50] sm:$0xff]  ;;  %1326 = vmatmul.msk.f32.vlgmr.msra.gmra.mxu0 %vm125_vm0, %v111_v7  ;;  %v306_v13 = vsel %vm282_vm1, 1, %v3016_v2  ;;  %316 = vmatpush.msra.mxu3 %v1765_v11  ;;  %v428_v19 = vsel %vm403_vm2, 1, %v3016_v2  ;;  %v1799_v23 = vld [vmem:[#allocation10 + $0x48] sm:$0xff]  ;;  %vm993_vm3 = vcmp.gt.s32.totalorder %v1759_v9, 6 }
  0x1d   :  { %3186 = vst [vmem:[#allocation24_spill] sm:$0xff] %v1761_v10  ;;  %287 = vmatpush.msra.mxu1 %v1751_v4  ;;  %308 = vperm.xlu0 %1359, %v306_v13   ;;  %v1793_v21 = vld [vmem:[#allocation10 + $0x50] sm:$0xff]  ;;  %v1801_v24 = vld [vmem:[#allocation9 + $0x28] sm:$0xff]  ;;  %v1806_v25 = vld [vmem:[#allocation10 + $0x40] sm:$0xff]  ;;  %v1018_v29 = vsel %vm993_vm3, 1, %v3016_v2 }
  0x1e   :  { %3187 = vst [vmem:[#allocation25_spill] sm:$0xff] %v1767_v12  ;;  %1348 = vmatpush.msra.mxu2 %v119_v6  ;;  %317 = vmatpush.msra.mxu3 %v1773_v14  ;;  %v1795_v22 = vld [vmem:[#allocation9 + $0x30] sm:$0xff]  ;;  %v1808_v26 = vld [vmem:[#allocation9 + $0x20] sm:$0xff]  ;;  %v1812_v27 = vld [vmem:[#allocation10 + $0x38] sm:$0xff] }
  0x1f   :  { %288 = vmatpush.msra.mxu1 %v1754_v8  ;;  %3188 = vst [vmem:[#allocation26_spill] sm:$0xff] %v1773_v14  ;;  %v1814_v28 = vld [vmem:[#allocation9 + $0x18] sm:$0xff]  ;;  %v1819_v30 = vld [vmem:[#allocation10 + $0x30] sm:$0xff]  ;;  %v1825_v32 = vld [vmem:[#allocation10 + $0x28] sm:$0xff] }
  0x20   :  { %3189 = vst [vmem:[#allocation27_spill] sm:$0xff] %v1775_v15  ;;  %318 = vmatpush.msra.mxu3 %v1780_v16  ;;  %v1821_v31 = vld [vmem:[#allocation9 + $0x10] sm:$0xff]  ;;  %v1827_v33 = vld [vmem:[#allocation9 + $0x8] sm:$0xff]  ;;  %v1831_v34 = vld [vmem:[#allocation10 + $0x20] sm:$0xff] }
  0x21   :  { %289 = vmatpush.msra.mxu1 %v1767_v12  ;;  %3190 = vst [vmem:[#allocation28_spill] sm:$0xff] %v1780_v16  ;;  %v1833_v35 = vld [vmem:[#allocation9] sm:$0xff]  ;;  %v1837_v36 = vld [vmem:[#allocation10 + $0x18] sm:$0xff]  ;;  %v1841_v37 = vld [vmem:[#allocation10 + $0x10] sm:$0xff] }
  0x22   :  { %3191 = vst [vmem:[#allocation29_spill] sm:$0xff] %v1782_v17  ;;  %319 = vmatpush.msra.mxu3 %v1789_v20  ;;  %v1845_v39 = vld [vmem:[#allocation10 + $0x8] sm:$0xff]  ;;  %v1848_v40 = vld [vmem:[#allocation10] sm:$0xff]  ;;  %v1851_v41 = vld [vmem:[#allocation10 + $0xf8] sm:$0xff] }
  0x23   :  { %290 = vmatpush.msra.mxu1 %v1775_v15  ;;  %3192 = vst [vmem:[#allocation30_spill] sm:$0xff] %v1786_v18  ;;  %v1854_v42 = vld [vmem:[#allocation10 + $0xf0] sm:$0xff]  ;;  %v1857_v43 = vld [vmem:[#allocation10 + $0xe8] sm:$0xff]  ;;  %v1860_v44 = vld [vmem:[#allocation10 + $0xe0] sm:$0xff] }
  0x24   :  { %3193 = vst [vmem:[#allocation31_spill] sm:$0xff] %v1795_v22  ;;  %320 = vmatpush.msra.mxu3 %v1793_v21  ;;  %v1863_v45 = vld [vmem:[#allocation10 + $0xd8] sm:$0xff]  ;;  %v1866_v46 = vld [vmem:[#allocation10 + $0xd0] sm:$0xff]  ;;  %v1869_v47 = vld [vmem:[#allocation10 + $0xc8] sm:$0xff] }
  0x25   :  { %291 = vmatpush.msra.mxu1 %v1782_v17  ;;  %430 = vperm.xlu0 %1359, %v428_v19   ;;  %3194 = vst [vmem:[#allocation32_spill] sm:$0xff] %v1801_v24  ;;  %v1873_v48 = vld [vmem:[#allocation10 + $0xc0] sm:$0xff]  ;;  %v1875_v49 = vld [vmem:[#allocation10 + $0xb8] sm:$0xff]  ;;  %v1878_v50 = vld [vmem:[#allocation10 + $0xb0] sm:$0xff] }
  0x26   :  { %3195 = vst [vmem:[#allocation33_spill] sm:$0xff] %v1808_v26  ;;  %321 = vmatpush.msra.mxu3 %v1799_v23  ;;  %v1882_v51 = vld [vmem:[#allocation10 + $0xa8] sm:$0xff]  ;;  %v1885_v52 = vld [vmem:[#allocation10 + $0xa0] sm:$0xff]  ;;  %v1888_v53 = vld [vmem:[#allocation10 + $0x98] sm:$0xff] }
  0x27   :  { %292 = vmatpush.msra.mxu1 %v1786_v18  ;;  %3196 = vst [vmem:[#allocation34_spill] sm:$0xff] %v1814_v28  ;;  %v1891_v54 = vld [vmem:[#allocation10 + $0x90] sm:$0xff]  ;;  %v1893_v55 = vld [vmem:[#allocation10 + $0x88] sm:$0xff]  ;;  %v1896_v56 = vld [vmem:[#allocation10 + $0x80] sm:$0xff] }
  0x28   :  { %322 = vmatpush.msra.mxu3 %v1806_v25  ;;  %3197 = vst [vmem:[#allocation35_spill] sm:$0xff] %v1821_v31  ;;  %v1903_v57 = vld [vmem:[%s3011_s5] ss:$0 sm:$0xff]  ;;  %v112_v5 = vld [vmem:[#allocation4 + $0x8] sm:$0xff]  ;;  %v1959_v9 = vld [vmem:[#allocation10 + $0x1c8] sm:$0xff] }
  0x29   :  { %293 = vmatpush.msra.mxu1 %v1795_v22  ;;  %3198 = vst [vmem:[#allocation36_spill] sm:$0xff] %v1827_v33  ;;  %v1914_v6 = vld [vmem:[#allocation10 + $0x1f8] sm:$0xff]  ;;  %1327 = vmatmul.msk.f32.gmra.mxu0 %vm125_vm0, %v112_v5  ;;  %v1918_v7 = vld [vmem:[#allocation10 + $0x1f0] sm:$0xff] }
  0x2a   :  { %323 = vmatpush.msra.mxu3 %v1812_v27  ;;  %3199 = vst [vmem:[#allocation37_spill] sm:$0xff] %v1833_v35  ;;  %v1920_v13 = vld [vmem:[#allocation10 + $0x178] sm:$0xff]  ;;  %380 = vmatpush.msrb.mxu0 %v1914_v6  ;;  %v1924_v19 = vld [vmem:[#allocation10 + $0x170] sm:$0xff] }
  0x2b   :  { %294 = vmatpush.msra.mxu1 %v1801_v24  ;;  %3200 = vst [vmem:[#allocation38_spill] sm:$0xff] %v1851_v41  ;;  %476 = vmatpush.msrb.mxu2 %v1920_v13  ;;  %v1948_v5 = vld [vmem:[#allocation10 + $0x158] sm:$0xff]  ;;  %v1951_v2 = vld [vmem:[#allocation10 + $0x1d0] sm:$0xff] }
  0x2c   :  { %324 = vmatpush.msra.mxu3 %v1819_v30  ;;  %3201 = vst [vmem:[#allocation39_spill] sm:$0xff] %v1854_v42  ;;  %381 = vmatpush.msrb.mxu0 %v1918_v7 }
  0x2d   :  { %295 = vmatpush.msra.mxu1 %v1808_v26  ;;  %1020 = vperm.xlu0 %1359, %v1018_v29   ;;  %3202 = vst [vmem:[#allocation40_spill] sm:$0xff] %v1857_v43  ;;  %v1927_v29 = vld [vmem:[#allocation10 + $0x1e8] sm:$0xff] }
  0x2e   :  { %325 = vmatpush.msra.mxu3 %v1825_v32  ;;  %3203 = vst [vmem:[#allocation41_spill] sm:$0xff] %v1860_v44  ;;  %477 = vmatpush.msrb.mxu2 %v1924_v19 }
  0x2f   :  { %296 = vmatpush.msra.mxu1 %v1814_v28  ;;  %3204 = vst [vmem:[#allocation42_spill] sm:$0xff] %v1863_v45  ;;  %382 = vmatpush.msrb.mxu0 %v1927_v29 }
  0x30   :  { %326 = vmatpush.msra.mxu3 %v1831_v34  ;;  %3205 = vst [vmem:[#allocation43_spill] sm:$0xff] %v1866_v46 }
  0x31   :  { %297 = vmatpush.msra.mxu1 %v1821_v31  ;;  %3206 = vst [vmem:[#allocation44_spill] sm:$0xff] %v1869_v47 }
  0x32   :  { %327 = vmatpush.msra.mxu3 %v1837_v36  ;;  %3207 = vst [vmem:[#allocation45_spill] sm:$0xff] %v1873_v48 }
  0x33   :  { %298 = vmatpush.msra.mxu1 %v1827_v33  ;;  %3208 = vst [vmem:[#allocation46_spill] sm:$0xff] %v1875_v49 }
  0x34   :  { %328 = vmatpush.msra.mxu3 %v1841_v37  ;;  %3209 = vst [vmem:[#allocation47_spill] sm:$0xff] %v1878_v50 }
  0x35   :  { %299 = vmatpush.msra.mxu1 %v1833_v35  ;;  %3210 = vst [vmem:[#allocation48_spill] sm:$0xff] %v1882_v51 }
  0x36   :  { %300 = vmatmul.f32.vlgmr.msra.gmra.mxu1 %v3022_v38  ;;  %329 = vmatpush.msra.mxu3 %v1845_v39  ;;  %3211 = vst [vmem:[#allocation49_spill] sm:$0xff] %v1885_v52 }
  0x37   :  { %3212 = vst [vmem:[#allocation50_spill] sm:$0xff] %v1888_v53  ;;  %360 = vmatpush.msrb.mxu1 %v1920_v13 }
  0x38   :  { %330 = vmatpush.msra.mxu3 %v1848_v40  ;;  %3213 = vst [vmem:[#allocation51_spill] sm:$0xff] %v1891_v54 }
  0x39   :  { %3214 = vst [vmem:[#allocation52_spill] sm:$0xff] %v1893_v55  ;;  %361 = vmatpush.msrb.mxu1 %v1924_v19 }
  0x3a   :  { %335 = vmatpush.msrb.mxu3 %v1851_v41  ;;  %3215 = vst [vmem:[#allocation53_spill] sm:$0xff] %v1896_v56 }
  0x3b   :  { %3216 = vst [vmem:[#allocation54_spill] sm:$0xff] %v1903_v57 }
  0x3c   :  { %336 = vmatpush.msrb.mxu3 %v1854_v42  ;;  %3219 = vst [vmem:[#allocation57_spill] sm:$0xff] %v1948_v5 }
  0x3e   :  { %337 = vmatpush.msrb.mxu3 %v1857_v43 }
  0x40   :  { %338 = vmatpush.msrb.mxu3 %v1860_v44 }
  0x42   :  { %339 = vmatpush.msrb.mxu3 %v1863_v45 }
  0x44   :  { %340 = vmatpush.msrb.mxu3 %v1866_v46 }
  0x46   :  { %341 = vmatpush.msrb.mxu3 %v1869_v47 }
  0x48   :  { %342 = vmatpush.msrb.mxu3 %v1873_v48 }
  0x4a   :  { %343 = vmatpush.msrb.mxu3 %v1875_v49 }
  0x4c   :  { %344 = vmatpush.msrb.mxu3 %v1878_v50 }
  0x4e   :  { %345 = vmatpush.msrb.mxu3 %v1882_v51 }
  0x50   :  { %346 = vmatpush.msrb.mxu3 %v1885_v52 }
  0x52   :  { %347 = vmatpush.msrb.mxu3 %v1888_v53 }
  0x54   :  { %348 = vmatpush.msrb.mxu3 %v1891_v54 }
  0x56   :  { %349 = vmatpush.msrb.mxu3 %v1893_v55 }
  0x58   :  { %350 = vmatpush.msrb.mxu3 %v1896_v56 }
  0x8f   :  { %v1906_v62 = vpop.permute.xlu0 %308 }
  0x90   :  { %3217 = vst [vmem:[#allocation55_spill] sm:$0xff] %v1906_v62  ;;  %vm310_vm4 = vcmp.eq.s32.totalorder %v1906_v62, 1  ;;  %v2662_v62 = vld [vmem:[#allocation10 + $0x90] sm:$0xff] }
  0x99   :  { %v167_v58 = vpop.f32.mrf.mxu0 }
  0x9a   :  { %v168_v59 = vadd.f32 %v1903_v57, %v167_v58  ;;  %v1929_v58 = vld [vmem:[#allocation10 + $0x168] sm:$0xff]  ;;  %v1955_v57 = vld [vmem:[#allocation10 + $0x150] sm:$0xff] }
  0x9b   :  { %362 = vmatpush.msrb.mxu1 %v1929_v58  ;;  %478 = vmatpush.msrb.mxu2 %v1929_v58  ;;  %3220 = vst [vmem:[#allocation58_spill] sm:$0xff] %v1955_v57 }
  0xb3   :  { %v301_v60 = vpop.f32.mrf.mxu1 }
  0xb4   :  { %v304_v61 = vadd.f32 %v301_v60, %v168_v59  ;;  %v1935_v59 = vld [vmem:[#allocation10 + $0x1e0] sm:$0xff] }
  0xb5   :  { %v1940_v60 = vld [vmem:[#allocation10 + $0x160] sm:$0xff]  ;;  %383 = vmatpush.msrb.mxu0 %v1935_v59 }
  0xb6   :  { %1366 = vtanh.f32 %v304_v61  ;;  %3218 = vst [vmem:[#allocation56_spill] sm:$0xff] %v1940_v60  ;;  %v1943_v61 = vld [vmem:[#allocation10 + $0x1d8] sm:$0xff]  ;;  %363 = vmatpush.msrb.mxu1 %v1940_v60  ;;  %479 = vmatpush.msrb.mxu2 %v1940_v60 }
  0xb7   :  { %384 = vmatpush.msrb.mxu0 %v1943_v61 }
  0xb8   :  { %364 = vmatpush.msrb.mxu1 %v1948_v5  ;;  %480 = vmatpush.msrb.mxu2 %v1948_v5 }
  0xb9   :  { %385 = vmatpush.msrb.mxu0 %v1951_v2 }
  0xba   :  { %365 = vmatpush.msrb.mxu1 %v1955_v57  ;;  %481 = vmatpush.msrb.mxu2 %v1955_v57 }
  0xbb   :  { %386 = vmatpush.msrb.mxu0 %v1959_v9 }
  0xbc   :  { %v1909_v63 = vpop.eup %1366 }
  0xbd   :  { %1334 = vmatmul.msk.f32.vlgmr.msra.gmra.mxu3 %vm310_vm4, %v1909_v63 }
  0xbe   :  { %406 = vmatpush.msra.mxu3 %v1740_v0  ;;  %v1995_v0 = vld [vmem:[#allocation10 + $0x128] sm:$0xff] }
  0xbf   :  { %3225 = vst [vmem:[#allocation63_spill] sm:$0xff] %v1995_v0 }
  0xc0   :  { %407 = vmatpush.msra.mxu3 %v1742_v1  ;;  %v1987_v1 = vld [vmem:[#allocation10 + $0x130] sm:$0xff] }
  0xc1   :  { %3224 = vst [vmem:[#allocation62_spill] sm:$0xff] %v1987_v1 }
  0xc2   :  { %408 = vmatpush.msra.mxu3 %v1746_v3  ;;  %v1979_v3 = vld [vmem:[#allocation10 + $0x138] sm:$0xff] }
  0xc3   :  { %3223 = vst [vmem:[#allocation61_spill] sm:$0xff] %v1979_v3 }
  0xc4   :  { %409 = vmatpush.msra.mxu3 %v1751_v4  ;;  %v1971_v4 = vld [vmem:[#allocation10 + $0x140] sm:$0xff] }
  0xc5   :  { %351 = vmatmul.f32.vlgmr.msrb.gmra.mxu3 %v3022_v38  ;;  %v1963_v38 = vld [vmem:[#allocation10 + $0x148] sm:$0xff]  ;;  %3222 = vst [vmem:[#allocation60_spill] sm:$0xff] %v1971_v4 }
  0xc6   :  { %410 = vmatpush.msra.mxu3 %v1754_v8  ;;  %3221 = vst [vmem:[#allocation59_spill] sm:$0xff] %v1963_v38  ;;  %v1967_v8 = vld [vmem:[#allocation10 + $0x1c0] sm:$0xff]  ;;  %366 = vmatpush.msrb.mxu1 %v1963_v38 }
  0xc7   :  { %387 = vmatpush.msrb.mxu0 %v1967_v8  ;;  %482 = vmatpush.msrb.mxu2 %v1963_v38 }
  0xc8   :  { %411 = vmatpush.msra.mxu3 %v1767_v12  ;;  %v1975_v12 = vld [vmem:[#allocation10 + $0x1b8] sm:$0xff]  ;;  %367 = vmatpush.msrb.mxu1 %v1971_v4 }
  0xc9   :  { %388 = vmatpush.msrb.mxu0 %v1975_v12  ;;  %483 = vmatpush.msrb.mxu2 %v1971_v4  ;;  %v2003_v4 = vld [vmem:[#allocation10 + $0x120] sm:$0xff] }
  0xca   :  { %412 = vmatpush.msra.mxu3 %v1775_v15  ;;  %v1983_v15 = vld [vmem:[#allocation10 + $0x1b0] sm:$0xff]  ;;  %368 = vmatpush.msrb.mxu1 %v1979_v3  ;;  %3226 = vst [vmem:[#allocation64_spill] sm:$0xff] %v2003_v4 }
  0xcb   :  { %389 = vmatpush.msrb.mxu0 %v1983_v15  ;;  %484 = vmatpush.msrb.mxu2 %v1979_v3  ;;  %v2011_v3 = vld [vmem:[#allocation10 + $0x118] sm:$0xff] }
  0xcc   :  { %413 = vmatpush.msra.mxu3 %v1782_v17  ;;  %v1991_v17 = vld [vmem:[#allocation10 + $0x1a8] sm:$0xff]  ;;  %369 = vmatpush.msrb.mxu1 %v1987_v1  ;;  %3227 = vst [vmem:[#allocation65_spill] sm:$0xff] %v2011_v3 }
  0xcd   :  { %390 = vmatpush.msrb.mxu0 %v1991_v17  ;;  %485 = vmatpush.msrb.mxu2 %v1987_v1  ;;  %v2019_v1 = vld [vmem:[#allocation10 + $0x110] sm:$0xff] }
  0xce   :  { %414 = vmatpush.msra.mxu3 %v1786_v18  ;;  %v1999_v18 = vld [vmem:[#allocation10 + $0x1a0] sm:$0xff]  ;;  %370 = vmatpush.msrb.mxu1 %v1995_v0  ;;  %3228 = vst [vmem:[#allocation66_spill] sm:$0xff] %v2019_v1 }
  0xcf   :  { %391 = vmatpush.msrb.mxu0 %v1999_v18  ;;  %486 = vmatpush.msrb.mxu2 %v1995_v0  ;;  %v2027_v0 = vld [vmem:[#allocation10 + $0x108] sm:$0xff] }
  0xd0   :  { %415 = vmatpush.msra.mxu3 %v1795_v22  ;;  %v2007_v22 = vld [vmem:[#allocation10 + $0x198] sm:$0xff]  ;;  %371 = vmatpush.msrb.mxu1 %v2003_v4  ;;  %3229 = vst [vmem:[#allocation67_spill] sm:$0xff] %v2027_v0 }
  0xd1   :  { %392 = vmatpush.msrb.mxu0 %v2007_v22  ;;  %487 = vmatpush.msrb.mxu2 %v2003_v4  ;;  %v2035_v4 = vld [vmem:[#allocation10 + $0x100] sm:$0xff] }
  0xd2   :  { %416 = vmatpush.msra.mxu3 %v1801_v24  ;;  %v2015_v24 = vld [vmem:[#allocation10 + $0x190] sm:$0xff]  ;;  %372 = vmatpush.msrb.mxu1 %v2011_v3  ;;  %3230 = vst [vmem:[#allocation68_spill] sm:$0xff] %v2035_v4 }
  0xd3   :  { %393 = vmatpush.msrb.mxu0 %v2015_v24  ;;  %488 = vmatpush.msrb.mxu2 %v2011_v3 }
  0xd4   :  { %417 = vmatpush.msra.mxu3 %v1808_v26  ;;  %v2023_v26 = vld [vmem:[#allocation10 + $0x188] sm:$0xff]  ;;  %373 = vmatpush.msrb.mxu1 %v2019_v1 }
  0xd5   :  { %394 = vmatpush.msrb.mxu0 %v2023_v26  ;;  %489 = vmatpush.msrb.mxu2 %v2019_v1 }
  0xd6   :  { %418 = vmatpush.msra.mxu3 %v1814_v28  ;;  %v2031_v28 = vld [vmem:[#allocation10 + $0x180] sm:$0xff]  ;;  %374 = vmatpush.msrb.mxu1 %v2027_v0 }
  0xd7   :  { %395 = vmatpush.msrb.mxu0 %v2031_v28  ;;  %490 = vmatpush.msrb.mxu2 %v2027_v0 }
  0xd8   :  { %419 = vmatpush.msra.mxu3 %v1821_v31  ;;  %375 = vmatpush.msrb.mxu1 %v2035_v4 }
  0xd9   :  { %434 = vmatpush.msra.mxu0 %v1761_v10  ;;  %491 = vmatpush.msrb.mxu2 %v2035_v4 }
  0xda   :  { %420 = vmatpush.msra.mxu3 %v1827_v33  ;;  %454 = vmatpush.msra.mxu1 %v1851_v41  ;;  %v3243_v41 = vld [vmem:[#allocation27_spill] sm:$0xff] }
  0xdb   :  { %435 = vmatpush.msra.mxu0 %v1765_v11 }
  0xdc   :  { %421 = vmatpush.msra.mxu3 %v1833_v35  ;;  %455 = vmatpush.msra.mxu1 %v1854_v42 }
  0xdd   :  { %1336 = vmatmul.msk.f32.vlgmr.msra.gmra.mxu3 %vm310_vm4, %v1909_v63  ;;  %436 = vmatpush.msra.mxu0 %v1773_v14 }
  0xde   :  { %496 = vmatpush.msrb.mxu3 %v1914_v6  ;;  %456 = vmatpush.msra.mxu1 %v1857_v43  ;;  %v3242_v43 = vld [vmem:[#allocation25_spill] sm:$0xff] }
  0xdf   :  { %437 = vmatpush.msra.mxu0 %v1780_v16 }
  0xe0   :  { %497 = vmatpush.msrb.mxu3 %v1918_v7  ;;  %457 = vmatpush.msra.mxu1 %v1860_v44  ;;  %v3241_v44 = vld [vmem:[#allocation22_spill] sm:$0xff] }
  0xe1   :  { %438 = vmatpush.msra.mxu0 %v1789_v20 }
  0xe2   :  { %498 = vmatpush.msrb.mxu3 %v1927_v29  ;;  %458 = vmatpush.msra.mxu1 %v1863_v45  ;;  %v3240_v45 = vld [vmem:[#allocation21_spill] sm:$0xff] }
  0xe3   :  { %439 = vmatpush.msra.mxu0 %v1793_v21 }
  0xe4   :  { %499 = vmatpush.msrb.mxu3 %v1935_v59  ;;  %459 = vmatpush.msra.mxu1 %v1866_v46  ;;  %v3239_v46 = vld [vmem:[#allocation20_spill] sm:$0xff] }
  0xe5   :  { %440 = vmatpush.msra.mxu0 %v1799_v23 }
  0xe6   :  { %500 = vmatpush.msrb.mxu3 %v1943_v61  ;;  %460 = vmatpush.msra.mxu1 %v1869_v47  ;;  %v3238_v47 = vld [vmem:[#allocation19_spill] sm:$0xff] }
  0xe7   :  { %441 = vmatpush.msra.mxu0 %v1806_v25 }
  0xe8   :  { %501 = vmatpush.msrb.mxu3 %v1951_v2  ;;  %461 = vmatpush.msra.mxu1 %v1873_v48  ;;  %v3237_v48 = vld [vmem:[#allocation18_spill] sm:$0xff] }
  0xe9   :  { %442 = vmatpush.msra.mxu0 %v1812_v27 }
  0xea   :  { %502 = vmatpush.msrb.mxu3 %v1959_v9  ;;  %462 = vmatpush.msra.mxu1 %v1875_v49  ;;  %v3236_v49 = vmov 0.0  }
  0xeb   :  { %443 = vmatpush.msra.mxu0 %v1819_v30 }
  0xec   :  { %503 = vmatpush.msrb.mxu3 %v1967_v8  ;;  %463 = vmatpush.msra.mxu1 %v1878_v50  ;;  %v114_v50 = vld [vmem:[#allocation4 + $0x18] sm:$0xff] }
  0xed   :  { %444 = vmatpush.msra.mxu0 %v1825_v32 }
  0xee   :  { %504 = vmatpush.msrb.mxu3 %v1975_v12  ;;  %464 = vmatpush.msra.mxu1 %v1882_v51  ;;  %v113_v51 = vld [vmem:[#allocation4 + $0x10] sm:$0xff] }
  0xef   :  { %445 = vmatpush.msra.mxu0 %v1831_v34 }
  0xf0   :  { %505 = vmatpush.msrb.mxu3 %v1983_v15  ;;  %465 = vmatpush.msra.mxu1 %v1885_v52  ;;  %v3235_v52 = vld [vmem:[#allocation64_spill] sm:$0xff] }
  0xf1   :  { %446 = vmatpush.msra.mxu0 %v1837_v36 }
  0xf2   :  { %506 = vmatpush.msrb.mxu3 %v1991_v17  ;;  %466 = vmatpush.msra.mxu1 %v1888_v53  ;;  %v3234_v53 = vld [vmem:[#allocation63_spill] sm:$0xff] }
  0xf3   :  { %447 = vmatpush.msra.mxu0 %v1841_v37 }
  0xf4   :  { %507 = vmatpush.msrb.mxu3 %v1999_v18  ;;  %467 = vmatpush.msra.mxu1 %v1891_v54  ;;  %v3232_v54 = vld [vmem:[#allocation61_spill] sm:$0xff] }
  0xf5   :  { %448 = vmatpush.msra.mxu0 %v1845_v39 }
  0xf6   :  { %508 = vmatpush.msrb.mxu3 %v2007_v22  ;;  %468 = vmatpush.msra.mxu1 %v1893_v55  ;;  %v3231_v55 = vld [vmem:[#allocation60_spill] sm:$0xff] }
  0xf7   :  { %449 = vmatpush.msra.mxu0 %v1848_v40 }
  0xf8   :  { %509 = vmatpush.msrb.mxu3 %v2015_v24  ;;  %469 = vmatpush.msra.mxu1 %v1896_v56  ;;  %v3233_v56 = vld [vmem:[#allocation62_spill] sm:$0xff] }
  0xf9   :  { %1328 = vmatmul.msk.f32.gmra.mxu0 %vm125_vm0, %v113_v51  ;;  %v3246_v51 = vld [vmem:[#allocation30_spill] sm:$0xff] }
  0xfa   :  { %510 = vmatpush.msrb.mxu3 %v2023_v26 }
  0xfc   :  { %511 = vmatpush.msrb.mxu3 %v2031_v28 }
  0xfe   :  { %594 = vmatpush.msra.mxu3 %v1920_v13 }
 0x100   :  { %595 = vmatpush.msra.mxu3 %v1924_v19 }
 0x101   :  { %1329 = vmatmul.msk.f32.gmra.mxu0 %vm125_vm0, %v114_v50  ;;  %v2124_v50 = vld [vmem:[%s3012_s6] ss:$0 sm:$0xff] }
 0x102   :  { %596 = vmatpush.msra.mxu3 %v1929_v58  ;;  %3244 = vst [vmem:[#allocation18_spill] sm:$0xff] %v2124_v50 }
 0x104   :  { %597 = vmatpush.msra.mxu3 %v1940_v60 }
 0x106   :  { %598 = vmatpush.msra.mxu3 %v1948_v5 }
 0x108   :  { %599 = vmatpush.msra.mxu3 %v1955_v57 }
 0x109   :  { %396 = vmatmul.f32.vlgmr.msrb.gmra.mxu0 %v3236_v49  ;;  %v3245_v49 = vld [vmem:[#allocation29_spill] sm:$0xff] }
 0x10a   :  { %600 = vmatpush.msra.mxu3 %v1963_v38  ;;  %524 = vmatpush.msrb.mxu0 %v3237_v48 }
 0x10c   :  { %601 = vmatpush.msra.mxu3 %v3231_v55  ;;  %525 = vmatpush.msrb.mxu0 %v3238_v47 }
 0x10e   :  { %602 = vmatpush.msra.mxu3 %v3232_v54  ;;  %526 = vmatpush.msrb.mxu0 %v3239_v46 }
 0x110   :  { %603 = vmatpush.msra.mxu3 %v3233_v56  ;;  %527 = vmatpush.msrb.mxu0 %v3240_v45  ;;  %v3250_v56 = vld [vmem:[#allocation34_spill] sm:$0xff] }
 0x112   :  { %604 = vmatpush.msra.mxu3 %v3234_v53  ;;  %528 = vmatpush.msrb.mxu0 %v3241_v44  ;;  %v3249_v53 = vld [vmem:[#allocation33_spill] sm:$0xff] }
 0x114   :  { %605 = vmatpush.msra.mxu3 %v3235_v52  ;;  %529 = vmatpush.msrb.mxu0 %v3242_v43  ;;  %v3248_v52 = vld [vmem:[#allocation32_spill] sm:$0xff] }
 0x116   :  { %606 = vmatpush.msra.mxu3 %v2011_v3  ;;  %530 = vmatpush.msrb.mxu0 %v3243_v41 }
 0x118   :  { %607 = vmatpush.msra.mxu3 %v2019_v1  ;;  %531 = vmatpush.msrb.mxu0 %v3245_v49 }
 0x11a   :  { %608 = vmatpush.msra.mxu3 %v2027_v0  ;;  %532 = vmatpush.msrb.mxu0 %v3246_v51  ;;  %v3247_v0 = vld [vmem:[#allocation31_spill] sm:$0xff] }
 0x11c   :  { %609 = vmatpush.msra.mxu3 %v2035_v4  ;;  %533 = vmatpush.msrb.mxu0 %v3247_v0 }
 0x11e   :  { %534 = vmatpush.msrb.mxu0 %v3248_v52 }
 0x120   :  { %535 = vmatpush.msrb.mxu0 %v3249_v53 }
 0x122   :  { %536 = vmatpush.msrb.mxu0 %v3250_v56 }
 0x124   :  { %537 = vmatpush.msrb.mxu0 %v1821_v31 }
 0x126   :  { %538 = vmatpush.msrb.mxu0 %v1827_v33 }
 0x128   :  { %539 = vmatpush.msrb.mxu0 %v1833_v35 }
 0x140   :  { %v332_v42 = vpop.f32.mrf.mxu3 }
 0x141   :  { %v333_v4 = vadd.f32 %v2124_v50, %v332_v42  ;;  %v170_v42 = vpop.f32.mrf.mxu0 }
 0x148   :  { %v352_v1 = vpop.f32.mrf.mxu3 }
 0x149   :  { %v353_v3 = vadd.f32 %v352_v1, %v333_v4  ;;  %v3251_v1 = vld [vmem:[#allocation23_spill] sm:$0xff] }
 0x14a   :  { %vm521_vm5 = vcmp.gt.s32.totalorder %v3251_v1, 2  ;;  %vm639_vm6 = vcmp.gt.s32.totalorder %v3251_v1, 3  ;;  %vm1111_vm7 = vcmp.gt.s32.totalorder %v3251_v1, 7  ;;  %v3260_v1 = vld [vmem:[#allocation65_spill] sm:$0xff] }
 0x14b   :  { %1368 = vtanh.f32 %v353_v3  ;;  %v3252_v3 = vmov 0  }
 0x14c   :  { %v546_v4 = vsel %vm521_vm5, 1, %v3252_v3  ;;  %v664_v50 = vsel %vm639_vm6, 1, %v3252_v3 }
 0x14d   :  { %548 = vperm.xlu1 %1360, %v546_v4  }
 0x151   :  { %v2134_v54 = vpop.eup %1368 }
 0x152   :  { %1335 = vmatmul.msk.f32.vlgmr.msrb.gmra.mxu1 %vm310_vm4, %v2134_v54 }
 0x153   :  { %552 = vmatpush.msrb.mxu1 %v1761_v10  ;;  %v3253_v10 = vld [vmem:[#allocation54_spill] sm:$0xff] }
 0x154   :  { %v171_v55 = vadd.f32 %v3253_v10, %v170_v42 }
 0x155   :  { %553 = vmatpush.msrb.mxu1 %v1765_v11  ;;  %666 = vperm.xlu1 %1360, %v664_v50   ;;  %v2162_v50 = vpop.permute.xlu0 %430 }
 0x156   :  { %3254 = vst [vmem:[#allocation19_spill] sm:$0xff] %v2162_v50  ;;  %vm432_vm8 = vcmp.eq.s32.totalorder %v2162_v50, 1  ;;  %v2655_v50 = vld [vmem:[#allocation10 + $0x98] sm:$0xff] }
 0x157   :  { %554 = vmatpush.msrb.mxu1 %v1773_v14  ;;  %v1136_v14 = vsel %vm1111_vm7, 1, %v3252_v3  ;;  %v115_v3 = vld [vmem:[#allocation4 + $0x20] sm:$0xff] }
 0x158   :  { %1330 = vmatmul.msk.f32.vlgmr.msra.gmra.mxu2 %vm125_vm0, %v115_v3  ;;  %v3271_v3 = vld [vmem:[#allocation45_spill] sm:$0xff] }
 0x159   :  { %555 = vmatpush.msrb.mxu1 %v1780_v16 }
 0x15a   :  { %1337 = vmatmul.msk.f32.vlgmr.msra.gmra.mxu1 %vm310_vm4, %v2134_v54 }
 0x15b   :  { %556 = vmatpush.msrb.mxu1 %v1789_v20 }
 0x15d   :  { %557 = vmatpush.msrb.mxu1 %v1793_v21  ;;  %1138 = vperm.xlu1 %1360, %v1136_v14   ;;  %v3255_v14 = vld [vmem:[#allocation60_spill] sm:$0xff] }
 0x15f   :  { %558 = vmatpush.msrb.mxu1 %v1799_v23 }
 0x160   :  { %v423_v4 = vpop.f32.mrf.mxu3 }
 0x161   :  { %v426_v16 = vadd.f32 %v423_v4, %v171_v55  ;;  %559 = vmatpush.msrb.mxu1 %v1806_v25  ;;  %v311_v55 = vsel %vm310_vm4, %v1909_v63, 0.0  ;;  %v3259_v63 = vld [vmem:[#allocation64_spill] sm:$0xff]  ;;  %v3261_v4 = vld [vmem:[#allocation66_spill] sm:$0xff] }
 0x163   :  { %1370 = vtanh.f32 %v426_v16  ;;  %560 = vmatpush.msrb.mxu1 %v1812_v27 }
 0x165   :  { %561 = vmatpush.msrb.mxu1 %v1819_v30 }
 0x167   :  { %562 = vmatpush.msrb.mxu1 %v1825_v32 }
 0x169   :  { %v1371_v42 = vpop.eup %1370  ;;  %563 = vmatpush.msrb.mxu1 %v1831_v34 }
 0x16a   :  { %v2171_v16 = vsel %vm432_vm8, %v1371_v42, %v311_v55  ;;  %v3262_v42 = vld [vmem:[#allocation67_spill] sm:$0xff]  ;;  %v3263_v55 = vld [vmem:[#allocation68_spill] sm:$0xff] }
 0x16b   :  { %450 = vmatmul.f32.vlgmr.msra.gmra.mxu0 %v2171_v16  ;;  %564 = vmatpush.msrb.mxu1 %v1837_v36 }
 0x16c   :  { %614 = vmatpush.msra.mxu0 %v1914_v6 }
 0x16d   :  { %565 = vmatpush.msrb.mxu1 %v1841_v37 }
 0x16e   :  { %615 = vmatpush.msra.mxu0 %v1918_v7 }
 0x16f   :  { %566 = vmatpush.msrb.mxu1 %v1845_v39 }
 0x170   :  { %616 = vmatpush.msra.mxu0 %v1927_v29 }
 0x171   :  { %567 = vmatpush.msrb.mxu1 %v1848_v40 }
 0x172   :  { %617 = vmatpush.msra.mxu0 %v1935_v59 }
 0x173   :  { %642 = vmatpush.msra.mxu1 %v3237_v48  ;;  %540 = vmatmul.f32.vlgmr.msrb.gmra.mxu0 %v2171_v16  ;;  %v3258_v48 = vld [vmem:[#allocation63_spill] sm:$0xff] }
 0x174   :  { %618 = vmatpush.msra.mxu0 %v1943_v61 }
 0x175   :  { %643 = vmatpush.msra.mxu1 %v3238_v47  ;;  %v3257_v47 = vld [vmem:[#allocation62_spill] sm:$0xff] }
 0x176   :  { %619 = vmatpush.msra.mxu0 %v1951_v2 }
 0x177   :  { %644 = vmatpush.msra.mxu1 %v3239_v46  ;;  %v3256_v46 = vld [vmem:[#allocation61_spill] sm:$0xff] }
 0x178   :  { %620 = vmatpush.msra.mxu0 %v1959_v9 }
 0x179   :  { %645 = vmatpush.msra.mxu1 %v3240_v45 }
 0x17a   :  { %621 = vmatpush.msra.mxu0 %v1967_v8 }
 0x17b   :  { %646 = vmatpush.msra.mxu1 %v3241_v44 }
 0x17c   :  { %622 = vmatpush.msra.mxu0 %v1975_v12 }
 0x17d   :  { %647 = vmatpush.msra.mxu1 %v3242_v43 }
 0x17e   :  { %623 = vmatpush.msra.mxu0 %v1983_v15 }
 0x17f   :  { %648 = vmatpush.msra.mxu1 %v3243_v41 }
 0x180   :  { %624 = vmatpush.msra.mxu0 %v1991_v17 }
 0x181   :  { %649 = vmatpush.msra.mxu1 %v3245_v49  ;;  %v3279_v49 = vld [vmem:[#allocation52_spill] sm:$0xff] }
 0x182   :  { %625 = vmatpush.msra.mxu0 %v1999_v18 }
 0x183   :  { %650 = vmatpush.msra.mxu1 %v3246_v51  ;;  %v3278_v51 = vld [vmem:[#allocation51_spill] sm:$0xff] }
 0x184   :  { %626 = vmatpush.msra.mxu0 %v2007_v22 }
 0x185   :  { %651 = vmatpush.msra.mxu1 %v3247_v0  ;;  %v3277_v0 = vld [vmem:[#allocation50_spill] sm:$0xff] }
 0x186   :  { %627 = vmatpush.msra.mxu0 %v2015_v24 }
 0x187   :  { %652 = vmatpush.msra.mxu1 %v3248_v52  ;;  %v118_v52 = vld [vmem:[#allocation4 + $0x38] sm:$0xff] }
 0x188   :  { %628 = vmatpush.msra.mxu0 %v2023_v26 }
 0x189   :  { %653 = vmatpush.msra.mxu1 %v3249_v53  ;;  %v3274_v53 = vld [vmem:[#allocation47_spill] sm:$0xff] }
 0x18a   :  { %629 = vmatpush.msra.mxu0 %v2031_v28 }
 0x18b   :  { %654 = vmatpush.msra.mxu1 %v3250_v56 }
 0x18c   :  { %712 = vmatpush.msrb.mxu0 %v1920_v13 }
 0x18d   :  { %655 = vmatpush.msra.mxu1 %v1821_v31  ;;  %v3266_v31 = vld [vmem:[#allocation40_spill] sm:$0xff] }
 0x18e   :  { %713 = vmatpush.msrb.mxu0 %v1924_v19 }
 0x18f   :  { %656 = vmatpush.msra.mxu1 %v1827_v33  ;;  %v3265_v33 = vld [vmem:[#allocation39_spill] sm:$0xff] }
 0x190   :  { %714 = vmatpush.msrb.mxu0 %v1929_v58 }
 0x191   :  { %657 = vmatpush.msra.mxu1 %v1833_v35  ;;  %v3264_v35 = vld [vmem:[#allocation38_spill] sm:$0xff] }
 0x192   :  { %715 = vmatpush.msrb.mxu0 %v1940_v60  ;;  %572 = vmatpush.msra.mxu2 %v3264_v35  ;;  %v3280_v60 = vld [vmem:[#allocation53_spill] sm:$0xff] }
 0x194   :  { %716 = vmatpush.msrb.mxu0 %v1948_v5  ;;  %573 = vmatpush.msra.mxu2 %v3265_v33 }
 0x196   :  { %717 = vmatpush.msrb.mxu0 %v1955_v57  ;;  %574 = vmatpush.msra.mxu2 %v3266_v31 }
 0x198   :  { %718 = vmatpush.msrb.mxu0 %v1963_v38  ;;  %v3276_v38 = vld [vmem:[#allocation49_spill] sm:$0xff] }
 0x19a   :  { %719 = vmatpush.msrb.mxu0 %v3255_v14  ;;  %v3275_v14 = vld [vmem:[#allocation48_spill] sm:$0xff] }
 0x19c   :  { %720 = vmatpush.msrb.mxu0 %v3256_v46  ;;  %v3273_v46 = vld [vmem:[#allocation46_spill] sm:$0xff] }
 0x19e   :  { %721 = vmatpush.msrb.mxu0 %v3257_v47  ;;  %v116_v47 = vld [vmem:[#allocation4 + $0x28] sm:$0xff] }
 0x19f   :  { %1331 = vmatmul.msk.f32.gmra.mxu2 %vm125_vm0, %v116_v47  ;;  %v2246_v47 = vld [vmem:[%s3012_s6 + $0x1] ss:$0 sm:$0xff] }
 0x1a0   :  { %722 = vmatpush.msrb.mxu0 %v3258_v48  ;;  %v173_v48 = vpop.f32.mrf.mxu0 }
 0x1a2   :  { %723 = vmatpush.msrb.mxu0 %v3259_v63  ;;  %v3267_v63 = vld [vmem:[#allocation41_spill] sm:$0xff] }
 0x1a3   :  { %575 = vmatpush.msra.mxu2 %v3267_v63 }
 0x1a4   :  { %724 = vmatpush.msrb.mxu0 %v3260_v1  ;;  %v3270_v1 = vld [vmem:[#allocation44_spill] sm:$0xff] }
 0x1a6   :  { %725 = vmatpush.msrb.mxu0 %v3261_v4  ;;  %v3268_v4 = vld [vmem:[#allocation42_spill] sm:$0xff] }
 0x1a7   :  { %576 = vmatpush.msra.mxu2 %v3268_v4 }
 0x1a8   :  { %726 = vmatpush.msrb.mxu0 %v3262_v42  ;;  %v3269_v42 = vld [vmem:[#allocation43_spill] sm:$0xff]  ;;  %v2237_v56 = vpop.f32.mrf.mxu0 }
 0x1a9   :  { %577 = vmatpush.msra.mxu2 %v3269_v42  ;;  %3272 = vst [vmem:[#allocation20_spill] sm:$0xff] %v2237_v56 }
 0x1aa   :  { %727 = vmatpush.msrb.mxu0 %v3263_v55  ;;  %v117_v55 = vld [vmem:[#allocation4 + $0x30] sm:$0xff] }
 0x1ab   :  { %578 = vmatpush.msra.mxu2 %v3270_v1 }
 0x1ac   :  { %1332 = vmatmul.msk.f32.gmra.mxu2 %vm125_vm0, %v117_v55 }
 0x1ad   :  { %579 = vmatpush.msra.mxu2 %v3271_v3 }
 0x1af   :  { %580 = vmatpush.msra.mxu2 %v3273_v46 }
 0x1b0   :  { %v397_v55 = vpop.f32.mrf.mxu0 }
 0x1b1   :  { %581 = vmatpush.msra.mxu2 %v3274_v53 }
 0x1b3   :  { %582 = vmatpush.msra.mxu2 %v3275_v14 }
 0x1b4   :  { %1333 = vmatmul.msk.f32.gmra.mxu2 %vm125_vm0, %v118_v52 }
 0x1b5   :  { %583 = vmatpush.msra.mxu2 %v3276_v38 }
 0x1b7   :  { %584 = vmatpush.msra.mxu2 %v3277_v0 }
 0x1b9   :  { %585 = vmatpush.msra.mxu2 %v3278_v51 }
 0x1bb   :  { %586 = vmatpush.msra.mxu2 %v3279_v49 }
 0x1bd   :  { %587 = vmatpush.msra.mxu2 %v3280_v60 }
 0x1cf   :  { %v377_v56 = vpop.f32.mrf.mxu1 }
 0x1d0   :  { %v378_v57 = vadd.f32 %v2246_v47, %v377_v56  ;;  %v3282_v56 = vld [vmem:[#allocation18_spill] sm:$0xff] }
 0x1d2   :  { %v398_v5 = vadd.f32 %v397_v55, %v378_v57 }
 0x1d4   :  { %1372 = vtanh.f32 %v398_v5 }
 0x1d7   :  { %v471_v5 = vpop.f32.mrf.mxu1 }
 0x1da   :  { %v2255_v41 = vpop.eup %1372 }
 0x1db   :  { %3281 = vst [vmem:[#allocation21_spill] sm:$0xff] %v2255_v41  ;;  %1338 = vmatmul.msk.f32.vlgmr.msrb.gmra.mxu3 %vm310_vm4, %v2255_v41 }
 0x1dc   :  { %690 = vmatpush.msrb.mxu3 %v3264_v35 }
 0x1de   :  { %691 = vmatpush.msrb.mxu3 %v3265_v33 }
 0x1e0   :  { %692 = vmatpush.msrb.mxu3 %v3266_v31 }
 0x1e2   :  { %693 = vmatpush.msrb.mxu3 %v3267_v63  ;;  %v174_v63 = vadd.f32 %v3253_v10, %v173_v48  ;;  %v2283_v48 = vpop.permute.xlu1 %548 }
 0x1e3   :  { %3283 = vst [vmem:[#allocation22_spill] sm:$0xff] %v2283_v48  ;;  %vm550_vm9 = vcmp.eq.s32.totalorder %v2283_v48, 1  ;;  %v2648_v48 = vld [vmem:[#allocation10 + $0xa0] sm:$0xff] }
 0x1e4   :  { %694 = vmatpush.msrb.mxu3 %v3268_v4 }
 0x1e6   :  { %695 = vmatpush.msrb.mxu3 %v3269_v42 }
 0x1e8   :  { %v451_v52 = vpop.f32.mrf.mxu0  ;;  %696 = vmatpush.msrb.mxu3 %v3270_v1 }
 0x1e9   :  { %v452_v57 = vadd.f32 %v3282_v56, %v451_v52  ;;  %v356_v52 = vsel %vm310_vm4, %v2134_v54, 0.0 }
 0x1ea   :  { %697 = vmatpush.msrb.mxu3 %v3271_v3 }
 0x1eb   :  { %v472_v55 = vadd.f32 %v471_v5, %v452_v57  ;;  %v3284_v5 = vld [vmem:[#allocation24_spill] sm:$0xff] }
 0x1ec   :  { %698 = vmatpush.msrb.mxu3 %v3273_v46 }
 0x1ed   :  { %1374 = vtanh.f32 %v472_v55  ;;  %v3303_v55 = vld [vmem:[#allocation63_spill] sm:$0xff] }
 0x1ee   :  { %699 = vmatpush.msrb.mxu3 %v3274_v53 }
 0x1f0   :  { %v541_v31 = vpop.f32.mrf.mxu0  ;;  %700 = vmatpush.msrb.mxu3 %v3275_v14 }
 0x1f1   :  { %v544_v42 = vadd.f32 %v541_v31, %v174_v63  ;;  %v3285_v63 = vld [vmem:[#allocation26_spill] sm:$0xff] }
 0x1f2   :  { %701 = vmatpush.msrb.mxu3 %v3276_v38 }
 0x1f3   :  { %v1375_v1 = vpop.eup %1374  ;;  %1376 = vtanh.f32 %v544_v42  ;;  %v3302_v42 = vld [vmem:[#allocation35_spill] sm:$0xff] }
 0x1f4   :  { %v2279_v57 = vsel %vm432_vm8, %v1375_v1, %v356_v52  ;;  %702 = vmatpush.msrb.mxu3 %v3277_v0  ;;  %v3286_v1 = vld [vmem:[#allocation28_spill] sm:$0xff] }
 0x1f5   :  { %492 = vmatmul.f32.vlgmr.msrb.gmra.mxu2 %v2279_v57  ;;  %v3304_v52 = vld [vmem:[#allocation36_spill] sm:$0xff] }
 0x1f6   :  { %670 = vmatpush.msrb.mxu2 %v3284_v5  ;;  %703 = vmatpush.msrb.mxu3 %v3278_v51  ;;  %v3305_v5 = vld [vmem:[#allocation64_spill] sm:$0xff] }
 0x1f8   :  { %671 = vmatpush.msrb.mxu2 %v1765_v11  ;;  %704 = vmatpush.msrb.mxu3 %v3279_v49  ;;  %v2326_v11 = vld [vmem:[#allocation9 + $0x78] sm:$0xff] }
 0x1f9   :  { %v1377_v31 = vpop.eup %1376  ;;  %3287 = vst [vmem:[#allocation25_spill] sm:$0xff] %v2326_v11 }
 0x1fa   :  { %v2293_v54 = vsel %vm550_vm9, %v1377_v31, %v2171_v16  ;;  %672 = vmatpush.msrb.mxu2 %v3285_v63  ;;  %705 = vmatpush.msrb.mxu3 %v3280_v60  ;;  %v3301_v16 = vld [vmem:[#allocation62_spill] sm:$0xff]  ;;  %v3306_v31 = vld [vmem:[#allocation37_spill] sm:$0xff] }
 0x1fb   :  { %568 = vmatmul.f32.vlgmr.msrb.gmra.mxu1 %v2293_v54  ;;  %v3307_v63 = vld [vmem:[#allocation65_spill] sm:$0xff] }
 0x1fc   :  { %673 = vmatpush.msrb.mxu2 %v3286_v1  ;;  %732 = vmatpush.msrb.mxu1 %v1914_v6  ;;  %v3308_v1 = vld [vmem:[#allocation66_spill] sm:$0xff] }
 0x1fd   :  { %588 = vmatmul.f32.vlgmr.msra.gmra.mxu2 %v2279_v57 }
 0x1fe   :  { %674 = vmatpush.msrb.mxu2 %v1789_v20  ;;  %733 = vmatpush.msrb.mxu1 %v1918_v7  ;;  %v2330_v20 = vld [vmem:[#allocation9 + $0x70] sm:$0xff] }
 0x200   :  { %675 = vmatpush.msrb.mxu2 %v1793_v21  ;;  %734 = vmatpush.msrb.mxu1 %v1927_v29  ;;  %v2334_v21 = vld [vmem:[#allocation9 + $0x68] sm:$0xff] }
 0x202   :  { %676 = vmatpush.msrb.mxu2 %v1799_v23  ;;  %735 = vmatpush.msrb.mxu1 %v1935_v59  ;;  %v3288_v23 = vld [vmem:[#allocation27_spill] sm:$0xff] }
 0x203   :  { %658 = vmatmul.f32.vlgmr.msra.gmra.mxu1 %v2293_v54 }
 0x204   :  { %677 = vmatpush.msrb.mxu2 %v1806_v25  ;;  %736 = vmatpush.msrb.mxu1 %v1943_v61  ;;  %v3289_v25 = vld [vmem:[#allocation56_spill] sm:$0xff] }
 0x206   :  { %678 = vmatpush.msrb.mxu2 %v1812_v27  ;;  %737 = vmatpush.msrb.mxu1 %v1951_v2  ;;  %v3290_v27 = vld [vmem:[#allocation29_spill] sm:$0xff] }
 0x208   :  { %679 = vmatpush.msrb.mxu2 %v1819_v30  ;;  %738 = vmatpush.msrb.mxu1 %v1959_v9  ;;  %v3291_v30 = vld [vmem:[#allocation57_spill] sm:$0xff] }
 0x20a   :  { %680 = vmatpush.msrb.mxu2 %v1825_v32  ;;  %739 = vmatpush.msrb.mxu1 %v1967_v8  ;;  %v3292_v32 = vld [vmem:[#allocation30_spill] sm:$0xff] }
 0x20c   :  { %681 = vmatpush.msrb.mxu2 %v1831_v34  ;;  %740 = vmatpush.msrb.mxu1 %v1975_v12  ;;  %v3293_v34 = vld [vmem:[#allocation58_spill] sm:$0xff] }
 0x20e   :  { %682 = vmatpush.msrb.mxu2 %v1837_v36  ;;  %741 = vmatpush.msrb.mxu1 %v1983_v15  ;;  %v3294_v36 = vld [vmem:[#allocation31_spill] sm:$0xff] }
 0x210   :  { %683 = vmatpush.msrb.mxu2 %v1841_v37  ;;  %742 = vmatpush.msrb.mxu1 %v1991_v17  ;;  %v3295_v37 = vld [vmem:[#allocation59_spill] sm:$0xff] }
 0x212   :  { %684 = vmatpush.msrb.mxu2 %v1845_v39  ;;  %743 = vmatpush.msrb.mxu1 %v1999_v18  ;;  %v3296_v39 = vld [vmem:[#allocation32_spill] sm:$0xff] }
 0x214   :  { %685 = vmatpush.msrb.mxu2 %v1848_v40  ;;  %744 = vmatpush.msrb.mxu1 %v2007_v22  ;;  %v3297_v40 = vld [vmem:[#allocation60_spill] sm:$0xff] }
 0x216   :  { %760 = vmatpush.msra.mxu2 %v2326_v11  ;;  %745 = vmatpush.msrb.mxu1 %v2015_v24 }
 0x218   :  { %761 = vmatpush.msra.mxu2 %v2330_v20  ;;  %746 = vmatpush.msrb.mxu1 %v2023_v26 }
 0x21a   :  { %762 = vmatpush.msra.mxu2 %v2334_v21  ;;  %747 = vmatpush.msrb.mxu1 %v2031_v28 }
 0x21c   :  { %763 = vmatpush.msra.mxu2 %v3240_v45  ;;  %830 = vmatpush.msra.mxu1 %v1920_v13  ;;  %v3300_v45 = vld [vmem:[#allocation34_spill] sm:$0xff] }
 0x21e   :  { %764 = vmatpush.msra.mxu2 %v3241_v44  ;;  %831 = vmatpush.msra.mxu1 %v1924_v19  ;;  %v3299_v44 = vld [vmem:[#allocation61_spill] sm:$0xff] }
 0x220   :  { %765 = vmatpush.msra.mxu2 %v3242_v43  ;;  %832 = vmatpush.msra.mxu1 %v1929_v58  ;;  %v3298_v43 = vld [vmem:[#allocation33_spill] sm:$0xff] }
 0x222   :  { %766 = vmatpush.msra.mxu2 %v3288_v23  ;;  %833 = vmatpush.msra.mxu1 %v3289_v25  ;;  %v3309_v23 = vld [vmem:[#allocation67_spill] sm:$0xff] }
 0x224   :  { %767 = vmatpush.msra.mxu2 %v3290_v27  ;;  %834 = vmatpush.msra.mxu1 %v3291_v30  ;;  %v3310_v27 = vld [vmem:[#allocation68_spill] sm:$0xff] }
 0x226   :  { %768 = vmatpush.msra.mxu2 %v3292_v32  ;;  %835 = vmatpush.msra.mxu1 %v3293_v34  ;;  %v2367_v32 = vpop.f32.mrf.mxu2 }
 0x227   :  { %3311 = vst [vmem:[#allocation23_spill] sm:$0xff] %v2367_v32 }
 0x228   :  { %769 = vmatpush.msra.mxu2 %v3294_v36  ;;  %836 = vmatpush.msra.mxu1 %v3295_v37 }
 0x22a   :  { %770 = vmatpush.msra.mxu2 %v3296_v39  ;;  %837 = vmatpush.msra.mxu1 %v3297_v40 }
 0x22c   :  { %771 = vmatpush.msra.mxu2 %v3298_v43  ;;  %838 = vmatpush.msra.mxu1 %v3299_v44 }
 0x22e   :  { %772 = vmatpush.msra.mxu2 %v3300_v45  ;;  %839 = vmatpush.msra.mxu1 %v3301_v16  ;;  %v2369_v36 = vpop.f32.mrf.mxu2  ;;  %v1417_v45 = vld [vmem:[%s3006_s0] sm:$0xff] }
 0x22f   :  { %3312 = vst [vmem:[#allocation54_spill] sm:$0xff] %v2369_v36  ;;  %vm757_vm10 = vcmp.gt.s32.totalorder %v1417_v45, 4  ;;  %vm875_vm11 = vcmp.gt.s32.totalorder %v1417_v45, 5 }
 0x230   :  { %773 = vmatpush.msra.mxu2 %v3302_v42  ;;  %840 = vmatpush.msra.mxu1 %v3303_v55  ;;  %v3315_v42 = vmov 0  }
 0x231   :  { %v900_v36 = vsel %vm875_vm11, 1, %v3315_v42 }
 0x232   :  { %774 = vmatpush.msra.mxu2 %v3304_v52  ;;  %841 = vmatpush.msra.mxu1 %v3305_v5  ;;  %v782_v52 = vsel %vm757_vm10, 1, %v3315_v42 }
 0x233   :  { %784 = vperm.xlu2 %1361, %v782_v52  }
 0x234   :  { %775 = vmatpush.msra.mxu2 %v3306_v31  ;;  %842 = vmatpush.msra.mxu1 %v3307_v63 }
 0x236   :  { %843 = vmatpush.msra.mxu1 %v3308_v1  ;;  %v2371_v39 = vpop.f32.mrf.mxu2 }
 0x237   :  { %3313 = vst [vmem:[#allocation38_spill] sm:$0xff] %v2371_v39 }
 0x238   :  { %844 = vmatpush.msra.mxu1 %v3309_v23 }
 0x23a   :  { %845 = vmatpush.msra.mxu1 %v3310_v27 }
 0x23b   :  { %902 = vperm.xlu2 %1361, %v900_v36   ;;  %v2428_v36 = vld [vmem:[#allocation10 + $0x60] sm:$0xff] }
 0x23e   :  { %v2373_v43 = vpop.f32.mrf.mxu2 }
 0x23f   :  { %3314 = vst [vmem:[#allocation39_spill] sm:$0xff] %v2373_v43  ;;  %v3316_v43 = vld [vmem:[#allocation20_spill] sm:$0xff] }
 0x240   :  { %v177_v39 = vadd.f32 %v3253_v10, %v3316_v43 }
 0x25e   :  { %v513_v32 = vpop.f32.mrf.mxu3 }
 0x278   :  { %v493_v31 = vpop.f32.mrf.mxu2  ;;  %v569_v23 = vpop.f32.mrf.mxu1 }
 0x279   :  { %v494_v27 = vadd.f32 %v2246_v47, %v493_v31  ;;  %v570_v63 = vadd.f32 %v3282_v56, %v569_v23  ;;  %v3320_v23 = vld [vmem:[#allocation41_spill] sm:$0xff] }
 0x27b   :  { %v514_v1 = vadd.f32 %v513_v32, %v494_v27  ;;  %v401_v27 = vsel %vm310_vm4, %v2255_v41, 0.0  ;;  %v3321_v32 = vld [vmem:[#allocation43_spill] sm:$0xff]  ;;  %v2665_v41 = vld [vmem:[#allocation10 + $0x1b0] sm:$0xff] }
 0x27c   :  { %3345 = vst [vmem:[#allocation56_spill] sm:$0xff] %v2665_v41 }
 0x27d   :  { %1378 = vtanh.f32 %v514_v1 }
 0x280   :  { %v589_v5 = vpop.f32.mrf.mxu2  ;;  %v659_v55 = vpop.f32.mrf.mxu1 }
 0x281   :  { %v590_v16 = vadd.f32 %v589_v5, %v570_v63  ;;  %v662_v52 = vadd.f32 %v659_v55, %v177_v39  ;;  %v2397_v55 = vpop.permute.xlu1 %666  ;;  %v3319_v63 = vld [vmem:[#allocation40_spill] sm:$0xff]  ;;  %v2449_v39 = vld [vmem:[#allocation10 + $0x40] sm:$0xff] }
 0x282   :  { %3318 = vst [vmem:[#allocation45_spill] sm:$0xff] %v2397_v55  ;;  %vm668_vm12 = vcmp.eq.s32.totalorder %v2397_v55, 1  ;;  %v3377_v55 = vld [vmem:[#allocation25_spill] sm:$0xff] }
 0x283   :  { %v2384_v44 = vpop.eup %1378  ;;  %1380 = vtanh.f32 %v590_v16 }
 0x284   :  { %3317 = vst [vmem:[#allocation42_spill] sm:$0xff] %v2384_v44  ;;  %1382 = vtanh.f32 %v662_v52  ;;  %v2392_v1 = vsel %vm432_vm8, %v2384_v44, %v401_v27  ;;  %v2555_v27 = vld [vmem:[%s3011_s5] ss:$0 sm:$0xff]  ;;  %v2658_v44 = vld [vmem:[#allocation10 + $0x1b8] sm:$0xff] }
 0x285   :  { %630 = vmatmul.f32.vlgmr.msra.gmra.mxu0 %v2392_v1  ;;  %3344 = vst [vmem:[#allocation27_spill] sm:$0xff] %v2658_v44 }
 0x286   :  { %808 = vmatpush.msra.mxu0 %v3264_v35 }
 0x288   :  { %809 = vmatpush.msra.mxu0 %v3265_v33  ;;  %v2413_v33 = vld [vmem:[#allocation10 + $0x78] sm:$0xff] }
 0x289   :  { %v1381_v10 = vpop.eup %1380 }
 0x28a   :  { %v1383_v16 = vpop.eup %1382  ;;  %v2403_v5 = vsel %vm550_vm9, %v1381_v10, %v2279_v57  ;;  %810 = vmatpush.msra.mxu0 %v3319_v63  ;;  %v2418_v57 = vld [vmem:[#allocation10 + $0x70] sm:$0xff]  ;;  %v3340_v10 = vld [vmem:[#allocation23_spill] sm:$0xff] }
 0x28b   :  { %610 = vmatmul.f32.vlgmr.msra.gmra.mxu3 %v2403_v5  ;;  %v2410_v35 = vsel %vm668_vm12, %v1383_v16, %v2293_v54  ;;  %v2423_v54 = vld [vmem:[#allocation10 + $0x68] sm:$0xff]  ;;  %v180_v16 = vadd.f32 %v2555_v27, %v3340_v10  ;;  %v2620_v10 = vld [vmem:[#allocation10 + $0xc0] sm:$0xff] }
 0x28c   :  { %686 = vmatmul.f32.vlgmr.msrb.gmra.mxu2 %v2410_v35  ;;  %788 = vmatpush.msra.mxu3 %v2413_v33 }
 0x28d   :  { %811 = vmatpush.msra.mxu0 %v3320_v23  ;;  %850 = vmatpush.msrb.mxu2 %v1914_v6  ;;  %v3322_v6 = vld [vmem:[#allocation44_spill] sm:$0xff] }
 0x28e   :  { %789 = vmatpush.msra.mxu3 %v2418_v57 }
 0x28f   :  { %812 = vmatpush.msra.mxu0 %v3268_v4  ;;  %851 = vmatpush.msrb.mxu2 %v1918_v7  ;;  %v2434_v4 = vld [vmem:[#allocation10 + $0x58] sm:$0xff]  ;;  %v2439_v7 = vld [vmem:[#allocation10 + $0x50] sm:$0xff] }
 0x290   :  { %790 = vmatpush.msra.mxu3 %v2423_v54 }
 0x291   :  { %813 = vmatpush.msra.mxu0 %v3321_v32  ;;  %852 = vmatpush.msrb.mxu2 %v1927_v29  ;;  %v2444_v29 = vld [vmem:[#allocation10 + $0x48] sm:$0xff] }
 0x292   :  { %791 = vmatpush.msra.mxu3 %v2428_v36 }
 0x293   :  { %706 = vmatmul.f32.vlgmr.msrb.gmra.mxu3 %v2403_v5  ;;  %814 = vmatpush.msra.mxu0 %v3322_v6 }
 0x294   :  { %776 = vmatmul.f32.vlgmr.msra.gmra.mxu2 %v2410_v35  ;;  %792 = vmatpush.msra.mxu3 %v2434_v4 }
 0x295   :  { %815 = vmatpush.msra.mxu0 %v3271_v3  ;;  %853 = vmatpush.msrb.mxu2 %v1935_v59  ;;  %v2454_v59 = vld [vmem:[#allocation10 + $0x38] sm:$0xff]  ;;  %v2541_v3 = vld [vmem:[#allocation9 + $0x8] sm:$0xff] }
 0x296   :  { %793 = vmatpush.msra.mxu3 %v2439_v7  ;;  %3335 = vst [vmem:[#allocation53_spill] sm:$0xff] %v2541_v3 }
 0x297   :  { %816 = vmatpush.msra.mxu0 %v3273_v46  ;;  %854 = vmatpush.msrb.mxu2 %v1943_v61  ;;  %v2459_v61 = vld [vmem:[#allocation10 + $0x30] sm:$0xff]  ;;  %v3334_v46 = vld [vmem:[#allocation65_spill] sm:$0xff] }
 0x298   :  { %794 = vmatpush.msra.mxu3 %v2444_v29 }
 0x299   :  { %817 = vmatpush.msra.mxu0 %v3274_v53  ;;  %855 = vmatpush.msrb.mxu2 %v1951_v2  ;;  %v2464_v2 = vld [vmem:[#allocation10 + $0x28] sm:$0xff]  ;;  %v3326_v53 = vld [vmem:[#allocation61_spill] sm:$0xff] }
 0x29a   :  { %795 = vmatpush.msra.mxu3 %v2449_v39  ;;  %3323 = vst [vmem:[#allocation46_spill] sm:$0xff] %v2464_v2 }
 0x29b   :  { %818 = vmatpush.msra.mxu0 %v3275_v14  ;;  %856 = vmatpush.msrb.mxu2 %v1959_v9  ;;  %v2469_v9 = vld [vmem:[#allocation10 + $0x20] sm:$0xff]  ;;  %v2537_v14 = vld [vmem:[#allocation9 + $0x10] sm:$0xff] }
 0x29c   :  { %796 = vmatpush.msra.mxu3 %v2454_v59  ;;  %3324 = vst [vmem:[#allocation47_spill] sm:$0xff] %v2469_v9 }
 0x29d   :  { %819 = vmatpush.msra.mxu0 %v3276_v38  ;;  %857 = vmatpush.msrb.mxu2 %v1967_v8  ;;  %v2474_v8 = vld [vmem:[#allocation10 + $0x18] sm:$0xff]  ;;  %v2521_v38 = vld [vmem:[#allocation9 + $0x30] sm:$0xff]  ;;  %3333 = vst [vmem:[#allocation52_spill] sm:$0xff] %v2537_v14 }
 0x29e   :  { %797 = vmatpush.msra.mxu3 %v2459_v61  ;;  %3325 = vst [vmem:[#allocation48_spill] sm:$0xff] %v2521_v38 }
 0x29f   :  { %820 = vmatpush.msra.mxu0 %v3277_v0  ;;  %858 = vmatpush.msrb.mxu2 %v1975_v12  ;;  %v2479_v0 = vld [vmem:[#allocation10 + $0x10] sm:$0xff]  ;;  %v2483_v12 = vld [vmem:[#allocation10 + $0x8] sm:$0xff] }
 0x2a0   :  { %798 = vmatpush.msra.mxu3 %v2464_v2 }
 0x2a1   :  { %821 = vmatpush.msra.mxu0 %v3278_v51  ;;  %859 = vmatpush.msrb.mxu2 %v1983_v15  ;;  %v2487_v15 = vld [vmem:[#allocation10] sm:$0xff]  ;;  %v3332_v51 = vld [vmem:[#allocation64_spill] sm:$0xff] }
 0x2a2   :  { %799 = vmatpush.msra.mxu3 %v2469_v9 }
 0x2a3   :  { %822 = vmatpush.msra.mxu0 %v3279_v49  ;;  %860 = vmatpush.msrb.mxu2 %v1991_v17  ;;  %v2497_v17 = vld [vmem:[#allocation9 + $0x60] sm:$0xff]  ;;  %v2533_v49 = vld [vmem:[#allocation9 + $0x18] sm:$0xff] }
 0x2a4   :  { %800 = vmatpush.msra.mxu3 %v2474_v8  ;;  %3331 = vst [vmem:[#allocation51_spill] sm:$0xff] %v2533_v49 }
 0x2a5   :  { %823 = vmatpush.msra.mxu0 %v3280_v60  ;;  %861 = vmatpush.msrb.mxu2 %v1999_v18  ;;  %v2501_v18 = vld [vmem:[#allocation9 + $0x58] sm:$0xff]  ;;  %v3330_v60 = vld [vmem:[#allocation63_spill] sm:$0xff] }
 0x2a6   :  { %801 = vmatpush.msra.mxu3 %v2479_v0 }
 0x2a7   :  { %862 = vmatpush.msrb.mxu2 %v2007_v22  ;;  %v2505_v22 = vld [vmem:[#allocation9 + $0x50] sm:$0xff] }
 0x2a8   :  { %802 = vmatpush.msra.mxu3 %v2483_v12 }
 0x2a9   :  { %863 = vmatpush.msrb.mxu2 %v2015_v24  ;;  %v2509_v24 = vld [vmem:[#allocation9 + $0x48] sm:$0xff] }
 0x2aa   :  { %803 = vmatpush.msra.mxu3 %v2487_v15 }
 0x2ab   :  { %864 = vmatpush.msrb.mxu2 %v2023_v26  ;;  %v2513_v26 = vld [vmem:[#allocation9 + $0x40] sm:$0xff] }
 0x2ac   :  { %878 = vmatpush.msrb.mxu3 %v2326_v11 }
 0x2ad   :  { %865 = vmatpush.msrb.mxu2 %v2031_v28  ;;  %v2517_v28 = vld [vmem:[#allocation9 + $0x38] sm:$0xff] }
 0x2ae   :  { %879 = vmatpush.msrb.mxu3 %v2330_v20 }
 0x2af   :  { %948 = vmatpush.msra.mxu2 %v1920_v13  ;;  %v2525_v13 = vld [vmem:[#allocation9 + $0x28] sm:$0xff] }
 0x2b0   :  { %880 = vmatpush.msrb.mxu3 %v2334_v21  ;;  %3327 = vst [vmem:[#allocation49_spill] sm:$0xff] %v2525_v13 }
 0x2b1   :  { %949 = vmatpush.msra.mxu2 %v1924_v19  ;;  %v3328_v19 = vld [vmem:[#allocation62_spill] sm:$0xff] }
 0x2b2   :  { %881 = vmatpush.msrb.mxu3 %v2497_v17 }
 0x2b3   :  { %950 = vmatpush.msra.mxu2 %v1929_v58  ;;  %v2529_v58 = vld [vmem:[#allocation9 + $0x20] sm:$0xff] }
 0x2b4   :  { %882 = vmatpush.msrb.mxu3 %v2501_v18  ;;  %3329 = vst [vmem:[#allocation50_spill] sm:$0xff] %v2529_v58 }
 0x2b5   :  { %951 = vmatpush.msra.mxu2 %v3289_v25  ;;  %v3336_v25 = vld [vmem:[#allocation66_spill] sm:$0xff] }
 0x2b6   :  { %883 = vmatpush.msrb.mxu3 %v2505_v22 }
 0x2b7   :  { %952 = vmatpush.msra.mxu2 %v3291_v30  ;;  %v2545_v30 = vld [vmem:[#allocation9] sm:$0xff] }
 0x2b8   :  { %884 = vmatpush.msrb.mxu3 %v2509_v24  ;;  %3337 = vst [vmem:[#allocation18_spill] sm:$0xff] %v2545_v30 }
 0x2b9   :  { %953 = vmatpush.msra.mxu2 %v3293_v34  ;;  %v3338_v34 = vld [vmem:[#allocation67_spill] sm:$0xff] }
 0x2ba   :  { %885 = vmatpush.msrb.mxu3 %v2513_v26 }
 0x2bb   :  { %954 = vmatpush.msra.mxu2 %v3295_v37  ;;  %v3339_v37 = vld [vmem:[#allocation68_spill] sm:$0xff] }
 0x2bc   :  { %886 = vmatpush.msrb.mxu3 %v2517_v28 }
 0x2bd   :  { %955 = vmatpush.msra.mxu2 %v3297_v40 }
 0x2be   :  { %887 = vmatpush.msrb.mxu3 %v2521_v38 }
 0x2bf   :  { %956 = vmatpush.msra.mxu2 %v3326_v53 }
 0x2c0   :  { %888 = vmatpush.msrb.mxu3 %v2525_v13 }
 0x2c1   :  { %957 = vmatpush.msra.mxu2 %v3328_v19 }
 0x2c2   :  { %889 = vmatpush.msrb.mxu3 %v2529_v58 }
 0x2c3   :  { %958 = vmatpush.msra.mxu2 %v3330_v60  ;;  %v2568_v60 = vld [vmem:[#allocation10 + $0xf8] sm:$0xff] }
 0x2c4   :  { %890 = vmatpush.msrb.mxu3 %v2533_v49 }
 0x2c5   :  { %959 = vmatpush.msra.mxu2 %v3332_v51  ;;  %v2571_v51 = vpop.permute.xlu2 %784 }
 0x2c6   :  { %891 = vmatpush.msrb.mxu3 %v2537_v14  ;;  %vm786_vm13 = vcmp.eq.s32.totalorder %v2571_v51, 1 }
 0x2c7   :  { %960 = vmatpush.msra.mxu2 %v3334_v46  ;;  %v2574_v46 = vld [vmem:[#allocation10 + $0xf0] sm:$0xff] }
 0x2c8   :  { %892 = vmatpush.msrb.mxu3 %v2541_v3 }
 0x2c9   :  { %961 = vmatpush.msra.mxu2 %v3336_v25 }
 0x2ca   :  { %893 = vmatpush.msrb.mxu3 %v2545_v30 }
 0x2cb   :  { %962 = vmatpush.msra.mxu2 %v3338_v34 }
 0x2cd   :  { %963 = vmatpush.msra.mxu2 %v3339_v37  ;;  %v2582_v37 = vld [vmem:[#allocation10 + $0xe8] sm:$0xff] }
 0x302   :  { %v631_v42 = vpop.f32.mrf.mxu0 }
 0x30e   :  { %v611_v40 = vpop.f32.mrf.mxu3 }
 0x30f   :  { %v612_v43 = vadd.f32 %v2246_v47, %v611_v40  ;;  %v687_v45 = vpop.f32.mrf.mxu2 }
 0x310   :  { %v688_v52 = vadd.f32 %v3282_v56, %v687_v45  ;;  %v2600_v45 = vld [vmem:[#allocation10 + $0xd8] sm:$0xff] }
 0x311   :  { %v632_v31 = vadd.f32 %v631_v42, %v612_v43  ;;  %v2593_v43 = vld [vmem:[#allocation10 + $0xe0] sm:$0xff]  ;;  %v2607_v42 = vld [vmem:[#allocation10 + $0xd0] sm:$0xff] }
 0x313   :  { %1384 = vtanh.f32 %v632_v31  ;;  %v2610_v31 = vld [vmem:[#allocation10 + $0x1e8] sm:$0xff] }
 0x316   :  { %v707_v63 = vpop.f32.mrf.mxu3 }
 0x317   :  { %v708_v23 = vadd.f32 %v707_v63, %v688_v52  ;;  %v777_v32 = vpop.f32.mrf.mxu2  ;;  %v2615_v52 = vld [vmem:[#allocation10 + $0xc8] sm:$0xff]  ;;  %v2627_v63 = vld [vmem:[#allocation10 + $0xb8] sm:$0xff] }
 0x318   :  { %v780_v6 = vadd.f32 %v777_v32, %v180_v16  ;;  %v2623_v16 = vld [vmem:[#allocation10 + $0x1e0] sm:$0xff]  ;;  %v2634_v32 = vld [vmem:[#allocation10 + $0xb0] sm:$0xff] }
 0x319   :  { %v2559_v53 = vpop.eup %1384  ;;  %1386 = vtanh.f32 %v708_v23  ;;  %v2630_v23 = vld [vmem:[#allocation10 + $0x1d8] sm:$0xff] }
 0x31a   :  { %3341 = vst [vmem:[#allocation24_spill] sm:$0xff] %v2559_v53  ;;  %1388 = vtanh.f32 %v780_v6  ;;  %v2565_v19 = vsel %vm550_vm9, %v2559_v53, %v2392_v1  ;;  %v2637_v6 = vld [vmem:[#allocation10 + $0x1d0] sm:$0xff]  ;;  %v2651_v53 = vld [vmem:[#allocation10 + $0x1c0] sm:$0xff] }
 0x31b   :  { %748 = vmatmul.f32.vlgmr.msrb.gmra.mxu1 %v2565_v19  ;;  %3343 = vst [vmem:[#allocation28_spill] sm:$0xff] %v2651_v53 }
 0x31c   :  { %926 = vmatpush.msrb.mxu1 %v2568_v60 }
 0x31e   :  { %927 = vmatpush.msrb.mxu1 %v2574_v46 }
 0x31f   :  { %v1387_v25 = vpop.eup %1386 }
 0x320   :  { %v1389_v34 = vpop.eup %1388  ;;  %v2580_v1 = vsel %vm668_vm12, %v1387_v25, %v2403_v5  ;;  %928 = vmatpush.msrb.mxu1 %v2582_v37  ;;  %v2596_v5 = vld [vmem:[#allocation10 + $0x1f8] sm:$0xff]  ;;  %v2641_v25 = vld [vmem:[#allocation10 + $0xa8] sm:$0xff] }
 0x321   :  { %728 = vmatmul.f32.vlgmr.msrb.gmra.mxu0 %v2580_v1  ;;  %v2589_v40 = vsel %vm786_vm13, %v1389_v34, %v2410_v35  ;;  %v2603_v35 = vld [vmem:[#allocation10 + $0x1f0] sm:$0xff]  ;;  %v2644_v34 = vld [vmem:[#allocation10 + $0x1c8] sm:$0xff] }
 0x322   :  { %804 = vmatmul.f32.vlgmr.msra.gmra.mxu3 %v2589_v40  ;;  %906 = vmatpush.msrb.mxu0 %v2413_v33  ;;  %3342 = vst [vmem:[#allocation26_spill] sm:$0xff] %v2644_v34 }
 0x323   :  { %929 = vmatpush.msrb.mxu1 %v2593_v43  ;;  %968 = vmatpush.msra.mxu3 %v2596_v5 }
 0x324   :  { %907 = vmatpush.msrb.mxu0 %v2418_v57 }
 0x325   :  { %930 = vmatpush.msrb.mxu1 %v2600_v45  ;;  %969 = vmatpush.msra.mxu3 %v2603_v35 }
 0x326   :  { %908 = vmatpush.msrb.mxu0 %v2423_v54 }
 0x327   :  { %931 = vmatpush.msrb.mxu1 %v2607_v42  ;;  %970 = vmatpush.msra.mxu3 %v2610_v31 }
 0x328   :  { %909 = vmatpush.msrb.mxu0 %v2428_v36 }
 0x329   :  { %824 = vmatmul.f32.vlgmr.msra.gmra.mxu0 %v2580_v1  ;;  %932 = vmatpush.msrb.mxu1 %v2615_v52 }
 0x32a   :  { %894 = vmatmul.f32.vlgmr.msrb.gmra.mxu3 %v2589_v40  ;;  %910 = vmatpush.msrb.mxu0 %v2434_v4 }
 0x32b   :  { %933 = vmatpush.msrb.mxu1 %v2620_v10  ;;  %971 = vmatpush.msra.mxu3 %v2623_v16 }
 0x32c   :  { %911 = vmatpush.msrb.mxu0 %v2439_v7 }
 0x32d   :  { %934 = vmatpush.msrb.mxu1 %v2627_v63  ;;  %972 = vmatpush.msra.mxu3 %v2630_v23 }
 0x32e   :  { %912 = vmatpush.msrb.mxu0 %v2444_v29 }
 0x32f   :  { %935 = vmatpush.msrb.mxu1 %v2634_v32  ;;  %973 = vmatpush.msra.mxu3 %v2637_v6 }
 0x330   :  { %913 = vmatpush.msrb.mxu0 %v2449_v39 }
 0x331   :  { %936 = vmatpush.msrb.mxu1 %v2641_v25  ;;  %974 = vmatpush.msra.mxu3 %v2644_v34  ;;  %v2672_v34 = vld [vmem:[#allocation10 + $0x1a8] sm:$0xff] }
 0x332   :  { %914 = vmatpush.msrb.mxu0 %v2454_v59  ;;  %3346 = vst [vmem:[#allocation29_spill] sm:$0xff] %v2672_v34 }
 0x333   :  { %937 = vmatpush.msrb.mxu1 %v2648_v48  ;;  %975 = vmatpush.msra.mxu3 %v2651_v53  ;;  %v2669_v53 = vld [vmem:[#allocation10 + $0x88] sm:$0xff] }
 0x334   :  { %915 = vmatpush.msrb.mxu0 %v2459_v61 }
 0x335   :  { %938 = vmatpush.msrb.mxu1 %v2655_v50  ;;  %976 = vmatpush.msra.mxu3 %v2658_v44  ;;  %v2676_v44 = vld [vmem:[#allocation10 + $0x80] sm:$0xff] }
 0x336   :  { %916 = vmatpush.msrb.mxu0 %v2464_v2  ;;  %v2679_v2 = vld [vmem:[#allocation10 + $0x1a0] sm:$0xff] }
 0x337   :  { %939 = vmatpush.msrb.mxu1 %v2662_v62  ;;  %977 = vmatpush.msra.mxu3 %v2665_v41  ;;  %3347 = vst [vmem:[#allocation57_spill] sm:$0xff] %v2679_v2  ;;  %v2683_v41 = vld [vmem:[#allocation10 + $0x198] sm:$0xff] }
 0x338   :  { %917 = vmatpush.msrb.mxu0 %v2469_v9  ;;  %3348 = vst [vmem:[#allocation30_spill] sm:$0xff] %v2683_v41  ;;  %v2687_v9 = vld [vmem:[#allocation10 + $0x190] sm:$0xff] }
 0x339   :  { %940 = vmatpush.msrb.mxu1 %v2669_v53  ;;  %978 = vmatpush.msra.mxu3 %v2672_v34  ;;  %3349 = vst [vmem:[#allocation58_spill] sm:$0xff] %v2687_v9  ;;  %v2692_v34 = vld [vmem:[#allocation10 + $0x188] sm:$0xff] }
 0x33a   :  { %918 = vmatpush.msrb.mxu0 %v2474_v8  ;;  %3350 = vst [vmem:[#allocation31_spill] sm:$0xff] %v2692_v34 }
 0x33b   :  { %941 = vmatpush.msrb.mxu1 %v2676_v44  ;;  %979 = vmatpush.msra.mxu3 %v2679_v2  ;;  %v2696_v2 = vld [vmem:[#allocation10 + $0x180] sm:$0xff] }
 0x33c   :  { %919 = vmatpush.msrb.mxu0 %v2479_v0 }
 0x33d   :  { %980 = vmatpush.msra.mxu3 %v2683_v41  ;;  %v2699_v41 = vld [vmem:[#allocation10 + $0x178] sm:$0xff] }
 0x33e   :  { %920 = vmatpush.msrb.mxu0 %v2483_v12  ;;  %3351 = vst [vmem:[#allocation59_spill] sm:$0xff] %v2699_v41 }
 0x33f   :  { %981 = vmatpush.msra.mxu3 %v2687_v9  ;;  %v2703_v9 = vld [vmem:[#allocation10 + $0x170] sm:$0xff] }
 0x340   :  { %921 = vmatpush.msrb.mxu0 %v2487_v15  ;;  %3352 = vst [vmem:[#allocation32_spill] sm:$0xff] %v2703_v9 }
 0x341   :  { %982 = vmatpush.msra.mxu3 %v2692_v34  ;;  %v2711_v34 = vld [vmem:[#allocation10 + $0x160] sm:$0xff] }
 0x342   :  { %996 = vmatpush.msra.mxu0 %v2326_v11  ;;  %v2707_v11 = vld [vmem:[#allocation10 + $0x168] sm:$0xff]  ;;  %3354 = vst [vmem:[#allocation33_spill] sm:$0xff] %v2711_v34 }
 0x343   :  { %983 = vmatpush.msra.mxu3 %v2696_v2  ;;  %3353 = vst [vmem:[#allocation60_spill] sm:$0xff] %v2707_v11 }
 0x344   :  { %997 = vmatpush.msra.mxu0 %v2330_v20 }
 0x345   :  { %1066 = vmatpush.msrb.mxu3 %v2699_v41  ;;  %v2715_v41 = vld [vmem:[#allocation10 + $0x158] sm:$0xff] }
 0x346   :  { %998 = vmatpush.msra.mxu0 %v2334_v21  ;;  %3355 = vst [vmem:[#allocation34_spill] sm:$0xff] %v2715_v41 }
 0x347   :  { %1067 = vmatpush.msrb.mxu3 %v2703_v9  ;;  %v2719_v9 = vld [vmem:[#allocation10 + $0x150] sm:$0xff] }
 0x348   :  { %999 = vmatpush.msra.mxu0 %v2497_v17  ;;  %3356 = vst [vmem:[#allocation35_spill] sm:$0xff] %v2719_v9 }
 0x349   :  { %1068 = vmatpush.msrb.mxu3 %v2707_v11  ;;  %v2723_v11 = vld [vmem:[#allocation10 + $0x148] sm:$0xff] }
 0x34a   :  { %1000 = vmatpush.msra.mxu0 %v2501_v18  ;;  %3357 = vst [vmem:[#allocation36_spill] sm:$0xff] %v2723_v11 }
 0x34b   :  { %1069 = vmatpush.msrb.mxu3 %v2711_v34  ;;  %v2727_v34 = vld [vmem:[#allocation10 + $0x140] sm:$0xff] }
 0x34c   :  { %1001 = vmatpush.msra.mxu0 %v2505_v22  ;;  %3358 = vst [vmem:[#allocation37_spill] sm:$0xff] %v2727_v34 }
 0x34d   :  { %1070 = vmatpush.msrb.mxu3 %v2715_v41  ;;  %v2731_v41 = vld [vmem:[#allocation10 + $0x138] sm:$0xff] }
 0x34e   :  { %1002 = vmatpush.msra.mxu0 %v2509_v24  ;;  %3359 = vst [vmem:[#allocation20_spill] sm:$0xff] %v2731_v41 }
 0x34f   :  { %1071 = vmatpush.msrb.mxu3 %v2719_v9  ;;  %v2735_v9 = vld [vmem:[#allocation10 + $0x130] sm:$0xff] }
 0x350   :  { %1003 = vmatpush.msra.mxu0 %v2513_v26  ;;  %3360 = vst [vmem:[#allocation40_spill] sm:$0xff] %v2735_v9 }
 0x351   :  { %1072 = vmatpush.msrb.mxu3 %v2723_v11  ;;  %v2739_v11 = vld [vmem:[#allocation10 + $0x128] sm:$0xff] }
 0x352   :  { %1004 = vmatpush.msra.mxu0 %v2517_v28  ;;  %3361 = vst [vmem:[#allocation41_spill] sm:$0xff] %v2739_v11 }
 0x353   :  { %1073 = vmatpush.msrb.mxu3 %v2727_v34  ;;  %v2743_v34 = vld [vmem:[#allocation10 + $0x120] sm:$0xff] }
 0x354   :  { %1005 = vmatpush.msra.mxu0 %v2521_v38  ;;  %3362 = vst [vmem:[#allocation43_spill] sm:$0xff] %v2743_v34 }
 0x355   :  { %1074 = vmatpush.msrb.mxu3 %v2731_v41  ;;  %v2747_v41 = vld [vmem:[#allocation10 + $0x118] sm:$0xff] }
 0x356   :  { %1006 = vmatpush.msra.mxu0 %v2525_v13  ;;  %3363 = vst [vmem:[#allocation44_spill] sm:$0xff] %v2747_v41 }
 0x357   :  { %1075 = vmatpush.msrb.mxu3 %v2735_v9  ;;  %v2751_v9 = vld [vmem:[#allocation10 + $0x110] sm:$0xff] }
 0x358   :  { %1007 = vmatpush.msra.mxu0 %v2529_v58  ;;  %3364 = vst [vmem:[#allocation61_spill] sm:$0xff] %v2751_v9 }
 0x359   :  { %1076 = vmatpush.msrb.mxu3 %v2739_v11  ;;  %v2755_v11 = vld [vmem:[#allocation10 + $0x108] sm:$0xff] }
 0x35a   :  { %1008 = vmatpush.msra.mxu0 %v2533_v49  ;;  %3365 = vst [vmem:[#allocation62_spill] sm:$0xff] %v2755_v11  ;;  %v2758_v49 = vld [vmem:[#allocation10 + $0x100] sm:$0xff] }
 0x35b   :  { %1077 = vmatpush.msrb.mxu3 %v2743_v34 }
 0x35c   :  { %1009 = vmatpush.msra.mxu0 %v2537_v14 }
 0x35d   :  { %1078 = vmatpush.msrb.mxu3 %v2747_v41 }
 0x35e   :  { %1010 = vmatpush.msra.mxu0 %v2541_v3 }
 0x35f   :  { %1079 = vmatpush.msrb.mxu3 %v2751_v9 }
 0x360   :  { %1011 = vmatpush.msra.mxu0 %v2545_v30 }
 0x361   :  { %1080 = vmatpush.msrb.mxu3 %v2755_v11 }
 0x363   :  { %1081 = vmatpush.msrb.mxu3 %v2758_v49 }
 0x398   :  { %v749_v41 = vpop.f32.mrf.mxu1 }
 0x39e   :  { %v729_v34 = vpop.f32.mrf.mxu0 }
 0x39f   :  { %v730_v14 = vadd.f32 %v2246_v47, %v729_v34  ;;  %v3367_v34 = vld [vmem:[#allocation54_spill] sm:$0xff] }
 0x3a1   :  { %v750_v58 = vadd.f32 %v749_v41, %v730_v14  ;;  %v183_v41 = vadd.f32 %v2555_v27, %v3367_v34  ;;  %v3371_v34 = vld [vmem:[#allocation47_spill] sm:$0xff] }
 0x3a3   :  { %1390 = vtanh.f32 %v750_v58 }
 0x3a5   :  { %v805_v3 = vpop.f32.mrf.mxu3 }
 0x3a6   :  { %v806_v13 = vadd.f32 %v3282_v56, %v805_v3  ;;  %v825_v9 = vpop.f32.mrf.mxu0 }
 0x3a8   :  { %v826_v38 = vadd.f32 %v825_v9, %v806_v13  ;;  %v2784_v13 = vpop.permute.xlu2 %902 }
 0x3a9   :  { %v2763_v30 = vpop.eup %1390  ;;  %vm904_vm14 = vcmp.eq.s32.totalorder %v2784_v13, 1 }
 0x3aa   :  { %3366 = vst [vmem:[#allocation63_spill] sm:$0xff] %v2763_v30  ;;  %1392 = vtanh.f32 %v826_v38  ;;  %v2769_v11 = vsel %vm668_vm12, %v2763_v30, %v2565_v19  ;;  %v3368_v19 = vld [vmem:[#allocation26_spill] sm:$0xff] }
 0x3ab   :  { %866 = vmatmul.f32.vlgmr.msrb.gmra.mxu2 %v2769_v11  ;;  %v3378_v30 = vld [vmem:[#allocation58_spill] sm:$0xff] }
 0x3ac   :  { %1044 = vmatpush.msrb.mxu2 %v2568_v60 }
 0x3ad   :  { %v895_v58 = vpop.f32.mrf.mxu3 }
 0x3ae   :  { %v898_v56 = vadd.f32 %v895_v58, %v183_v41  ;;  %1045 = vmatpush.msrb.mxu2 %v2574_v46  ;;  %v3372_v41 = vld [vmem:[#allocation27_spill] sm:$0xff]  ;;  %v3373_v58 = vld [vmem:[#allocation56_spill] sm:$0xff] }
 0x3b0   :  { %v1393_v9 = vpop.eup %1392  ;;  %1394 = vtanh.f32 %v898_v56  ;;  %1046 = vmatpush.msrb.mxu2 %v2582_v37  ;;  %v3374_v56 = vld [vmem:[#allocation29_spill] sm:$0xff] }
 0x3b1   :  { %v2780_v38 = vsel %vm786_vm13, %v1393_v9, %v2580_v1  ;;  %v3369_v1 = vld [vmem:[#allocation46_spill] sm:$0xff]  ;;  %v3375_v9 = vld [vmem:[#allocation57_spill] sm:$0xff] }
 0x3b2   :  { %846 = vmatmul.f32.vlgmr.msra.gmra.mxu1 %v2780_v38  ;;  %1047 = vmatpush.msrb.mxu2 %v2593_v43 }
 0x3b3   :  { %1024 = vmatpush.msra.mxu1 %v2413_v33 }
 0x3b4   :  { %1048 = vmatpush.msrb.mxu2 %v2600_v45 }
 0x3b5   :  { %1025 = vmatpush.msra.mxu1 %v2418_v57 }
 0x3b6   :  { %v1395_v14 = vpop.eup %1394  ;;  %1049 = vmatpush.msrb.mxu2 %v2607_v42 }
 0x3b7   :  { %v2794_v3 = vsel %vm904_vm14, %v1395_v14, %v2589_v40  ;;  %1026 = vmatpush.msra.mxu1 %v2423_v54  ;;  %v3370_v40 = vld [vmem:[#allocation28_spill] sm:$0xff]  ;;  %v3376_v14 = vld [vmem:[#allocation30_spill] sm:$0xff] }
 0x3b8   :  { %922 = vmatmul.f32.vlgmr.msrb.gmra.mxu0 %v2794_v3  ;;  %1050 = vmatpush.msrb.mxu2 %v2615_v52 }
 0x3b9   :  { %1027 = vmatpush.msra.mxu1 %v2428_v36  ;;  %1086 = vmatpush.msrb.mxu0 %v2596_v5 }
 0x3ba   :  { %942 = vmatmul.f32.vlgmr.msrb.gmra.mxu1 %v2780_v38  ;;  %1051 = vmatpush.msrb.mxu2 %v2620_v10 }
 0x3bb   :  { %1028 = vmatpush.msra.mxu1 %v2434_v4  ;;  %1087 = vmatpush.msrb.mxu0 %v2603_v35 }
 0x3bc   :  { %1052 = vmatpush.msrb.mxu2 %v2627_v63 }
 0x3bd   :  { %1029 = vmatpush.msra.mxu1 %v2439_v7  ;;  %1088 = vmatpush.msrb.mxu0 %v2610_v31 }
 0x3be   :  { %1053 = vmatpush.msrb.mxu2 %v2634_v32 }
 0x3bf   :  { %1030 = vmatpush.msra.mxu1 %v2444_v29  ;;  %1089 = vmatpush.msrb.mxu0 %v2623_v16 }
 0x3c0   :  { %1012 = vmatmul.f32.vlgmr.msra.gmra.mxu0 %v2794_v3  ;;  %1054 = vmatpush.msrb.mxu2 %v2641_v25 }
 0x3c1   :  { %1031 = vmatpush.msra.mxu1 %v2449_v39  ;;  %1090 = vmatpush.msrb.mxu0 %v2630_v23 }
 0x3c2   :  { %1055 = vmatpush.msrb.mxu2 %v2648_v48 }
 0x3c3   :  { %1032 = vmatpush.msra.mxu1 %v2454_v59  ;;  %1091 = vmatpush.msrb.mxu0 %v2637_v6 }
 0x3c4   :  { %1056 = vmatpush.msrb.mxu2 %v2655_v50 }
 0x3c5   :  { %1033 = vmatpush.msra.mxu1 %v2459_v61  ;;  %1092 = vmatpush.msrb.mxu0 %v3368_v19 }
 0x3c6   :  { %1057 = vmatpush.msrb.mxu2 %v2662_v62 }
 0x3c7   :  { %1034 = vmatpush.msra.mxu1 %v3369_v1  ;;  %1093 = vmatpush.msrb.mxu0 %v3370_v40 }
 0x3c8   :  { %1058 = vmatpush.msrb.mxu2 %v2669_v53 }
 0x3c9   :  { %1035 = vmatpush.msra.mxu1 %v3371_v34  ;;  %1094 = vmatpush.msrb.mxu0 %v3372_v41  ;;  %v3379_v41 = vld [vmem:[#allocation31_spill] sm:$0xff] }
 0x3ca   :  { %1059 = vmatpush.msrb.mxu2 %v2676_v44 }
 0x3cb   :  { %1036 = vmatpush.msra.mxu1 %v2474_v8  ;;  %1095 = vmatpush.msrb.mxu0 %v3373_v58 }
 0x3cd   :  { %1037 = vmatpush.msra.mxu1 %v2479_v0  ;;  %1096 = vmatpush.msrb.mxu0 %v3374_v56  ;;  %v3380_v56 = vld [vmem:[#allocation59_spill] sm:$0xff] }
 0x3cf   :  { %1038 = vmatpush.msra.mxu1 %v2483_v12  ;;  %1097 = vmatpush.msrb.mxu0 %v3375_v9  ;;  %v3381_v9 = vld [vmem:[#allocation32_spill] sm:$0xff] }
 0x3d1   :  { %1039 = vmatpush.msra.mxu1 %v2487_v15  ;;  %1098 = vmatpush.msrb.mxu0 %v3376_v14 }
 0x3d3   :  { %1114 = vmatpush.msrb.mxu1 %v3377_v55  ;;  %1099 = vmatpush.msrb.mxu0 %v3378_v30  ;;  %v3382_v55 = vld [vmem:[#allocation60_spill] sm:$0xff] }
 0x3d5   :  { %1115 = vmatpush.msrb.mxu1 %v2330_v20  ;;  %1100 = vmatpush.msrb.mxu0 %v3379_v41  ;;  %v3383_v20 = vld [vmem:[#allocation33_spill] sm:$0xff] }
 0x3d7   :  { %1116 = vmatpush.msrb.mxu1 %v2334_v21  ;;  %1101 = vmatpush.msrb.mxu0 %v2696_v2  ;;  %v3384_v21 = vld [vmem:[#allocation34_spill] sm:$0xff] }
 0x3d9   :  { %1117 = vmatpush.msrb.mxu1 %v2497_v17  ;;  %1184 = vmatpush.msra.mxu0 %v3380_v56  ;;  %v3385_v17 = vld [vmem:[#allocation35_spill] sm:$0xff]  ;;  %v3386_v56 = vld [vmem:[#allocation48_spill] sm:$0xff] }
 0x3db   :  { %1118 = vmatpush.msrb.mxu1 %v2501_v18  ;;  %1185 = vmatpush.msra.mxu0 %v3381_v9  ;;  %v3387_v18 = vld [vmem:[#allocation36_spill] sm:$0xff]  ;;  %v3388_v9 = vld [vmem:[#allocation49_spill] sm:$0xff] }
 0x3dd   :  { %1119 = vmatpush.msrb.mxu1 %v2505_v22  ;;  %1186 = vmatpush.msra.mxu0 %v3382_v55  ;;  %v3389_v22 = vld [vmem:[#allocation37_spill] sm:$0xff]  ;;  %v3390_v55 = vld [vmem:[#allocation50_spill] sm:$0xff] }
 0x3df   :  { %1120 = vmatpush.msrb.mxu1 %v2509_v24  ;;  %1187 = vmatpush.msra.mxu0 %v3383_v20  ;;  %v3391_v24 = vld [vmem:[#allocation20_spill] sm:$0xff]  ;;  %v3392_v20 = vld [vmem:[#allocation51_spill] sm:$0xff] }
 0x3e1   :  { %1121 = vmatpush.msrb.mxu1 %v2513_v26  ;;  %1188 = vmatpush.msra.mxu0 %v3384_v21  ;;  %v3393_v26 = vld [vmem:[#allocation40_spill] sm:$0xff] }
 0x3e2   :  { %v3394_v21 = vld [vmem:[#allocation52_spill] sm:$0xff] }
 0x3e3   :  { %1122 = vmatpush.msrb.mxu1 %v2517_v28  ;;  %1189 = vmatpush.msra.mxu0 %v3385_v17  ;;  %v3395_v28 = vld [vmem:[#allocation41_spill] sm:$0xff] }
 0x3e4   :  { %v3396_v17 = vld [vmem:[#allocation53_spill] sm:$0xff] }
 0x3e5   :  { %1123 = vmatpush.msrb.mxu1 %v3386_v56  ;;  %1190 = vmatpush.msra.mxu0 %v3387_v18  ;;  %v3397_v56 = vld [vmem:[#allocation43_spill] sm:$0xff]  ;;  %v3398_v18 = vld [vmem:[#allocation18_spill] sm:$0xff] }
 0x3e7   :  { %1124 = vmatpush.msrb.mxu1 %v3388_v9  ;;  %1191 = vmatpush.msra.mxu0 %v3389_v22  ;;  %v3399_v9 = vld [vmem:[#allocation44_spill] sm:$0xff]  ;;  %v3400_v22 = vld [vmem:[#allocation61_spill] sm:$0xff] }
 0x3e9   :  { %1125 = vmatpush.msrb.mxu1 %v3390_v55  ;;  %1192 = vmatpush.msra.mxu0 %v3391_v24  ;;  %v3401_v55 = vld [vmem:[#allocation62_spill] sm:$0xff] }
 0x3eb   :  { %1126 = vmatpush.msrb.mxu1 %v3392_v20  ;;  %1193 = vmatpush.msra.mxu0 %v3393_v26 }
 0x3ed   :  { %1127 = vmatpush.msrb.mxu1 %v3394_v21  ;;  %1194 = vmatpush.msra.mxu0 %v3395_v28 }
 0x3ef   :  { %1128 = vmatpush.msrb.mxu1 %v3396_v17  ;;  %1195 = vmatpush.msra.mxu0 %v3397_v56  ;;  %v2875_v17 = vld [vmem:[%s3012_s6] ss:$0 sm:$0xff] }
 0x3f1   :  { %1129 = vmatpush.msrb.mxu1 %v3398_v18  ;;  %1196 = vmatpush.msra.mxu0 %v3399_v9 }
 0x3f3   :  { %1197 = vmatpush.msra.mxu0 %v3400_v22 }
 0x3f5   :  { %1198 = vmatpush.msra.mxu0 %v3401_v55 }
 0x3f7   :  { %1199 = vmatpush.msra.mxu0 %v2758_v49  ;;  %v3402_v49 = vld [vmem:[#allocation38_spill] sm:$0xff] }
 0x3f8   :  { %v186_v55 = vadd.f32 %v2555_v27, %v3402_v49 }
 0x42e   :  { %v867_v26 = vpop.f32.mrf.mxu2 }
 0x42f   :  { %v847_v24 = vpop.f32.mrf.mxu1 }
 0x430   :  { %v848_v20 = vadd.f32 %v2246_v47, %v847_v24 }
 0x432   :  { %v868_v21 = vadd.f32 %v867_v26, %v848_v20 }
 0x434   :  { %1396 = vtanh.f32 %v868_v21 }
 0x435   :  { %v923_v28 = vpop.f32.mrf.mxu0 }
 0x436   :  { %v924_v56 = vadd.f32 %v2875_v17, %v923_v28 }
 0x437   :  { %v943_v18 = vpop.f32.mrf.mxu1 }
 0x438   :  { %v944_v9 = vadd.f32 %v943_v18, %v924_v56 }
 0x43a   :  { %v2878_v22 = vpop.eup %1396  ;;  %1398 = vtanh.f32 %v944_v9 }
 0x43b   :  { %v2884_v47 = vsel %vm786_vm13, %v2878_v22, %v2769_v11  ;;  %v2898_v11 = vpop.permute.xlu0 %1020 }
 0x43c   :  { %984 = vmatmul.f32.vlgmr.msra.gmra.mxu3 %v2884_v47  ;;  %vm1022_vm15 = vcmp.eq.s32.totalorder %v2898_v11, 1 }
 0x43d   :  { %v1013_v24 = vpop.f32.mrf.mxu0  ;;  %1162 = vmatpush.msra.mxu3 %v2568_v60 }
 0x43e   :  { %v1016_v20 = vadd.f32 %v1013_v24, %v186_v55  ;;  %v1365_v55 = vld [vmem:[%s3014_s8] ss:$0 sm:$0xff]  ;;  %s1659_s8 = smov [#allocation13]  }
 0x43f   :  { %1163 = vmatpush.msra.mxu3 %v2574_v46  ;;  %s1309_s25 = sshll.u32 %s1659_s8, 4  ;;  %s1310_s25 = int_to_ptr.vmem [resolvable:$true] %s1309_s25 }
 0x440   :  { %v1399_v26 = vpop.eup %1398  ;;  %1400 = vtanh.f32 %v1016_v20 }
 0x441   :  { %v2894_v21 = vsel %vm904_vm14, %v1399_v26, %v2780_v38  ;;  %1164 = vmatpush.msra.mxu3 %v2582_v37  ;;  %v2957_v37 = vld [vmem:[%s3012_s6 + $0x1] ss:$0 sm:$0xff] }
 0x442   :  { %964 = vmatmul.f32.vlgmr.msra.gmra.mxu2 %v2894_v21 }
 0x443   :  { %1142 = vmatpush.msra.mxu2 %v2413_v33  ;;  %1165 = vmatpush.msra.mxu3 %v2593_v43  ;;  %v1250_v33 = vld [vmem:[#allocation12 + $0x70] sm:$0xff] }
 0x445   :  { %1143 = vmatpush.msra.mxu2 %v2418_v57  ;;  %1166 = vmatpush.msra.mxu3 %v2600_v45  ;;  %v1249_v57 = vld [vmem:[#allocation12 + $0x68] sm:$0xff] }
 0x446   :  { %v1401_v60 = vpop.eup %1400 }
 0x447   :  { %v2908_v46 = vsel %vm1022_vm15, %v1401_v60, %v2794_v3  ;;  %1144 = vmatpush.msra.mxu2 %v2423_v54  ;;  %1167 = vmatpush.msra.mxu3 %v2607_v42  ;;  %v1248_v54 = vld [vmem:[#allocation12 + $0x60] sm:$0xff] }
 0x448   :  { %1040 = vmatmul.f32.vlgmr.msra.gmra.mxu1 %v2908_v46 }
 0x449   :  { %1145 = vmatpush.msra.mxu2 %v2428_v36  ;;  %1168 = vmatpush.msra.mxu3 %v2615_v52  ;;  %v1247_v36 = vld [vmem:[#allocation12 + $0x58] sm:$0xff] }
 0x44a   :  { %1060 = vmatmul.f32.vlgmr.msrb.gmra.mxu2 %v2894_v21  ;;  %1204 = vmatpush.msra.mxu1 %v2596_v5 }
 0x44b   :  { %1146 = vmatpush.msra.mxu2 %v2434_v4  ;;  %1169 = vmatpush.msra.mxu3 %v2620_v10  ;;  %v1246_v4 = vld [vmem:[#allocation12 + $0x50] sm:$0xff] }
 0x44c   :  { %1205 = vmatpush.msra.mxu1 %v2603_v35  ;;  %v3406_v35 = vld [vmem:[#allocation39_spill] sm:$0xff] }
 0x44d   :  { %1147 = vmatpush.msra.mxu2 %v2439_v7  ;;  %1170 = vmatpush.msra.mxu3 %v2627_v63  ;;  %v1245_v7 = vld [vmem:[#allocation12 + $0x48] sm:$0xff]  ;;  %v189_v42 = vadd.f32 %v2555_v27, %v3406_v35 }
 0x44e   :  { %1206 = vmatpush.msra.mxu1 %v2610_v31 }
 0x44f   :  { %1148 = vmatpush.msra.mxu2 %v2444_v29  ;;  %1171 = vmatpush.msra.mxu3 %v2634_v32  ;;  %v1244_v29 = vld [vmem:[#allocation12 + $0x40] sm:$0xff] }
 0x450   :  { %1130 = vmatmul.f32.vlgmr.msrb.gmra.mxu1 %v2908_v46 }
 0x451   :  { %1149 = vmatpush.msra.mxu2 %v2449_v39  ;;  %1172 = vmatpush.msra.mxu3 %v2641_v25  ;;  %v1243_v39 = vld [vmem:[#allocation12 + $0x38] sm:$0xff] }
 0x452   :  { %1207 = vmatpush.msra.mxu1 %v2623_v16 }
 0x453   :  { %1150 = vmatpush.msra.mxu2 %v2454_v59  ;;  %1173 = vmatpush.msra.mxu3 %v2648_v48  ;;  %v3403_v48 = vld [vmem:[#allocation27_spill] sm:$0xff]  ;;  %v1242_v59 = vld [vmem:[#allocation12 + $0x30] sm:$0xff] }
 0x454   :  { %1208 = vmatpush.msra.mxu1 %v2630_v23 }
 0x455   :  { %1151 = vmatpush.msra.mxu2 %v2459_v61  ;;  %1174 = vmatpush.msra.mxu3 %v2655_v50  ;;  %v3405_v50 = vld [vmem:[#allocation57_spill] sm:$0xff]  ;;  %v1241_v61 = vld [vmem:[#allocation12 + $0x28] sm:$0xff] }
 0x456   :  { %1209 = vmatpush.msra.mxu1 %v2637_v6  ;;  %v1139_v6 = vpop.permute.xlu1 %1138 }
 0x457   :  { %1152 = vmatpush.msra.mxu2 %v3369_v1  ;;  %1175 = vmatpush.msra.mxu3 %v2662_v62  ;;  %v3404_v62 = vld [vmem:[#allocation29_spill] sm:$0xff]  ;;  %vm1140_vm0 = vcmp.eq.s32.totalorder %v1139_v6, 1 }
 0x458   :  { %1210 = vmatpush.msra.mxu1 %v3368_v19  ;;  %v3407_v19 = vld [vmem:[#allocation21_spill] sm:$0xff] }
 0x459   :  { %1153 = vmatpush.msra.mxu2 %v3371_v34  ;;  %1176 = vmatpush.msra.mxu3 %v2669_v53 }
 0x45a   :  { %1211 = vmatpush.msra.mxu1 %v3370_v40  ;;  %v3409_v40 = vld [vmem:[#allocation42_spill] sm:$0xff] }
 0x45b   :  { %1154 = vmatpush.msra.mxu2 %v2474_v8  ;;  %1177 = vmatpush.msra.mxu3 %v2676_v44  ;;  %v1251_v44 = vld [vmem:[#allocation12 + $0x78] sm:$0xff] }
 0x45c   :  { %1212 = vmatpush.msra.mxu1 %v3403_v48  ;;  %v1239_v8 = vld [vmem:[#allocation12 + $0x18] sm:$0xff] }
 0x45d   :  { %1155 = vmatpush.msra.mxu2 %v2479_v0  ;;  %v1238_v0 = vld [vmem:[#allocation12 + $0x10] sm:$0xff] }
 0x45e   :  { %1213 = vmatpush.msra.mxu1 %v3373_v58 }
 0x45f   :  { %1156 = vmatpush.msra.mxu2 %v2483_v12  ;;  %v1237_v12 = vld [vmem:[#allocation12 + $0x8] sm:$0xff] }
 0x460   :  { %1214 = vmatpush.msra.mxu1 %v3404_v62 }
 0x461   :  { %1157 = vmatpush.msra.mxu2 %v2487_v15  ;;  %v1236_v15 = vld [vmem:[#allocation12] sm:$0xff] }
 0x462   :  { %1215 = vmatpush.msra.mxu1 %v3405_v50 }
 0x463   :  { %1256 = vmatpush.msrb.mxu2 %v1251_v44 }
 0x464   :  { %1216 = vmatpush.msra.mxu1 %v3376_v14  ;;  %v3413_v14 = vld [vmem:[#allocation63_spill] sm:$0xff] }
 0x465   :  { %1257 = vmatpush.msrb.mxu2 %v1250_v33 }
 0x466   :  { %1217 = vmatpush.msra.mxu1 %v3378_v30 }
 0x467   :  { %1258 = vmatpush.msrb.mxu2 %v1249_v57 }
 0x468   :  { %1218 = vmatpush.msra.mxu1 %v3379_v41  ;;  %v3411_v41 = vld [vmem:[#allocation24_spill] sm:$0xff] }
 0x469   :  { %1259 = vmatpush.msrb.mxu2 %v1248_v54 }
 0x46a   :  { %1219 = vmatpush.msra.mxu1 %v2696_v2  ;;  %v1240_v2 = vld [vmem:[#allocation12 + $0x20] sm:$0xff] }
 0x46b   :  { %1260 = vmatpush.msrb.mxu2 %v1247_v36 }
 0x46d   :  { %1261 = vmatpush.msrb.mxu2 %v1246_v4 }
 0x46f   :  { %1262 = vmatpush.msrb.mxu2 %v1245_v7 }
 0x471   :  { %1263 = vmatpush.msrb.mxu2 %v1244_v29 }
 0x473   :  { %1264 = vmatpush.msrb.mxu2 %v1243_v39 }
 0x475   :  { %1265 = vmatpush.msrb.mxu2 %v1242_v59 }
 0x477   :  { %1266 = vmatpush.msrb.mxu2 %v1241_v61 }
 0x479   :  { %1267 = vmatpush.msrb.mxu2 %v1240_v2 }
 0x47b   :  { %1268 = vmatpush.msrb.mxu2 %v1239_v8 }
 0x47d   :  { %1269 = vmatpush.msrb.mxu2 %v1238_v0 }
 0x47f   :  { %1270 = vmatpush.msrb.mxu2 %v1237_v12 }
 0x481   :  { %1271 = vmatpush.msrb.mxu2 %v1236_v15 }
 0x4bf   :  { %v985_v5 = vpop.f32.mrf.mxu3 }
 0x4c5   :  { %v965_v30 = vpop.f32.mrf.mxu2  ;;  %v1041_v53 = vpop.f32.mrf.mxu1 }
 0x4c6   :  { %v966_v43 = vadd.f32 %v2957_v37, %v965_v30  ;;  %v1042_v31 = vadd.f32 %v2875_v17, %v1041_v53 }
 0x4c8   :  { %v986_v45 = vadd.f32 %v985_v5, %v966_v43 }
 0x4ca   :  { %1402 = vtanh.f32 %v986_v45 }
 0x4cd   :  { %v1061_v52 = vpop.f32.mrf.mxu2  ;;  %v1131_v10 = vpop.f32.mrf.mxu1 }
 0x4ce   :  { %v1062_v16 = vadd.f32 %v1061_v52, %v1042_v31  ;;  %v1134_v63 = vadd.f32 %v1131_v10, %v189_v42 }
 0x4d0   :  { %v1403_v23 = vpop.eup %1402  ;;  %1404 = vtanh.f32 %v1062_v16 }
 0x4d1   :  { %1406 = vtanh.f32 %v1134_v63  ;;  %v989_v32 = vsel %vm904_vm14, %v1403_v23, %v2884_v47 }
 0x4d2   :  { %1102 = vmatmul.f32.vlgmr.msrb.gmra.mxu0 %v989_v32 }
 0x4d6   :  { %v1405_v25 = vpop.eup %1404 }
 0x4d7   :  { %v1407_v38 = vpop.eup %1406  ;;  %v1065_v27 = vsel %vm1022_vm15, %v1405_v25, %v2894_v21 }
 0x4d8   :  { %1082 = vmatmul.f32.vlgmr.msrb.gmra.mxu3 %v1065_v27  ;;  %v1141_v3 = vsel %vm1140_vm0, %v1407_v38, %v2908_v46 }
 0x4d9   :  { %1158 = vmatmul.f32.vlgmr.msra.gmra.mxu2 %v1141_v3 }
 0x4e0   :  { %1178 = vmatmul.f32.vlgmr.msra.gmra.mxu3 %v1065_v27 }
 0x4e1   :  { %1339 = vmatmul.msk.f32.vlgmr.msrb.gmra.mxu2 %vm310_vm4, %v3407_v19 }
 0x4e9   :  { %1340 = vmatmul.msk.f32.gmra.mxu2 %vm432_vm8, %v3409_v40 }
 0x4f1   :  { %1341 = vmatmul.msk.f32.gmra.mxu2 %vm550_vm9, %v3411_v41 }
 0x4f9   :  { %1342 = vmatmul.msk.f32.gmra.mxu2 %vm668_vm12, %v3413_v14 }
 0x501   :  { %1343 = vmatmul.msk.f32.gmra.mxu2 %vm786_vm13, %v2878_v22 }
 0x509   :  { %1344 = vmatmul.msk.f32.gmra.mxu2 %vm904_vm14, %v1403_v23 }
 0x54f   :  { %v1103_v47 = vpop.f32.mrf.mxu0 }
 0x55b   :  { %v1083_v56 = vpop.f32.mrf.mxu3 }
 0x55c   :  { %v1084_v18 = vadd.f32 %v2957_v37, %v1083_v56  ;;  %v1159_v9 = vpop.f32.mrf.mxu2 }
 0x55d   :  { %v1160_v24 = vadd.f32 %v2875_v17, %v1159_v9 }
 0x55e   :  { %v1104_v49 = vadd.f32 %v1103_v47, %v1084_v18 }
 0x560   :  { %1408 = vtanh.f32 %v1104_v49 }
 0x563   :  { %v1179_v20 = vpop.f32.mrf.mxu3 }
 0x564   :  { %v1180_v26 = vadd.f32 %v1179_v20, %v1160_v24  ;;  %v1273_v51 = vpop.f32.mrf.mxu2 }
 0x565   :  { %v1274_v22 = vadd.f32 %v1365_v55, %v1273_v51 }
 0x566   :  { %v1409_v21 = vpop.eup %1408  ;;  %1410 = vtanh.f32 %v1180_v26 }
 0x567   :  { %1297 = vst [vmem:[#allocation13] sm:$0xff] %v1274_v22  ;;  %1345 = vmatmul.msk.f32.gmra.mxu2 %vm1022_vm15, %v1409_v21  ;;  %v1107_v13 = vsel %vm1022_vm15, %v1409_v21, %v989_v32 }
 0x568   :  { %1220 = vmatmul.f32.vlgmr.msra.gmra.mxu1 %v1107_v13 }
 0x56c   :  { %v1411_v60 = vpop.eup %1410  ;;  %v1276_v46 = vpop.f32.mrf.mxu2 }
 0x56d   :  { %v1277_v48 = vadd.f32 %v1365_v55, %v1276_v46  ;;  %v1183_v62 = vsel %vm1140_vm0, %v1411_v60, %v1065_v27 }
 0x56e   :  { %1200 = vmatmul.f32.vlgmr.msra.gmra.mxu0 %v1183_v62 }
 0x56f   :  { %1298 = vst [vmem:[#allocation13 + $0x8] sm:$0xff] %v1277_v48 }
 0x574   :  { %v1279_v17 = vpop.f32.mrf.mxu2 }
 0x575   :  { %v1280_v50 = vadd.f32 %v1365_v55, %v1279_v17 }
 0x577   :  { %1299 = vst [vmem:[#allocation13 + $0x10] sm:$0xff] %v1280_v50 }
 0x57c   :  { %v1282_v44 = vpop.f32.mrf.mxu2 }
 0x57d   :  { %v1283_v33 = vadd.f32 %v1365_v55, %v1282_v44 }
 0x57f   :  { %1300 = vst [vmem:[#allocation13 + $0x18] sm:$0xff] %v1283_v33 }
 0x584   :  { %v1285_v57 = vpop.f32.mrf.mxu2 }
 0x585   :  { %v1286_v54 = vadd.f32 %v1365_v55, %v1285_v57 }
 0x587   :  { %1301 = vst [vmem:[#allocation13 + $0x20] sm:$0xff] %v1286_v54 }
 0x58c   :  { %v1288_v36 = vpop.f32.mrf.mxu2 }
 0x58d   :  { %v1289_v11 = vadd.f32 %v1365_v55, %v1288_v36 }
 0x58f   :  { %1302 = vst [vmem:[#allocation13 + $0x28] sm:$0xff] %v1289_v11 }
 0x5e5   :  { %v1221_v59 = vpop.f32.mrf.mxu1 }
 0x5ea   :  { %v1291_v4 = vpop.f32.mrf.mxu2 }
 0x5eb   :  { %v1292_v7 = vadd.f32 %v1365_v55, %v1291_v4  ;;  %v1201_v29 = vpop.f32.mrf.mxu0 }
 0x5ec   :  { %v1202_v39 = vadd.f32 %v2957_v37, %v1201_v29 }
 0x5ed   :  { %1303 = vst [vmem:[#allocation13 + $0x30] sm:$0xff] %v1292_v7 }
 0x5ee   :  { %v1222_v61 = vadd.f32 %v1221_v59, %v1202_v39 }
 0x5f0   :  { %1412 = vtanh.f32 %v1222_v61 }
 0x5f6   :  { %v1413_v2 = vpop.eup %1412 }
 0x5f7   :  { %1346 = vmatmul.msk.f32.gmra.mxu2 %vm1140_vm0, %v1413_v2 }
 0x67a   :  { %v1294_v8 = vpop.f32.mrf.mxu2 }
 0x67b   :  { %v1295_v0 = vadd.f32 %v1365_v55, %v1294_v8 }
 0x67d   :  { %1304 = vst [vmem:[#allocation13 + $0x38] sm:$0xff] %v1295_v0 }
 0x67e   :  { %1317 = dma.vmem_to_hbm [thread:$0]  %s1310_s25, 1024, %s1312_s1, [#allocation6], %s1651_s17, %s1651_s17, %s1652_s18  }
 0x67f   :  { %1648 = dma.done.wait [#allocation6], 1024  }
 0x680   :  { %1649 = vsyncadd [#allocation6], 4294966272 }
 0x681   :  { %1322 = vsyncpa [#allocation5], 1 }
 0x682   :  { %1323 = vsyncpa [#allocation8], 1 }
 0x683   :  { %1324 = vsyncpa [#allocation11], 1 }
 0x684   :  { %1325 = vsyncpa [#allocation6], 1 }

</bundles_post_ra>
